<compile_context>
chip_gen: v7x
topology: tpu7x:2x2x1
jax: 0.10.0
libtpu: 0.0.40
codegen_flags: <defaults>
</compile_context>

<pallas_src>
import math

import jax
import jax.numpy as jnp
from jax.experimental import pallas as pl
from jax.experimental.pallas import tpu as pltpu

NEG_SLOPE = 0.2
BN_EPS = 1e-5
INV_SQRT2 = 1.0 / math.sqrt(2.0)


# --------------------------------------------------------------------------
# helpers used inside the kernel
# --------------------------------------------------------------------------

def _leaky(x):
    return jnp.where(x >= 0, x, NEG_SLOPE * x)


def _dot(a, w):
    """MXU matmul: bf16 operands, f32 accumulation."""
    return jnp.dot(a.astype(jnp.bfloat16), w, preferred_element_type=jnp.float32)


def _conv_k3_s1(x, w_ref, pad_ref):
    """Conv1d(k=3, s=1, p=1, bias=False), channels-last, as 3 MXU matmuls.

    x: (L, Cin) f32, w_ref: (3*Cin, Cout) bf16 (tap-major), pad_ref: (L+2, Cin)
    f32 VMEM scratch holding the zero-padded activation.
    """
    L, C = x.shape
    Co = w_ref.shape[-1]
    pad_ref[0:1, :] = jnp.zeros((1, C), jnp.float32)
    pad_ref[1:L + 1, :] = x
    pad_ref[L + 1:L + 2, :] = jnp.zeros((1, C), jnp.float32)
    acc = jnp.zeros((L, Co), jnp.float32)
    for k in range(3):
        acc = acc + _dot(pad_ref[k:k + L, :], w_ref[k * C:(k + 1) * C, :])
    return acc


def _conv_k4_s2(x, w_ref, pad_ref):
    """Conv1d(k=4, s=2, p=1, bias=False), channels-last, as 4 MXU matmuls.

    Stride-2 taps are read from the VMEM scratch with strided loads
    (pl.ds(..., stride=2)); nothing strided ever touches HBM.
    """
    L, C = x.shape
    Lo = L // 2
    Co = w_ref.shape[-1]
    pad_ref[0:1, :] = jnp.zeros((1, C), jnp.float32)
    pad_ref[1:L + 1, :] = x
    pad_ref[L + 1:L + 2, :] = jnp.zeros((1, C), jnp.float32)
    acc = jnp.zeros((Lo, Co), jnp.float32)
    for k in range(4):
        acc = acc + _dot(pad_ref[pl.ds(k, Lo, stride=2), :],
                         w_ref[k * C:(k + 1) * C, :])
    return acc


def _bn_residual(d_list, s_list, gamma, beta):
    """Training-mode BatchNorm1d over (batch, length) + residual, / sqrt(2)."""
    n = float(len(d_list) * d_list[0].shape[0])
    s1 = s2 = None
    for d in d_list:
        r1 = jnp.sum(d, axis=0, keepdims=True)
        r2 = jnp.sum(d * d, axis=0, keepdims=True)
        s1 = r1 if s1 is None else s1 + r1
        s2 = r2 if s2 is None else s2 + r2
    mean = s1 / n
    var = s2 / n - mean * mean               # biased variance (torch train mode)
    scale = jax.lax.rsqrt(var + BN_EPS) * gamma
    return [((d - mean) * scale + beta + s) * INV_SQRT2
            for d, s in zip(d_list, s_list)]


# --------------------------------------------------------------------------
# the fused forward kernel (single pallas_call for the whole model)
# --------------------------------------------------------------------------

def _discriminator_kernel(
    emb_ref, x_ref,
    tw1_ref, tb1_ref, tw2_ref, tb2_ref,
    wc0_ref,
    d1_wc_ref, d1_ds1_ref, d1_ds2_ref, d1_dw_ref, d1_db_ref, d1_g_ref, d1_b_ref,
    d2_wc_ref, d2_ds1_ref, d2_ds2_ref, d2_dw_ref, d2_db_ref, d2_g_ref, d2_b_ref,
    hw_ref, hb_ref,
    out_ref,
    pad_x0, pad_d1a, pad_d1c, pad_d1h, pad_d2a, pad_d2c, pad_d2h,
):
    B = x_ref.shape[0]

    # ---- time MLP + per-block temb projections (all on the MXU) -----------
    t = _leaky(_dot(emb_ref[...], tw1_ref[...]) + tb1_ref[...])
    t = _leaky(_dot(t, tw2_ref[...]) + tb2_ref[...])
    temb1 = _dot(t, d1_dw_ref[...]) + d1_db_ref[...]          # (B, C1)
    temb2 = _dot(t, d2_dw_ref[...]) + d2_db_ref[...]          # (B, C2)

    # ---- conv1 + down1 (per batch row; BN couples the whole batch) --------
    d_list, s_list = [], []
    for b in range(B):
        h = _conv_k3_s1(x_ref[b], wc0_ref, pad_x0)            # discriminator.conv1
        a = _leaky(h)                                         # DownBlock.act(input)
        c = _leaky(_conv_k3_s1(a, d1_wc_ref, pad_d1a) + temb1[b:b + 1, :])
        d_list.append(_conv_k4_s2(c, d1_ds1_ref, pad_d1c))    # Downsample1
        s_list.append(_conv_k4_s2(h, d1_ds2_ref, pad_d1h))    # Downsample2 (skip)
    out1 = _bn_residual(d_list, s_list, d1_g_ref[...], d1_b_ref[...])

    # ---- down2 -------------------------------------------------------------
    d_list, s_list = [], []
    for b in range(B):
        h = out1[b]
        a = _leaky(h)
        c = _leaky(_conv_k3_s1(a, d2_wc_ref, pad_d2a) + temb2[b:b + 1, :])
        d_list.append(_conv_k4_s2(c, d2_ds1_ref, pad_d2c))
        s_list.append(_conv_k4_s2(h, d2_ds2_ref, pad_d2h))
    out2 = _bn_residual(d_list, s_list, d2_g_ref[...], d2_b_ref[...])

    # ---- tail: leaky + sum over length, fused two-head linear --------------
    hw = hw_ref[...]
    hb = hb_ref[...]
    for b in range(B):
        feat = jnp.sum(_leaky(out2[b]), axis=0, keepdims=True)  # (1, C2)
        out_ref[b:b + 1, :] = _dot(feat, hw) + hb               # (1, n_heads)


# --------------------------------------------------------------------------
# parameters & one-time weight re-layout
# --------------------------------------------------------------------------

def sinusoidal_pos_emb(t, dim):
    half = dim // 2
    scale = math.log(10000.0) / (half - 1)
    freqs = jnp.exp(jnp.arange(half, dtype=jnp.float32) * -scale)
    args = t[:, None].astype(jnp.float32) * freqs[None, :]
    return jnp.concatenate([jnp.sin(args), jnp.cos(args)], axis=-1)


def init_params(key, nc, ndf, init_ch=8, time_dim=32, out_class=1):
    keys = iter(jax.random.split(key, 64))

    def lin(out_f, in_f):
        kw, kb = jax.random.split(next(keys))
        w = jax.random.normal(kw, (out_f, in_f), jnp.float32) / math.sqrt(in_f)
        b = jax.random.normal(kb, (out_f,), jnp.float32) * 0.01
        return w, b

    def conv(out_c, in_c, ksz):
        return (jax.random.normal(next(keys), (out_c, in_c, ksz), jnp.float32)
                / math.sqrt(in_c * ksz))

    p = {}
    p["t_w1"], p["t_b1"] = lin(time_dim, init_ch)
    p["t_w2"], p["t_b2"] = lin(time_dim, time_dim)
    p["conv1"] = conv(ndf, nc, 3)

    def downblock(in_c, out_c):
        d = {}
        d["conv1"] = conv(out_c, in_c, 3)
        d["ds1"] = conv(out_c, out_c, 4)
        d["ds2"] = conv(out_c, in_c, 4)
        d["dense_w"], d["dense_b"] = lin(out_c, time_dim)
        d["bn_gamma"] = jnp.ones((out_c,), jnp.float32)
        d["bn_beta"] = jnp.zeros((out_c,), jnp.float32)
        return d

    p["down1"] = downblock(ndf, ndf * 2)
    p["down2"] = downblock(ndf * 2, ndf * 4)
    # TODO(synk): down3 / conv2(Sigmoid) exist in __init__ but are unused by
    # forward(); omitted here.
    p["end_w"], p["end_b"] = lin(out_class, ndf * 4)
    p["real_w"], p["real_b"] = lin(1, ndf * 4)
    return p


def _conv_weight_mat(w):
    """(Cout, Cin, K) torch Conv1d weight -> (K*Cin, Cout) tap-major matrix."""
    cout, cin, k = w.shape
    return jnp.transpose(w, (2, 1, 0)).reshape(k * cin, cout)


def prepare_params(p):
    """One-time weight re-layout + bf16 cast (hoisted out of the hot path)."""
    bf = lambda a: jnp.asarray(a, jnp.bfloat16)
    f32 = lambda a: jnp.asarray(a, jnp.float32)

    def block(d):
        return dict(
            conv1=bf(_conv_weight_mat(d["conv1"])),
            ds1=bf(_conv_weight_mat(d["ds1"])),
            ds2=bf(_conv_weight_mat(d["ds2"])),
            dense_w=bf(d["dense_w"].T),
            dense_b=f32(d["dense_b"][None, :]),
            gamma=f32(d["bn_gamma"][None, :]),
            beta=f32(d["bn_beta"][None, :]),
        )

    return dict(
        t_w1=bf(p["t_w1"].T), t_b1=f32(p["t_b1"][None, :]),
        t_w2=bf(p["t_w2"].T), t_b2=f32(p["t_b2"][None, :]),
        conv1=bf(_conv_weight_mat(p["conv1"])),
        down1=block(p["down1"]),
        down2=block(p["down2"]),
        head_w=bf(jnp.concatenate([p["end_w"], p["real_w"]], axis=0).T),
        head_b=f32(jnp.concatenate([p["end_b"], p["real_b"]])[None, :]),
    )


# --------------------------------------------------------------------------
# forward wrapper
# --------------------------------------------------------------------------

def discriminator_forward(prep, x, time, x_t):
    B, _, L = x.shape
    assert L % 4 == 0, "two stride-2 downsamples require L % 4 == 0"

    xcat = jnp.concatenate([x, x_t], axis=1)                   # (B, nc, L)
    xcl = jnp.transpose(xcat, (0, 2, 1)).astype(jnp.float32)   # channels-last
    init_ch = prep["t_w1"].shape[0]
    emb = sinusoidal_pos_emb(time, init_ch)                    # (B, init_ch)

    nc = xcl.shape[-1]
    ndf = prep["conv1"].shape[1]
    C1 = prep["down1"]["conv1"].shape[1]
    C2 = prep["down2"]["conv1"].shape[1]
    n_out = prep["head_w"].shape[1]
    L2 = L // 2

    args = (
        emb, xcl,
        prep["t_w1"], prep["t_b1"], prep["t_w2"], prep["t_b2"],
        prep["conv1"],
        prep["down1"]["conv1"], prep["down1"]["ds1"], prep["down1"]["ds2"],
        prep["down1"]["dense_w"], prep["down1"]["dense_b"],
        prep["down1"]["gamma"], prep["down1"]["beta"],
        prep["down2"]["conv1"], prep["down2"]["ds1"], prep["down2"]["ds2"],
        prep["down2"]["dense_w"], prep["down2"]["dense_b"],
        prep["down2"]["gamma"], prep["down2"]["beta"],
        prep["head_w"], prep["head_b"],
    )

    def _full(a):
        nd = a.ndim
        return pl.BlockSpec(a.shape, lambda i, nd=nd: (0,) * nd)

    heads = pl.pallas_call(
        _discriminator_kernel,
        out_shape=jax.ShapeDtypeStruct((B, n_out), jnp.float32),
        grid=(1,),  # whole forward fits in a few KB of VMEM; BN couples the batch
        in_specs=[_full(a) for a in args],
        out_specs=pl.BlockSpec((B, n_out), lambda i: (0, 0)),
        scratch_shapes=[
            pltpu.VMEM((L + 2, nc), jnp.float32),    # padded conv1 input
            pltpu.VMEM((L + 2, ndf), jnp.float32),   # padded down1 main-path act
            pltpu.VMEM((L + 2, C1), jnp.float32),    # padded down1 pre-downsample
            pltpu.VMEM((L + 2, ndf), jnp.float32),   # padded down1 skip-path input
            pltpu.VMEM((L2 + 2, C1), jnp.float32),   # padded down2 main-path act
            pltpu.VMEM((L2 + 2, C2), jnp.float32),   # padded down2 pre-downsample
            pltpu.VMEM((L2 + 2, C1), jnp.float32),   # padded down2 skip-path input
        ],
        compiler_params=pltpu.CompilerParams(
            dimension_semantics=("arbitrary",)),
    )(*args)

    n_class = n_out - 1
    return heads[:, :n_class], heads[:, n_class:]


# --------------------------------------------------------------------------
# pure-JAX reference (mirrors the PyTorch ops) for validation
# --------------------------------------------------------------------------

def _q(v):
    """Round to bf16 operand precision (what the MXU sees), back to f32."""
    return v.astype(jnp.bfloat16).astype(jnp.float32)


def reference_forward(params, x, time, x_t):
    def conv1d(h, w, stride, padding):
        return jax.lax.conv_general_dilated(
            _q(h), _q(w), window_strides=(stride,),
            padding=[(padding, padding)],
            dimension_numbers=("NCH", "OIH", "NCH"))

    def linear(h, w, b):
        return jnp.dot(_q(h), _q(w.T)) + b

    def bn(h, gamma, beta):
        mean = jnp.mean(h, axis=(0, 2), keepdims=True)
        var = jnp.mean(jnp.square(h - mean), axis=(0, 2), keepdims=True)
        return ((h - mean) * jax.lax.rsqrt(var + BN_EPS)
                * gamma[None, :, None] + beta[None, :, None])

    def down(h, t, d):
        a = _leaky(h)
        c = conv1d(a, d["conv1"], 1, 1)
        c = _leaky(c + linear(t, d["dense_w"], d["dense_b"])[..., None])
        out = bn(conv1d(c, d["ds1"], 2, 1), d["bn_gamma"], d["bn_beta"])
        skip = conv1d(h, d["ds2"], 2, 1)
        return (out + skip) * INV_SQRT2

    xcat = jnp.concatenate([x, x_t], axis=1)
    emb = sinusoidal_pos_emb(time, params["t_w1"].shape[1])
    t = _leaky(linear(emb, params["t_w1"], params["t_b1"]))
    t = _leaky(linear(t, params["t_w2"], params["t_b2"]))
    out = conv1d(xcat, params["conv1"], 1, 1)
    out = down(out, t, params["down1"])
    out = down(out, t, params["down2"])
    feat = jnp.sum(_leaky(out), axis=2)
    return (linear(feat, params["end_w"], params["end_b"]),
            linear(feat, params["real_w"], params["real_b"]))


# --------------------------------------------------------------------------

if __name__ == "__main__":
    B, L = 2, 16
    nc_half = 2                  # x and x_t each carry nc/2 channels
    nc = 2 * nc_half
    ndf = 8
    init_ch = 8                  # module default init_ch=1 is self-inconsistent

    key = jax.random.PRNGKey(0)
    kp, kx, kxt, kt = jax.random.split(key, 4)
    params = init_params(kp, nc=nc, ndf=ndf, init_ch=init_ch)
    prep = prepare_params(params)          # one-time weight re-layout (hoisted)

    x = jax.random.normal(kx, (B, nc_half, L), jnp.float32)
    x_t = jax.random.normal(kxt, (B, nc_half, L), jnp.float32)
    time = jax.random.uniform(kt, (B,), jnp.float32) * 100.0

    fwd = jax.jit(discriminator_forward)
    out_class, out_rf = fwd(prep, x, time, x_t)
    jax.block_until_ready((out_class, out_rf))

    assert out_class.shape == (B, 1) and out_rf.shape == (B, 1)
    assert bool(jnp.all(jnp.isfinite(out_class)))
    assert bool(jnp.all(jnp.isfinite(out_rf)))

    # validate against a pure-JAX reference using the same bf16 operand rounding
    ref_class, ref_rf = jax.jit(reference_forward)(params, x, time, x_t)
    assert bool(jnp.allclose(out_class, ref_class, rtol=2e-2, atol=2e-2))
    assert bool(jnp.allclose(out_rf, ref_rf, rtol=2e-2, atol=2e-2))

    print("KERNEL_OK")
</pallas_src>

<mosaic_0001>
module attributes {stable_mosaic.version = 11 : i64} {
  func.func @_discriminator_kernel(%arg0: i32, %arg1: memref<2x8xf32, #tpu.memory_space<vmem>>, %arg2: memref<2x16x4xf32, #tpu.memory_space<vmem>>, %arg3: memref<8x32xbf16, #tpu.memory_space<vmem>>, %arg4: memref<1x32xf32, #tpu.memory_space<vmem>>, %arg5: memref<32x32xbf16, #tpu.memory_space<vmem>>, %arg6: memref<1x32xf32, #tpu.memory_space<vmem>>, %arg7: memref<12x8xbf16, #tpu.memory_space<vmem>>, %arg8: memref<24x16xbf16, #tpu.memory_space<vmem>>, %arg9: memref<64x16xbf16, #tpu.memory_space<vmem>>, %arg10: memref<32x16xbf16, #tpu.memory_space<vmem>>, %arg11: memref<32x16xbf16, #tpu.memory_space<vmem>>, %arg12: memref<1x16xf32, #tpu.memory_space<vmem>>, %arg13: memref<1x16xf32, #tpu.memory_space<vmem>>, %arg14: memref<1x16xf32, #tpu.memory_space<vmem>>, %arg15: memref<48x32xbf16, #tpu.memory_space<vmem>>, %arg16: memref<128x32xbf16, #tpu.memory_space<vmem>>, %arg17: memref<64x32xbf16, #tpu.memory_space<vmem>>, %arg18: memref<32x32xbf16, #tpu.memory_space<vmem>>, %arg19: memref<1x32xf32, #tpu.memory_space<vmem>>, %arg20: memref<1x32xf32, #tpu.memory_space<vmem>>, %arg21: memref<1x32xf32, #tpu.memory_space<vmem>>, %arg22: memref<32x2xbf16, #tpu.memory_space<vmem>>, %arg23: memref<1x2xf32, #tpu.memory_space<vmem>>, %arg24: memref<2x2xf32, #tpu.memory_space<vmem>>, %arg25: memref<18x4xf32, #tpu.memory_space<vmem>>, %arg26: memref<18x8xf32, #tpu.memory_space<vmem>>, %arg27: memref<18x16xf32, #tpu.memory_space<vmem>>, %arg28: memref<18x8xf32, #tpu.memory_space<vmem>>, %arg29: memref<10x16xf32, #tpu.memory_space<vmem>>, %arg30: memref<10x32xf32, #tpu.memory_space<vmem>>, %arg31: memref<10x16xf32, #tpu.memory_space<vmem>>) attributes {dimension_semantics = [#tpu.dimension_semantics<arbitrary>], iteration_bounds = array<i64: 1>, scalar_prefetch = 0 : i64, scratch_operands = 7 : i64, tpu.core_type = #tpu.core_type<tc>, window_params = [{pipeline_mode = #tpu.pipeline_mode<synchronous>, transform_indices = @transform_0, window_bounds = array<i64: 2, 8>}, {pipeline_mode = #tpu.pipeline_mode<synchronous>, transform_indices = @transform_1, window_bounds = array<i64: 2, 16, 4>}, {pipeline_mode = #tpu.pipeline_mode<synchronous>, transform_indices = @transform_2, window_bounds = array<i64: 8, 32>}, {pipeline_mode = #tpu.pipeline_mode<synchronous>, transform_indices = @transform_3, window_bounds = array<i64: 1, 32>}, {pipeline_mode = #tpu.pipeline_mode<synchronous>, transform_indices = @transform_4, window_bounds = array<i64: 32, 32>}, {pipeline_mode = #tpu.pipeline_mode<synchronous>, transform_indices = @transform_5, window_bounds = array<i64: 1, 32>}, {pipeline_mode = #tpu.pipeline_mode<synchronous>, transform_indices = @transform_6, window_bounds = array<i64: 12, 8>}, {pipeline_mode = #tpu.pipeline_mode<synchronous>, transform_indices = @transform_7, window_bounds = array<i64: 24, 16>}, {pipeline_mode = #tpu.pipeline_mode<synchronous>, transform_indices = @transform_8, window_bounds = array<i64: 64, 16>}, {pipeline_mode = #tpu.pipeline_mode<synchronous>, transform_indices = @transform_9, window_bounds = array<i64: 32, 16>}, {pipeline_mode = #tpu.pipeline_mode<synchronous>, transform_indices = @transform_10, window_bounds = array<i64: 32, 16>}, {pipeline_mode = #tpu.pipeline_mode<synchronous>, transform_indices = @transform_11, window_bounds = array<i64: 1, 16>}, {pipeline_mode = #tpu.pipeline_mode<synchronous>, transform_indices = @transform_12, window_bounds = array<i64: 1, 16>}, {pipeline_mode = #tpu.pipeline_mode<synchronous>, transform_indices = @transform_13, window_bounds = array<i64: 1, 16>}, {pipeline_mode = #tpu.pipeline_mode<synchronous>, transform_indices = @transform_14, window_bounds = array<i64: 48, 32>}, {pipeline_mode = #tpu.pipeline_mode<synchronous>, transform_indices = @transform_15, window_bounds = array<i64: 128, 32>}, {pipeline_mode = #tpu.pipeline_mode<synchronous>, transform_indices = @transform_16, window_bounds = array<i64: 64, 32>}, {pipeline_mode = #tpu.pipeline_mode<synchronous>, transform_indices = @transform_17, window_bounds = array<i64: 32, 32>}, {pipeline_mode = #tpu.pipeline_mode<synchronous>, transform_indices = @transform_18, window_bounds = array<i64: 1, 32>}, {pipeline_mode = #tpu.pipeline_mode<synchronous>, transform_indices = @transform_19, window_bounds = array<i64: 1, 32>}, {pipeline_mode = #tpu.pipeline_mode<synchronous>, transform_indices = @transform_20, window_bounds = array<i64: 1, 32>}, {pipeline_mode = #tpu.pipeline_mode<synchronous>, transform_indices = @transform_21, window_bounds = array<i64: 32, 2>}, {pipeline_mode = #tpu.pipeline_mode<synchronous>, transform_indices = @transform_22, window_bounds = array<i64: 1, 2>}, {pipeline_mode = #tpu.pipeline_mode<synchronous>, transform_indices = @transform_23, window_bounds = array<i64: 2, 2>}]} {
    %c0 = arith.constant 0 : index
    %c0_0 = arith.constant 0 : index
    %0 = vector.load %arg1[%c0, %c0_0] : memref<2x8xf32, #tpu.memory_space<vmem>>, vector<2x8xf32>
    %c0_1 = arith.constant 0 : index
    %c0_2 = arith.constant 0 : index
    %1 = vector.load %arg3[%c0_1, %c0_2] : memref<8x32xbf16, #tpu.memory_space<vmem>>, vector<8x32xbf16>
    %2 = arith.truncf %0 : vector<2x8xf32> to vector<2x8xbf16>
    %cst = arith.constant dense<0.000000e+00> : vector<2x32xf32>
    %3 = tpu.matmul %2, %1, %cst {dimension_numbers = #tpu.dot_dimension_numbers<[1], [0], [0], [1], [0, 0, 1, 1], [], []>} : vector<2x8xbf16>, vector<8x32xbf16>, vector<2x32xf32> -> vector<2x32xf32>
    %c0_3 = arith.constant 0 : index
    %c0_4 = arith.constant 0 : index
    %4 = vector.load %arg4[%c0_3, %c0_4] : memref<1x32xf32, #tpu.memory_space<vmem>>, vector<1x32xf32>
    %5 = vector.broadcast %4 : vector<1x32xf32> to vector<2x32xf32>
    %6 = arith.addf %3, %5 : vector<2x32xf32>
    %cst_5 = arith.constant 0.000000e+00 : f32
    %7 = vector.broadcast %cst_5 : f32 to vector<2x32xf32>
    %8 = arith.cmpf oge, %6, %7 : vector<2x32xf32>
    %cst_6 = arith.constant 2.000000e-01 : f32
    %9 = vector.broadcast %cst_6 : f32 to vector<2x32xf32>
    %10 = arith.mulf %9, %6 : vector<2x32xf32>
    %11 = arith.select %8, %6, %10 : vector<2x32xi1>, vector<2x32xf32>
    %c0_7 = arith.constant 0 : index
    %c0_8 = arith.constant 0 : index
    %12 = vector.load %arg5[%c0_7, %c0_8] : memref<32x32xbf16, #tpu.memory_space<vmem>>, vector<32x32xbf16>
    %13 = arith.truncf %11 : vector<2x32xf32> to vector<2x32xbf16>
    %cst_9 = arith.constant dense<0.000000e+00> : vector<2x32xf32>
    %14 = tpu.matmul %13, %12, %cst_9 {dimension_numbers = #tpu.dot_dimension_numbers<[1], [0], [0], [1], [0, 0, 1, 1], [], []>} : vector<2x32xbf16>, vector<32x32xbf16>, vector<2x32xf32> -> vector<2x32xf32>
    %c0_10 = arith.constant 0 : index
    %c0_11 = arith.constant 0 : index
    %15 = vector.load %arg6[%c0_10, %c0_11] : memref<1x32xf32, #tpu.memory_space<vmem>>, vector<1x32xf32>
    %16 = vector.broadcast %15 : vector<1x32xf32> to vector<2x32xf32>
    %17 = arith.addf %14, %16 : vector<2x32xf32>
    %cst_12 = arith.constant 0.000000e+00 : f32
    %18 = vector.broadcast %cst_12 : f32 to vector<2x32xf32>
    %19 = arith.cmpf oge, %17, %18 : vector<2x32xf32>
    %cst_13 = arith.constant 2.000000e-01 : f32
    %20 = vector.broadcast %cst_13 : f32 to vector<2x32xf32>
    %21 = arith.mulf %20, %17 : vector<2x32xf32>
    %22 = arith.select %19, %17, %21 : vector<2x32xi1>, vector<2x32xf32>
    %c0_14 = arith.constant 0 : index
    %c0_15 = arith.constant 0 : index
    %23 = vector.load %arg11[%c0_14, %c0_15] : memref<32x16xbf16, #tpu.memory_space<vmem>>, vector<32x16xbf16>
    %24 = arith.truncf %22 : vector<2x32xf32> to vector<2x32xbf16>
    %cst_16 = arith.constant dense<0.000000e+00> : vector<2x16xf32>
    %25 = tpu.matmul %24, %23, %cst_16 {dimension_numbers = #tpu.dot_dimension_numbers<[1], [0], [0], [1], [0, 0, 1, 1], [], []>} : vector<2x32xbf16>, vector<32x16xbf16>, vector<2x16xf32> -> vector<2x16xf32>
    %c0_17 = arith.constant 0 : index
    %c0_18 = arith.constant 0 : index
    %26 = vector.load %arg12[%c0_17, %c0_18] : memref<1x16xf32, #tpu.memory_space<vmem>>, vector<1x16xf32>
    %27 = vector.broadcast %26 : vector<1x16xf32> to vector<2x16xf32>
    %28 = arith.addf %25, %27 : vector<2x16xf32>
    %c0_19 = arith.constant 0 : index
    %c0_20 = arith.constant 0 : index
    %29 = vector.load %arg18[%c0_19, %c0_20] : memref<32x32xbf16, #tpu.memory_space<vmem>>, vector<32x32xbf16>
    %30 = arith.truncf %22 : vector<2x32xf32> to vector<2x32xbf16>
    %cst_21 = arith.constant dense<0.000000e+00> : vector<2x32xf32>
    %31 = tpu.matmul %30, %29, %cst_21 {dimension_numbers = #tpu.dot_dimension_numbers<[1], [0], [0], [1], [0, 0, 1, 1], [], []>} : vector<2x32xbf16>, vector<32x32xbf16>, vector<2x32xf32> -> vector<2x32xf32>
    %c0_22 = arith.constant 0 : index
    %c0_23 = arith.constant 0 : index
    %32 = vector.load %arg19[%c0_22, %c0_23] : memref<1x32xf32, #tpu.memory_space<vmem>>, vector<1x32xf32>
    %33 = vector.broadcast %32 : vector<1x32xf32> to vector<2x32xf32>
    %34 = arith.addf %31, %33 : vector<2x32xf32>
    %c0_24 = arith.constant 0 : index
    %c0_25 = arith.constant 0 : index
    %c0_26 = arith.constant 0 : index
    %35 = vector.load %arg2[%c0_24, %c0_25, %c0_26] : memref<2x16x4xf32, #tpu.memory_space<vmem>>, vector<1x16x4xf32>
    %36 = vector.shape_cast %35 : vector<1x16x4xf32> to vector<16x4xf32>
    %cst_27 = arith.constant 0.000000e+00 : f32
    %37 = vector.broadcast %cst_27 : f32 to vector<1x4xf32>
    %c0_28 = arith.constant 0 : index
    %c0_29 = arith.constant 0 : index
    %38 = vector.load %arg25[%c0_28, %c0_29] : memref<18x4xf32, #tpu.memory_space<vmem>>, vector<1x4xf32>
    tpu.vector_store %arg25[%c0_28, %c0_29], %37 {strides = array<i32>} : memref<18x4xf32, #tpu.memory_space<vmem>>, vector<1x4xf32>,
    %c1 = arith.constant 1 : index
    %c0_30 = arith.constant 0 : index
    %39 = vector.load %arg25[%c1, %c0_30] : memref<18x4xf32, #tpu.memory_space<vmem>>, vector<16x4xf32>
    tpu.vector_store %arg25[%c1, %c0_30], %36 {strides = array<i32>} : memref<18x4xf32, #tpu.memory_space<vmem>>, vector<16x4xf32>,
    %cst_31 = arith.constant 0.000000e+00 : f32
    %40 = vector.broadcast %cst_31 : f32 to vector<1x4xf32>
    %c17 = arith.constant 17 : index
    %c0_32 = arith.constant 0 : index
    %41 = vector.load %arg25[%c17, %c0_32] : memref<18x4xf32, #tpu.memory_space<vmem>>, vector<1x4xf32>
    tpu.vector_store %arg25[%c17, %c0_32], %40 {strides = array<i32>} : memref<18x4xf32, #tpu.memory_space<vmem>>, vector<1x4xf32>,
    %cst_33 = arith.constant 0.000000e+00 : f32
    %42 = vector.broadcast %cst_33 : f32 to vector<16x8xf32>
    %c0_34 = arith.constant 0 : index
    %c0_35 = arith.constant 0 : index
    %43 = vector.load %arg25[%c0_34, %c0_35] : memref<18x4xf32, #tpu.memory_space<vmem>>, vector<16x4xf32>
    %c0_36 = arith.constant 0 : index
    %c0_37 = arith.constant 0 : index
    %44 = vector.load %arg7[%c0_36, %c0_37] : memref<12x8xbf16, #tpu.memory_space<vmem>>, vector<4x8xbf16>
    %45 = arith.truncf %43 : vector<16x4xf32> to vector<16x4xbf16>
    %cst_38 = arith.constant dense<0.000000e+00> : vector<16x8xf32>
    %46 = tpu.matmul %45, %44, %cst_38 {dimension_numbers = #tpu.dot_dimension_numbers<[1], [0], [0], [1], [0, 0, 1, 1], [], []>} : vector<16x4xbf16>, vector<4x8xbf16>, vector<16x8xf32> -> vector<16x8xf32>
    %47 = arith.addf %42, %46 : vector<16x8xf32>
    %c1_39 = arith.constant 1 : index
    %c0_40 = arith.constant 0 : index
    %48 = vector.load %arg25[%c1_39, %c0_40] : memref<18x4xf32, #tpu.memory_space<vmem>>, vector<16x4xf32>
    %c4 = arith.constant 4 : index
    %c0_41 = arith.constant 0 : index
    %49 = vector.load %arg7[%c4, %c0_41] : memref<12x8xbf16, #tpu.memory_space<vmem>>, vector<4x8xbf16>
    %50 = arith.truncf %48 : vector<16x4xf32> to vector<16x4xbf16>
    %cst_42 = arith.constant dense<0.000000e+00> : vector<16x8xf32>
    %51 = tpu.matmul %50, %49, %cst_42 {dimension_numbers = #tpu.dot_dimension_numbers<[1], [0], [0], [1], [0, 0, 1, 1], [], []>} : vector<16x4xbf16>, vector<4x8xbf16>, vector<16x8xf32> -> vector<16x8xf32>
    %52 = arith.addf %47, %51 : vector<16x8xf32>
    %c2 = arith.constant 2 : index
    %c0_43 = arith.constant 0 : index
    %53 = vector.load %arg25[%c2, %c0_43] : memref<18x4xf32, #tpu.memory_space<vmem>>, vector<16x4xf32>
    %c8 = arith.constant 8 : index
    %c0_44 = arith.constant 0 : index
    %54 = vector.load %arg7[%c8, %c0_44] : memref<12x8xbf16, #tpu.memory_space<vmem>>, vector<4x8xbf16>
    %55 = arith.truncf %53 : vector<16x4xf32> to vector<16x4xbf16>
    %cst_45 = arith.constant dense<0.000000e+00> : vector<16x8xf32>
    %56 = tpu.matmul %55, %54, %cst_45 {dimension_numbers = #tpu.dot_dimension_numbers<[1], [0], [0], [1], [0, 0, 1, 1], [], []>} : vector<16x4xbf16>, vector<4x8xbf16>, vector<16x8xf32> -> vector<16x8xf32>
    %57 = arith.addf %52, %56 : vector<16x8xf32>
    %cst_46 = arith.constant 0.000000e+00 : f32
    %58 = vector.broadcast %cst_46 : f32 to vector<16x8xf32>
    %59 = arith.cmpf oge, %57, %58 : vector<16x8xf32>
    %cst_47 = arith.constant 2.000000e-01 : f32
    %60 = vector.broadcast %cst_47 : f32 to vector<16x8xf32>
    %61 = arith.mulf %60, %57 : vector<16x8xf32>
    %62 = arith.select %59, %57, %61 : vector<16x8xi1>, vector<16x8xf32>
    %cst_48 = arith.constant 0.000000e+00 : f32
    %63 = vector.broadcast %cst_48 : f32 to vector<1x8xf32>
    %c0_49 = arith.constant 0 : index
    %c0_50 = arith.constant 0 : index
    %64 = vector.load %arg26[%c0_49, %c0_50] : memref<18x8xf32, #tpu.memory_space<vmem>>, vector<1x8xf32>
    tpu.vector_store %arg26[%c0_49, %c0_50], %63 {strides = array<i32>} : memref<18x8xf32, #tpu.memory_space<vmem>>, vector<1x8xf32>,
    %c1_51 = arith.constant 1 : index
    %c0_52 = arith.constant 0 : index
    %65 = vector.load %arg26[%c1_51, %c0_52] : memref<18x8xf32, #tpu.memory_space<vmem>>, vector<16x8xf32>
    tpu.vector_store %arg26[%c1_51, %c0_52], %62 {strides = array<i32>} : memref<18x8xf32, #tpu.memory_space<vmem>>, vector<16x8xf32>,
    %cst_53 = arith.constant 0.000000e+00 : f32
    %66 = vector.broadcast %cst_53 : f32 to vector<1x8xf32>
    %c17_54 = arith.constant 17 : index
    %c0_55 = arith.constant 0 : index
    %67 = vector.load %arg26[%c17_54, %c0_55] : memref<18x8xf32, #tpu.memory_space<vmem>>, vector<1x8xf32>
    tpu.vector_store %arg26[%c17_54, %c0_55], %66 {strides = array<i32>} : memref<18x8xf32, #tpu.memory_space<vmem>>, vector<1x8xf32>,
    %cst_56 = arith.constant 0.000000e+00 : f32
    %68 = vector.broadcast %cst_56 : f32 to vector<16x16xf32>
    %c0_57 = arith.constant 0 : index
    %c0_58 = arith.constant 0 : index
    %69 = vector.load %arg26[%c0_57, %c0_58] : memref<18x8xf32, #tpu.memory_space<vmem>>, vector<16x8xf32>
    %c0_59 = arith.constant 0 : index
    %c0_60 = arith.constant 0 : index
    %70 = vector.load %arg8[%c0_59, %c0_60] : memref<24x16xbf16, #tpu.memory_space<vmem>>, vector<8x16xbf16>
    %71 = arith.truncf %69 : vector<16x8xf32> to vector<16x8xbf16>
    %cst_61 = arith.constant dense<0.000000e+00> : vector<16x16xf32>
    %72 = tpu.matmul %71, %70, %cst_61 {dimension_numbers = #tpu.dot_dimension_numbers<[1], [0], [0], [1], [0, 0, 1, 1], [], []>} : vector<16x8xbf16>, vector<8x16xbf16>, vector<16x16xf32> -> vector<16x16xf32>
    %73 = arith.addf %68, %72 : vector<16x16xf32>
    %c1_62 = arith.constant 1 : index
    %c0_63 = arith.constant 0 : index
    %74 = vector.load %arg26[%c1_62, %c0_63] : memref<18x8xf32, #tpu.memory_space<vmem>>, vector<16x8xf32>
    %c8_64 = arith.constant 8 : index
    %c0_65 = arith.constant 0 : index
    %75 = vector.load %arg8[%c8_64, %c0_65] : memref<24x16xbf16, #tpu.memory_space<vmem>>, vector<8x16xbf16>
    %76 = arith.truncf %74 : vector<16x8xf32> to vector<16x8xbf16>
    %cst_66 = arith.constant dense<0.000000e+00> : vector<16x16xf32>
    %77 = tpu.matmul %76, %75, %cst_66 {dimension_numbers = #tpu.dot_dimension_numbers<[1], [0], [0], [1], [0, 0, 1, 1], [], []>} : vector<16x8xbf16>, vector<8x16xbf16>, vector<16x16xf32> -> vector<16x16xf32>
    %78 = arith.addf %73, %77 : vector<16x16xf32>
    %c2_67 = arith.constant 2 : index
    %c0_68 = arith.constant 0 : index
    %79 = vector.load %arg26[%c2_67, %c0_68] : memref<18x8xf32, #tpu.memory_space<vmem>>, vector<16x8xf32>
    %c16 = arith.constant 16 : index
    %c0_69 = arith.constant 0 : index
    %80 = vector.load %arg8[%c16, %c0_69] : memref<24x16xbf16, #tpu.memory_space<vmem>>, vector<8x16xbf16>
    %81 = arith.truncf %79 : vector<16x8xf32> to vector<16x8xbf16>
    %cst_70 = arith.constant dense<0.000000e+00> : vector<16x16xf32>
    %82 = tpu.matmul %81, %80, %cst_70 {dimension_numbers = #tpu.dot_dimension_numbers<[1], [0], [0], [1], [0, 0, 1, 1], [], []>} : vector<16x8xbf16>, vector<8x16xbf16>, vector<16x16xf32> -> vector<16x16xf32>
    %83 = arith.addf %78, %82 : vector<16x16xf32>
    %84 = vector.extract_strided_slice %28 {offsets = [0, 0], sizes = [1, 16], strides = [1, 1]} : vector<2x16xf32> to vector<1x16xf32>
    %85 = vector.broadcast %84 : vector<1x16xf32> to vector<16x16xf32>
    %86 = arith.addf %83, %85 : vector<16x16xf32>
    %cst_71 = arith.constant 0.000000e+00 : f32
    %87 = vector.broadcast %cst_71 : f32 to vector<16x16xf32>
    %88 = arith.cmpf oge, %86, %87 : vector<16x16xf32>
    %cst_72 = arith.constant 2.000000e-01 : f32
    %89 = vector.broadcast %cst_72 : f32 to vector<16x16xf32>
    %90 = arith.mulf %89, %86 : vector<16x16xf32>
    %91 = arith.select %88, %86, %90 : vector<16x16xi1>, vector<16x16xf32>
    %cst_73 = arith.constant 0.000000e+00 : f32
    %92 = vector.broadcast %cst_73 : f32 to vector<1x16xf32>
    %c0_74 = arith.constant 0 : index
    %c0_75 = arith.constant 0 : index
    %93 = vector.load %arg27[%c0_74, %c0_75] : memref<18x16xf32, #tpu.memory_space<vmem>>, vector<1x16xf32>
    tpu.vector_store %arg27[%c0_74, %c0_75], %92 {strides = array<i32>} : memref<18x16xf32, #tpu.memory_space<vmem>>, vector<1x16xf32>,
    %c1_76 = arith.constant 1 : index
    %c0_77 = arith.constant 0 : index
    %94 = vector.load %arg27[%c1_76, %c0_77] : memref<18x16xf32, #tpu.memory_space<vmem>>, vector<16x16xf32>
    tpu.vector_store %arg27[%c1_76, %c0_77], %91 {strides = array<i32>} : memref<18x16xf32, #tpu.memory_space<vmem>>, vector<16x16xf32>,
    %cst_78 = arith.constant 0.000000e+00 : f32
    %95 = vector.broadcast %cst_78 : f32 to vector<1x16xf32>
    %c17_79 = arith.constant 17 : index
    %c0_80 = arith.constant 0 : index
    %96 = vector.load %arg27[%c17_79, %c0_80] : memref<18x16xf32, #tpu.memory_space<vmem>>, vector<1x16xf32>
    tpu.vector_store %arg27[%c17_79, %c0_80], %95 {strides = array<i32>} : memref<18x16xf32, #tpu.memory_space<vmem>>, vector<1x16xf32>,
    %cst_81 = arith.constant 0.000000e+00 : f32
    %97 = vector.broadcast %cst_81 : f32 to vector<8x16xf32>
    %c0_82 = arith.constant 0 : index
    %c0_83 = arith.constant 0 : index
    %98 = tpu.strided_load %arg27[%c0_82, %c0_83] {strides = array<i32: 2, 1>} : memref<18x16xf32, #tpu.memory_space<vmem>>, vector<8x16xf32>
    %c0_84 = arith.constant 0 : index
    %c0_85 = arith.constant 0 : index
    %99 = vector.load %arg9[%c0_84, %c0_85] : memref<64x16xbf16, #tpu.memory_space<vmem>>, vector<16x16xbf16>
    %100 = arith.truncf %98 : vector<8x16xf32> to vector<8x16xbf16>
    %cst_86 = arith.constant dense<0.000000e+00> : vector<8x16xf32>
    %101 = tpu.matmul %100, %99, %cst_86 {dimension_numbers = #tpu.dot_dimension_numbers<[1], [0], [0], [1], [0, 0, 1, 1], [], []>} : vector<8x16xbf16>, vector<16x16xbf16>, vector<8x16xf32> -> vector<8x16xf32>
    %102 = arith.addf %97, %101 : vector<8x16xf32>
    %c1_87 = arith.constant 1 : index
    %c0_88 = arith.constant 0 : index
    %103 = tpu.strided_load %arg27[%c1_87, %c0_88] {strides = array<i32: 2, 1>} : memref<18x16xf32, #tpu.memory_space<vmem>>, vector<8x16xf32>
    %c16_89 = arith.constant 16 : index
    %c0_90 = arith.constant 0 : index
    %104 = vector.load %arg9[%c16_89, %c0_90] : memref<64x16xbf16, #tpu.memory_space<vmem>>, vector<16x16xbf16>
    %105 = arith.truncf %103 : vector<8x16xf32> to vector<8x16xbf16>
    %cst_91 = arith.constant dense<0.000000e+00> : vector<8x16xf32>
    %106 = tpu.matmul %105, %104, %cst_91 {dimension_numbers = #tpu.dot_dimension_numbers<[1], [0], [0], [1], [0, 0, 1, 1], [], []>} : vector<8x16xbf16>, vector<16x16xbf16>, vector<8x16xf32> -> vector<8x16xf32>
    %107 = arith.addf %102, %106 : vector<8x16xf32>
    %c2_92 = arith.constant 2 : index
    %c0_93 = arith.constant 0 : index
    %108 = tpu.strided_load %arg27[%c2_92, %c0_93] {strides = array<i32: 2, 1>} : memref<18x16xf32, #tpu.memory_space<vmem>>, vector<8x16xf32>
    %c32 = arith.constant 32 : index
    %c0_94 = arith.constant 0 : index
    %109 = vector.load %arg9[%c32, %c0_94] : memref<64x16xbf16, #tpu.memory_space<vmem>>, vector<16x16xbf16>
    %110 = arith.truncf %108 : vector<8x16xf32> to vector<8x16xbf16>
    %cst_95 = arith.constant dense<0.000000e+00> : vector<8x16xf32>
    %111 = tpu.matmul %110, %109, %cst_95 {dimension_numbers = #tpu.dot_dimension_numbers<[1], [0], [0], [1], [0, 0, 1, 1], [], []>} : vector<8x16xbf16>, vector<16x16xbf16>, vector<8x16xf32> -> vector<8x16xf32>
    %112 = arith.addf %107, %111 : vector<8x16xf32>
    %c3 = arith.constant 3 : index
    %c0_96 = arith.constant 0 : index
    %113 = tpu.strided_load %arg27[%c3, %c0_96] {strides = array<i32: 2, 1>} : memref<18x16xf32, #tpu.memory_space<vmem>>, vector<8x16xf32>
    %c48 = arith.constant 48 : index
    %c0_97 = arith.constant 0 : index
    %114 = vector.load %arg9[%c48, %c0_97] : memref<64x16xbf16, #tpu.memory_space<vmem>>, vector<16x16xbf16>
    %115 = arith.truncf %113 : vector<8x16xf32> to vector<8x16xbf16>
    %cst_98 = arith.constant dense<0.000000e+00> : vector<8x16xf32>
    %116 = tpu.matmul %115, %114, %cst_98 {dimension_numbers = #tpu.dot_dimension_numbers<[1], [0], [0], [1], [0, 0, 1, 1], [], []>} : vector<8x16xbf16>, vector<16x16xbf16>, vector<8x16xf32> -> vector<8x16xf32>
    %117 = arith.addf %112, %116 : vector<8x16xf32>
    %cst_99 = arith.constant 0.000000e+00 : f32
    %118 = vector.broadcast %cst_99 : f32 to vector<1x8xf32>
    %c0_100 = arith.constant 0 : index
    %c0_101 = arith.constant 0 : index
    %119 = vector.load %arg28[%c0_100, %c0_101] : memref<18x8xf32, #tpu.memory_space<vmem>>, vector<1x8xf32>
    tpu.vector_store %arg28[%c0_100, %c0_101], %118 {strides = array<i32>} : memref<18x8xf32, #tpu.memory_space<vmem>>, vector<1x8xf32>,
    %c1_102 = arith.constant 1 : index
    %c0_103 = arith.constant 0 : index
    %120 = vector.load %arg28[%c1_102, %c0_103] : memref<18x8xf32, #tpu.memory_space<vmem>>, vector<16x8xf32>
    tpu.vector_store %arg28[%c1_102, %c0_103], %57 {strides = array<i32>} : memref<18x8xf32, #tpu.memory_space<vmem>>, vector<16x8xf32>,
    %cst_104 = arith.constant 0.000000e+00 : f32
    %121 = vector.broadcast %cst_104 : f32 to vector<1x8xf32>
    %c17_105 = arith.constant 17 : index
    %c0_106 = arith.constant 0 : index
    %122 = vector.load %arg28[%c17_105, %c0_106] : memref<18x8xf32, #tpu.memory_space<vmem>>, vector<1x8xf32>
    tpu.vector_store %arg28[%c17_105, %c0_106], %121 {strides = array<i32>} : memref<18x8xf32, #tpu.memory_space<vmem>>, vector<1x8xf32>,
    %cst_107 = arith.constant 0.000000e+00 : f32
    %123 = vector.broadcast %cst_107 : f32 to vector<8x16xf32>
    %c0_108 = arith.constant 0 : index
    %c0_109 = arith.constant 0 : index
    %124 = tpu.strided_load %arg28[%c0_108, %c0_109] {strides = array<i32: 2, 1>} : memref<18x8xf32, #tpu.memory_space<vmem>>, vector<8x8xf32>
    %c0_110 = arith.constant 0 : index
    %c0_111 = arith.constant 0 : index
    %125 = vector.load %arg10[%c0_110, %c0_111] : memref<32x16xbf16, #tpu.memory_space<vmem>>, vector<8x16xbf16>
    %126 = arith.truncf %124 : vector<8x8xf32> to vector<8x8xbf16>
    %cst_112 = arith.constant dense<0.000000e+00> : vector<8x16xf32>
    %127 = tpu.matmul %126, %125, %cst_112 {dimension_numbers = #tpu.dot_dimension_numbers<[1], [0], [0], [1], [0, 0, 1, 1], [], []>} : vector<8x8xbf16>, vector<8x16xbf16>, vector<8x16xf32> -> vector<8x16xf32>
    %128 = arith.addf %123, %127 : vector<8x16xf32>
    %c1_113 = arith.constant 1 : index
    %c0_114 = arith.constant 0 : index
    %129 = tpu.strided_load %arg28[%c1_113, %c0_114] {strides = array<i32: 2, 1>} : memref<18x8xf32, #tpu.memory_space<vmem>>, vector<8x8xf32>
    %c8_115 = arith.constant 8 : index
    %c0_116 = arith.constant 0 : index
    %130 = vector.load %arg10[%c8_115, %c0_116] : memref<32x16xbf16, #tpu.memory_space<vmem>>, vector<8x16xbf16>
    %131 = arith.truncf %129 : vector<8x8xf32> to vector<8x8xbf16>
    %cst_117 = arith.constant dense<0.000000e+00> : vector<8x16xf32>
    %132 = tpu.matmul %131, %130, %cst_117 {dimension_numbers = #tpu.dot_dimension_numbers<[1], [0], [0], [1], [0, 0, 1, 1], [], []>} : vector<8x8xbf16>, vector<8x16xbf16>, vector<8x16xf32> -> vector<8x16xf32>
    %133 = arith.addf %128, %132 : vector<8x16xf32>
    %c2_118 = arith.constant 2 : index
    %c0_119 = arith.constant 0 : index
    %134 = tpu.strided_load %arg28[%c2_118, %c0_119] {strides = array<i32: 2, 1>} : memref<18x8xf32, #tpu.memory_space<vmem>>, vector<8x8xf32>
    %c16_120 = arith.constant 16 : index
    %c0_121 = arith.constant 0 : index
    %135 = vector.load %arg10[%c16_120, %c0_121] : memref<32x16xbf16, #tpu.memory_space<vmem>>, vector<8x16xbf16>
    %136 = arith.truncf %134 : vector<8x8xf32> to vector<8x8xbf16>
    %cst_122 = arith.constant dense<0.000000e+00> : vector<8x16xf32>
    %137 = tpu.matmul %136, %135, %cst_122 {dimension_numbers = #tpu.dot_dimension_numbers<[1], [0], [0], [1], [0, 0, 1, 1], [], []>} : vector<8x8xbf16>, vector<8x16xbf16>, vector<8x16xf32> -> vector<8x16xf32>
    %138 = arith.addf %133, %137 : vector<8x16xf32>
    %c3_123 = arith.constant 3 : index
    %c0_124 = arith.constant 0 : index
    %139 = tpu.strided_load %arg28[%c3_123, %c0_124] {strides = array<i32: 2, 1>} : memref<18x8xf32, #tpu.memory_space<vmem>>, vector<8x8xf32>
    %c24 = arith.constant 24 : index
    %c0_125 = arith.constant 0 : index
    %140 = vector.load %arg10[%c24, %c0_125] : memref<32x16xbf16, #tpu.memory_space<vmem>>, vector<8x16xbf16>
    %141 = arith.truncf %139 : vector<8x8xf32> to vector<8x8xbf16>
    %cst_126 = arith.constant dense<0.000000e+00> : vector<8x16xf32>
    %142 = tpu.matmul %141, %140, %cst_126 {dimension_numbers = #tpu.dot_dimension_numbers<[1], [0], [0], [1], [0, 0, 1, 1], [], []>} : vector<8x8xbf16>, vector<8x16xbf16>, vector<8x16xf32> -> vector<8x16xf32>
    %143 = arith.addf %138, %142 : vector<8x16xf32>
    %c1_127 = arith.constant 1 : index
    %c0_128 = arith.constant 0 : index
    %c0_129 = arith.constant 0 : index
    %144 = vector.load %arg2[%c1_127, %c0_128, %c0_129] : memref<2x16x4xf32, #tpu.memory_space<vmem>>, vector<1x16x4xf32>
    %145 = vector.shape_cast %144 : vector<1x16x4xf32> to vector<16x4xf32>
    %cst_130 = arith.constant 0.000000e+00 : f32
    %146 = vector.broadcast %cst_130 : f32 to vector<1x4xf32>
    %c0_131 = arith.constant 0 : index
    %c0_132 = arith.constant 0 : index
    %147 = vector.load %arg25[%c0_131, %c0_132] : memref<18x4xf32, #tpu.memory_space<vmem>>, vector<1x4xf32>
    tpu.vector_store %arg25[%c0_131, %c0_132], %146 {strides = array<i32>} : memref<18x4xf32, #tpu.memory_space<vmem>>, vector<1x4xf32>,
    %c1_133 = arith.constant 1 : index
    %c0_134 = arith.constant 0 : index
    %148 = vector.load %arg25[%c1_133, %c0_134] : memref<18x4xf32, #tpu.memory_space<vmem>>, vector<16x4xf32>
    tpu.vector_store %arg25[%c1_133, %c0_134], %145 {strides = array<i32>} : memref<18x4xf32, #tpu.memory_space<vmem>>, vector<16x4xf32>,
    %cst_135 = arith.constant 0.000000e+00 : f32
    %149 = vector.broadcast %cst_135 : f32 to vector<1x4xf32>
    %c17_136 = arith.constant 17 : index
    %c0_137 = arith.constant 0 : index
    %150 = vector.load %arg25[%c17_136, %c0_137] : memref<18x4xf32, #tpu.memory_space<vmem>>, vector<1x4xf32>
    tpu.vector_store %arg25[%c17_136, %c0_137], %149 {strides = array<i32>} : memref<18x4xf32, #tpu.memory_space<vmem>>, vector<1x4xf32>,
    %cst_138 = arith.constant 0.000000e+00 : f32
    %151 = vector.broadcast %cst_138 : f32 to vector<16x8xf32>
    %c0_139 = arith.constant 0 : index
    %c0_140 = arith.constant 0 : index
    %152 = vector.load %arg25[%c0_139, %c0_140] : memref<18x4xf32, #tpu.memory_space<vmem>>, vector<16x4xf32>
    %c0_141 = arith.constant 0 : index
    %c0_142 = arith.constant 0 : index
    %153 = vector.load %arg7[%c0_141, %c0_142] : memref<12x8xbf16, #tpu.memory_space<vmem>>, vector<4x8xbf16>
    %154 = arith.truncf %152 : vector<16x4xf32> to vector<16x4xbf16>
    %cst_143 = arith.constant dense<0.000000e+00> : vector<16x8xf32>
    %155 = tpu.matmul %154, %153, %cst_143 {dimension_numbers = #tpu.dot_dimension_numbers<[1], [0], [0], [1], [0, 0, 1, 1], [], []>} : vector<16x4xbf16>, vector<4x8xbf16>, vector<16x8xf32> -> vector<16x8xf32>
    %156 = arith.addf %151, %155 : vector<16x8xf32>
    %c1_144 = arith.constant 1 : index
    %c0_145 = arith.constant 0 : index
    %157 = vector.load %arg25[%c1_144, %c0_145] : memref<18x4xf32, #tpu.memory_space<vmem>>, vector<16x4xf32>
    %c4_146 = arith.constant 4 : index
    %c0_147 = arith.constant 0 : index
    %158 = vector.load %arg7[%c4_146, %c0_147] : memref<12x8xbf16, #tpu.memory_space<vmem>>, vector<4x8xbf16>
    %159 = arith.truncf %157 : vector<16x4xf32> to vector<16x4xbf16>
    %cst_148 = arith.constant dense<0.000000e+00> : vector<16x8xf32>
    %160 = tpu.matmul %159, %158, %cst_148 {dimension_numbers = #tpu.dot_dimension_numbers<[1], [0], [0], [1], [0, 0, 1, 1], [], []>} : vector<16x4xbf16>, vector<4x8xbf16>, vector<16x8xf32> -> vector<16x8xf32>
    %161 = arith.addf %156, %160 : vector<16x8xf32>
    %c2_149 = arith.constant 2 : index
    %c0_150 = arith.constant 0 : index
    %162 = vector.load %arg25[%c2_149, %c0_150] : memref<18x4xf32, #tpu.memory_space<vmem>>, vector<16x4xf32>
    %c8_151 = arith.constant 8 : index
    %c0_152 = arith.constant 0 : index
    %163 = vector.load %arg7[%c8_151, %c0_152] : memref<12x8xbf16, #tpu.memory_space<vmem>>, vector<4x8xbf16>
    %164 = arith.truncf %162 : vector<16x4xf32> to vector<16x4xbf16>
    %cst_153 = arith.constant dense<0.000000e+00> : vector<16x8xf32>
    %165 = tpu.matmul %164, %163, %cst_153 {dimension_numbers = #tpu.dot_dimension_numbers<[1], [0], [0], [1], [0, 0, 1, 1], [], []>} : vector<16x4xbf16>, vector<4x8xbf16>, vector<16x8xf32> -> vector<16x8xf32>
    %166 = arith.addf %161, %165 : vector<16x8xf32>
    %cst_154 = arith.constant 0.000000e+00 : f32
    %167 = vector.broadcast %cst_154 : f32 to vector<16x8xf32>
    %168 = arith.cmpf oge, %166, %167 : vector<16x8xf32>
    %cst_155 = arith.constant 2.000000e-01 : f32
    %169 = vector.broadcast %cst_155 : f32 to vector<16x8xf32>
    %170 = arith.mulf %169, %166 : vector<16x8xf32>
    %171 = arith.select %168, %166, %170 : vector<16x8xi1>, vector<16x8xf32>
    %cst_156 = arith.constant 0.000000e+00 : f32
    %172 = vector.broadcast %cst_156 : f32 to vector<1x8xf32>
    %c0_157 = arith.constant 0 : index
    %c0_158 = arith.constant 0 : index
    %173 = vector.load %arg26[%c0_157, %c0_158] : memref<18x8xf32, #tpu.memory_space<vmem>>, vector<1x8xf32>
    tpu.vector_store %arg26[%c0_157, %c0_158], %172 {strides = array<i32>} : memref<18x8xf32, #tpu.memory_space<vmem>>, vector<1x8xf32>,
    %c1_159 = arith.constant 1 : index
    %c0_160 = arith.constant 0 : index
    %174 = vector.load %arg26[%c1_159, %c0_160] : memref<18x8xf32, #tpu.memory_space<vmem>>, vector<16x8xf32>
    tpu.vector_store %arg26[%c1_159, %c0_160], %171 {strides = array<i32>} : memref<18x8xf32, #tpu.memory_space<vmem>>, vector<16x8xf32>,
    %cst_161 = arith.constant 0.000000e+00 : f32
    %175 = vector.broadcast %cst_161 : f32 to vector<1x8xf32>
    %c17_162 = arith.constant 17 : index
    %c0_163 = arith.constant 0 : index
    %176 = vector.load %arg26[%c17_162, %c0_163] : memref<18x8xf32, #tpu.memory_space<vmem>>, vector<1x8xf32>
    tpu.vector_store %arg26[%c17_162, %c0_163], %175 {strides = array<i32>} : memref<18x8xf32, #tpu.memory_space<vmem>>, vector<1x8xf32>,
    %cst_164 = arith.constant 0.000000e+00 : f32
    %177 = vector.broadcast %cst_164 : f32 to vector<16x16xf32>
    %c0_165 = arith.constant 0 : index
    %c0_166 = arith.constant 0 : index
    %178 = vector.load %arg26[%c0_165, %c0_166] : memref<18x8xf32, #tpu.memory_space<vmem>>, vector<16x8xf32>
    %c0_167 = arith.constant 0 : index
    %c0_168 = arith.constant 0 : index
    %179 = vector.load %arg8[%c0_167, %c0_168] : memref<24x16xbf16, #tpu.memory_space<vmem>>, vector<8x16xbf16>
    %180 = arith.truncf %178 : vector<16x8xf32> to vector<16x8xbf16>
    %cst_169 = arith.constant dense<0.000000e+00> : vector<16x16xf32>
    %181 = tpu.matmul %180, %179, %cst_169 {dimension_numbers = #tpu.dot_dimension_numbers<[1], [0], [0], [1], [0, 0, 1, 1], [], []>} : vector<16x8xbf16>, vector<8x16xbf16>, vector<16x16xf32> -> vector<16x16xf32>
    %182 = arith.addf %177, %181 : vector<16x16xf32>
    %c1_170 = arith.constant 1 : index
    %c0_171 = arith.constant 0 : index
    %183 = vector.load %arg26[%c1_170, %c0_171] : memref<18x8xf32, #tpu.memory_space<vmem>>, vector<16x8xf32>
    %c8_172 = arith.constant 8 : index
    %c0_173 = arith.constant 0 : index
    %184 = vector.load %arg8[%c8_172, %c0_173] : memref<24x16xbf16, #tpu.memory_space<vmem>>, vector<8x16xbf16>
    %185 = arith.truncf %183 : vector<16x8xf32> to vector<16x8xbf16>
    %cst_174 = arith.constant dense<0.000000e+00> : vector<16x16xf32>
    %186 = tpu.matmul %185, %184, %cst_174 {dimension_numbers = #tpu.dot_dimension_numbers<[1], [0], [0], [1], [0, 0, 1, 1], [], []>} : vector<16x8xbf16>, vector<8x16xbf16>, vector<16x16xf32> -> vector<16x16xf32>
    %187 = arith.addf %182, %186 : vector<16x16xf32>
    %c2_175 = arith.constant 2 : index
    %c0_176 = arith.constant 0 : index
    %188 = vector.load %arg26[%c2_175, %c0_176] : memref<18x8xf32, #tpu.memory_space<vmem>>, vector<16x8xf32>
    %c16_177 = arith.constant 16 : index
    %c0_178 = arith.constant 0 : index
    %189 = vector.load %arg8[%c16_177, %c0_178] : memref<24x16xbf16, #tpu.memory_space<vmem>>, vector<8x16xbf16>
    %190 = arith.truncf %188 : vector<16x8xf32> to vector<16x8xbf16>
    %cst_179 = arith.constant dense<0.000000e+00> : vector<16x16xf32>
    %191 = tpu.matmul %190, %189, %cst_179 {dimension_numbers = #tpu.dot_dimension_numbers<[1], [0], [0], [1], [0, 0, 1, 1], [], []>} : vector<16x8xbf16>, vector<8x16xbf16>, vector<16x16xf32> -> vector<16x16xf32>
    %192 = arith.addf %187, %191 : vector<16x16xf32>
    %193 = vector.extract_strided_slice %28 {offsets = [1, 0], sizes = [1, 16], strides = [1, 1]} : vector<2x16xf32> to vector<1x16xf32>
    %194 = vector.broadcast %193 : vector<1x16xf32> to vector<16x16xf32>
    %195 = arith.addf %192, %194 : vector<16x16xf32>
    %cst_180 = arith.constant 0.000000e+00 : f32
    %196 = vector.broadcast %cst_180 : f32 to vector<16x16xf32>
    %197 = arith.cmpf oge, %195, %196 : vector<16x16xf32>
    %cst_181 = arith.constant 2.000000e-01 : f32
    %198 = vector.broadcast %cst_181 : f32 to vector<16x16xf32>
    %199 = arith.mulf %198, %195 : vector<16x16xf32>
    %200 = arith.select %197, %195, %199 : vector<16x16xi1>, vector<16x16xf32>
    %cst_182 = arith.constant 0.000000e+00 : f32
    %201 = vector.broadcast %cst_182 : f32 to vector<1x16xf32>
    %c0_183 = arith.constant 0 : index
    %c0_184 = arith.constant 0 : index
    %202 = vector.load %arg27[%c0_183, %c0_184] : memref<18x16xf32, #tpu.memory_space<vmem>>, vector<1x16xf32>
    tpu.vector_store %arg27[%c0_183, %c0_184], %201 {strides = array<i32>} : memref<18x16xf32, #tpu.memory_space<vmem>>, vector<1x16xf32>,
    %c1_185 = arith.constant 1 : index
    %c0_186 = arith.constant 0 : index
    %203 = vector.load %arg27[%c1_185, %c0_186] : memref<18x16xf32, #tpu.memory_space<vmem>>, vector<16x16xf32>
    tpu.vector_store %arg27[%c1_185, %c0_186], %200 {strides = array<i32>} : memref<18x16xf32, #tpu.memory_space<vmem>>, vector<16x16xf32>,
    %cst_187 = arith.constant 0.000000e+00 : f32
    %204 = vector.broadcast %cst_187 : f32 to vector<1x16xf32>
    %c17_188 = arith.constant 17 : index
    %c0_189 = arith.constant 0 : index
    %205 = vector.load %arg27[%c17_188, %c0_189] : memref<18x16xf32, #tpu.memory_space<vmem>>, vector<1x16xf32>
    tpu.vector_store %arg27[%c17_188, %c0_189], %204 {strides = array<i32>} : memref<18x16xf32, #tpu.memory_space<vmem>>, vector<1x16xf32>,
    %cst_190 = arith.constant 0.000000e+00 : f32
    %206 = vector.broadcast %cst_190 : f32 to vector<8x16xf32>
    %c0_191 = arith.constant 0 : index
    %c0_192 = arith.constant 0 : index
    %207 = tpu.strided_load %arg27[%c0_191, %c0_192] {strides = array<i32: 2, 1>} : memref<18x16xf32, #tpu.memory_space<vmem>>, vector<8x16xf32>
    %c0_193 = arith.constant 0 : index
    %c0_194 = arith.constant 0 : index
    %208 = vector.load %arg9[%c0_193, %c0_194] : memref<64x16xbf16, #tpu.memory_space<vmem>>, vector<16x16xbf16>
    %209 = arith.truncf %207 : vector<8x16xf32> to vector<8x16xbf16>
    %cst_195 = arith.constant dense<0.000000e+00> : vector<8x16xf32>
    %210 = tpu.matmul %209, %208, %cst_195 {dimension_numbers = #tpu.dot_dimension_numbers<[1], [0], [0], [1], [0, 0, 1, 1], [], []>} : vector<8x16xbf16>, vector<16x16xbf16>, vector<8x16xf32> -> vector<8x16xf32>
    %211 = arith.addf %206, %210 : vector<8x16xf32>
    %c1_196 = arith.constant 1 : index
    %c0_197 = arith.constant 0 : index
    %212 = tpu.strided_load %arg27[%c1_196, %c0_197] {strides = array<i32: 2, 1>} : memref<18x16xf32, #tpu.memory_space<vmem>>, vector<8x16xf32>
    %c16_198 = arith.constant 16 : index
    %c0_199 = arith.constant 0 : index
    %213 = vector.load %arg9[%c16_198, %c0_199] : memref<64x16xbf16, #tpu.memory_space<vmem>>, vector<16x16xbf16>
    %214 = arith.truncf %212 : vector<8x16xf32> to vector<8x16xbf16>
    %cst_200 = arith.constant dense<0.000000e+00> : vector<8x16xf32>
    %215 = tpu.matmul %214, %213, %cst_200 {dimension_numbers = #tpu.dot_dimension_numbers<[1], [0], [0], [1], [0, 0, 1, 1], [], []>} : vector<8x16xbf16>, vector<16x16xbf16>, vector<8x16xf32> -> vector<8x16xf32>
    %216 = arith.addf %211, %215 : vector<8x16xf32>
    %c2_201 = arith.constant 2 : index
    %c0_202 = arith.constant 0 : index
    %217 = tpu.strided_load %arg27[%c2_201, %c0_202] {strides = array<i32: 2, 1>} : memref<18x16xf32, #tpu.memory_space<vmem>>, vector<8x16xf32>
    %c32_203 = arith.constant 32 : index
    %c0_204 = arith.constant 0 : index
    %218 = vector.load %arg9[%c32_203, %c0_204] : memref<64x16xbf16, #tpu.memory_space<vmem>>, vector<16x16xbf16>
    %219 = arith.truncf %217 : vector<8x16xf32> to vector<8x16xbf16>
    %cst_205 = arith.constant dense<0.000000e+00> : vector<8x16xf32>
    %220 = tpu.matmul %219, %218, %cst_205 {dimension_numbers = #tpu.dot_dimension_numbers<[1], [0], [0], [1], [0, 0, 1, 1], [], []>} : vector<8x16xbf16>, vector<16x16xbf16>, vector<8x16xf32> -> vector<8x16xf32>
    %221 = arith.addf %216, %220 : vector<8x16xf32>
    %c3_206 = arith.constant 3 : index
    %c0_207 = arith.constant 0 : index
    %222 = tpu.strided_load %arg27[%c3_206, %c0_207] {strides = array<i32: 2, 1>} : memref<18x16xf32, #tpu.memory_space<vmem>>, vector<8x16xf32>
    %c48_208 = arith.constant 48 : index
    %c0_209 = arith.constant 0 : index
    %223 = vector.load %arg9[%c48_208, %c0_209] : memref<64x16xbf16, #tpu.memory_space<vmem>>, vector<16x16xbf16>
    %224 = arith.truncf %222 : vector<8x16xf32> to vector<8x16xbf16>
    %cst_210 = arith.constant dense<0.000000e+00> : vector<8x16xf32>
    %225 = tpu.matmul %224, %223, %cst_210 {dimension_numbers = #tpu.dot_dimension_numbers<[1], [0], [0], [1], [0, 0, 1, 1], [], []>} : vector<8x16xbf16>, vector<16x16xbf16>, vector<8x16xf32> -> vector<8x16xf32>
    %226 = arith.addf %221, %225 : vector<8x16xf32>
    %cst_211 = arith.constant 0.000000e+00 : f32
    %227 = vector.broadcast %cst_211 : f32 to vector<1x8xf32>
    %c0_212 = arith.constant 0 : index
    %c0_213 = arith.constant 0 : index
    %228 = vector.load %arg28[%c0_212, %c0_213] : memref<18x8xf32, #tpu.memory_space<vmem>>, vector<1x8xf32>
    tpu.vector_store %arg28[%c0_212, %c0_213], %227 {strides = array<i32>} : memref<18x8xf32, #tpu.memory_space<vmem>>, vector<1x8xf32>,
    %c1_214 = arith.constant 1 : index
    %c0_215 = arith.constant 0 : index
    %229 = vector.load %arg28[%c1_214, %c0_215] : memref<18x8xf32, #tpu.memory_space<vmem>>, vector<16x8xf32>
    tpu.vector_store %arg28[%c1_214, %c0_215], %166 {strides = array<i32>} : memref<18x8xf32, #tpu.memory_space<vmem>>, vector<16x8xf32>,
    %cst_216 = arith.constant 0.000000e+00 : f32
    %230 = vector.broadcast %cst_216 : f32 to vector<1x8xf32>
    %c17_217 = arith.constant 17 : index
    %c0_218 = arith.constant 0 : index
    %231 = vector.load %arg28[%c17_217, %c0_218] : memref<18x8xf32, #tpu.memory_space<vmem>>, vector<1x8xf32>
    tpu.vector_store %arg28[%c17_217, %c0_218], %230 {strides = array<i32>} : memref<18x8xf32, #tpu.memory_space<vmem>>, vector<1x8xf32>,
    %cst_219 = arith.constant 0.000000e+00 : f32
    %232 = vector.broadcast %cst_219 : f32 to vector<8x16xf32>
    %c0_220 = arith.constant 0 : index
    %c0_221 = arith.constant 0 : index
    %233 = tpu.strided_load %arg28[%c0_220, %c0_221] {strides = array<i32: 2, 1>} : memref<18x8xf32, #tpu.memory_space<vmem>>, vector<8x8xf32>
    %c0_222 = arith.constant 0 : index
    %c0_223 = arith.constant 0 : index
    %234 = vector.load %arg10[%c0_222, %c0_223] : memref<32x16xbf16, #tpu.memory_space<vmem>>, vector<8x16xbf16>
    %235 = arith.truncf %233 : vector<8x8xf32> to vector<8x8xbf16>
    %cst_224 = arith.constant dense<0.000000e+00> : vector<8x16xf32>
    %236 = tpu.matmul %235, %234, %cst_224 {dimension_numbers = #tpu.dot_dimension_numbers<[1], [0], [0], [1], [0, 0, 1, 1], [], []>} : vector<8x8xbf16>, vector<8x16xbf16>, vector<8x16xf32> -> vector<8x16xf32>
    %237 = arith.addf %232, %236 : vector<8x16xf32>
    %c1_225 = arith.constant 1 : index
    %c0_226 = arith.constant 0 : index
    %238 = tpu.strided_load %arg28[%c1_225, %c0_226] {strides = array<i32: 2, 1>} : memref<18x8xf32, #tpu.memory_space<vmem>>, vector<8x8xf32>
    %c8_227 = arith.constant 8 : index
    %c0_228 = arith.constant 0 : index
    %239 = vector.load %arg10[%c8_227, %c0_228] : memref<32x16xbf16, #tpu.memory_space<vmem>>, vector<8x16xbf16>
    %240 = arith.truncf %238 : vector<8x8xf32> to vector<8x8xbf16>
    %cst_229 = arith.constant dense<0.000000e+00> : vector<8x16xf32>
    %241 = tpu.matmul %240, %239, %cst_229 {dimension_numbers = #tpu.dot_dimension_numbers<[1], [0], [0], [1], [0, 0, 1, 1], [], []>} : vector<8x8xbf16>, vector<8x16xbf16>, vector<8x16xf32> -> vector<8x16xf32>
    %242 = arith.addf %237, %241 : vector<8x16xf32>
    %c2_230 = arith.constant 2 : index
    %c0_231 = arith.constant 0 : index
    %243 = tpu.strided_load %arg28[%c2_230, %c0_231] {strides = array<i32: 2, 1>} : memref<18x8xf32, #tpu.memory_space<vmem>>, vector<8x8xf32>
    %c16_232 = arith.constant 16 : index
    %c0_233 = arith.constant 0 : index
    %244 = vector.load %arg10[%c16_232, %c0_233] : memref<32x16xbf16, #tpu.memory_space<vmem>>, vector<8x16xbf16>
    %245 = arith.truncf %243 : vector<8x8xf32> to vector<8x8xbf16>
    %cst_234 = arith.constant dense<0.000000e+00> : vector<8x16xf32>
    %246 = tpu.matmul %245, %244, %cst_234 {dimension_numbers = #tpu.dot_dimension_numbers<[1], [0], [0], [1], [0, 0, 1, 1], [], []>} : vector<8x8xbf16>, vector<8x16xbf16>, vector<8x16xf32> -> vector<8x16xf32>
    %247 = arith.addf %242, %246 : vector<8x16xf32>
    %c3_235 = arith.constant 3 : index
    %c0_236 = arith.constant 0 : index
    %248 = tpu.strided_load %arg28[%c3_235, %c0_236] {strides = array<i32: 2, 1>} : memref<18x8xf32, #tpu.memory_space<vmem>>, vector<8x8xf32>
    %c24_237 = arith.constant 24 : index
    %c0_238 = arith.constant 0 : index
    %249 = vector.load %arg10[%c24_237, %c0_238] : memref<32x16xbf16, #tpu.memory_space<vmem>>, vector<8x16xbf16>
    %250 = arith.truncf %248 : vector<8x8xf32> to vector<8x8xbf16>
    %cst_239 = arith.constant dense<0.000000e+00> : vector<8x16xf32>
    %251 = tpu.matmul %250, %249, %cst_239 {dimension_numbers = #tpu.dot_dimension_numbers<[1], [0], [0], [1], [0, 0, 1, 1], [], []>} : vector<8x8xbf16>, vector<8x16xbf16>, vector<8x16xf32> -> vector<8x16xf32>
    %252 = arith.addf %247, %251 : vector<8x16xf32>
    %c0_240 = arith.constant 0 : index
    %c0_241 = arith.constant 0 : index
    %253 = vector.load %arg13[%c0_240, %c0_241] : memref<1x16xf32, #tpu.memory_space<vmem>>, vector<1x16xf32>
    %c0_242 = arith.constant 0 : index
    %c0_243 = arith.constant 0 : index
    %254 = vector.load %arg14[%c0_242, %c0_243] : memref<1x16xf32, #tpu.memory_space<vmem>>, vector<1x16xf32>
    %cst_244 = arith.constant dense<0.000000e+00> : vector<16xf32>
    %255 = vector.multi_reduction <add>, %117, %cst_244 [0] : vector<8x16xf32> to vector<16xf32>
    %256 = vector.shape_cast %255 : vector<16xf32> to vector<1x16xf32>
    %257 = arith.mulf %117, %117 : vector<8x16xf32>
    %cst_245 = arith.constant dense<0.000000e+00> : vector<16xf32>
    %258 = vector.multi_reduction <add>, %257, %cst_245 [0] : vector<8x16xf32> to vector<16xf32>
    %259 = vector.shape_cast %258 : vector<16xf32> to vector<1x16xf32>
    %cst_246 = arith.constant dense<0.000000e+00> : vector<16xf32>
    %260 = vector.multi_reduction <add>, %226, %cst_246 [0] : vector<8x16xf32> to vector<16xf32>
    %261 = vector.shape_cast %260 : vector<16xf32> to vector<1x16xf32>
    %262 = arith.mulf %226, %226 : vector<8x16xf32>
    %cst_247 = arith.constant dense<0.000000e+00> : vector<16xf32>
    %263 = vector.multi_reduction <add>, %262, %cst_247 [0] : vector<8x16xf32> to vector<16xf32>
    %264 = vector.shape_cast %263 : vector<16xf32> to vector<1x16xf32>
    %265 = arith.addf %256, %261 : vector<1x16xf32>
    %266 = arith.addf %259, %264 : vector<1x16xf32>
    %cst_248 = arith.constant 1.600000e+01 : f32
    %267 = vector.broadcast %cst_248 : f32 to vector<1x16xf32>
    %268 = arith.divf %265, %267 : vector<1x16xf32>
    %cst_249 = arith.constant 1.600000e+01 : f32
    %269 = vector.broadcast %cst_249 : f32 to vector<1x16xf32>
    %270 = arith.divf %266, %269 : vector<1x16xf32>
    %271 = arith.mulf %268, %268 : vector<1x16xf32>
    %272 = arith.subf %270, %271 : vector<1x16xf32>
    %cst_250 = arith.constant 9.99999974E-6 : f32
    %273 = vector.broadcast %cst_250 : f32 to vector<1x16xf32>
    %274 = arith.addf %272, %273 : vector<1x16xf32>
    %275 = math.rsqrt %274 : vector<1x16xf32>
    %276 = arith.mulf %275, %253 : vector<1x16xf32>
    %277 = vector.broadcast %268 : vector<1x16xf32> to vector<8x16xf32>
    %278 = arith.subf %117, %277 : vector<8x16xf32>
    %279 = vector.broadcast %276 : vector<1x16xf32> to vector<8x16xf32>
    %280 = arith.mulf %278, %279 : vector<8x16xf32>
    %281 = vector.broadcast %254 : vector<1x16xf32> to vector<8x16xf32>
    %282 = arith.addf %280, %281 : vector<8x16xf32>
    %283 = arith.addf %282, %143 : vector<8x16xf32>
    %cst_251 = arith.constant 0.707106769 : f32
    %284 = vector.broadcast %cst_251 : f32 to vector<8x16xf32>
    %285 = arith.mulf %283, %284 : vector<8x16xf32>
    %286 = vector.broadcast %268 : vector<1x16xf32> to vector<8x16xf32>
    %287 = arith.subf %226, %286 : vector<8x16xf32>
    %288 = vector.broadcast %276 : vector<1x16xf32> to vector<8x16xf32>
    %289 = arith.mulf %287, %288 : vector<8x16xf32>
    %290 = vector.broadcast %254 : vector<1x16xf32> to vector<8x16xf32>
    %291 = arith.addf %289, %290 : vector<8x16xf32>
    %292 = arith.addf %291, %252 : vector<8x16xf32>
    %cst_252 = arith.constant 0.707106769 : f32
    %293 = vector.broadcast %cst_252 : f32 to vector<8x16xf32>
    %294 = arith.mulf %292, %293 : vector<8x16xf32>
    %cst_253 = arith.constant 0.000000e+00 : f32
    %295 = vector.broadcast %cst_253 : f32 to vector<8x16xf32>
    %296 = arith.cmpf oge, %285, %295 : vector<8x16xf32>
    %cst_254 = arith.constant 2.000000e-01 : f32
    %297 = vector.broadcast %cst_254 : f32 to vector<8x16xf32>
    %298 = arith.mulf %297, %285 : vector<8x16xf32>
    %299 = arith.select %296, %285, %298 : vector<8x16xi1>, vector<8x16xf32>
    %cst_255 = arith.constant 0.000000e+00 : f32
    %300 = vector.broadcast %cst_255 : f32 to vector<1x16xf32>
    %c0_256 = arith.constant 0 : index
    %c0_257 = arith.constant 0 : index
    %301 = vector.load %arg29[%c0_256, %c0_257] : memref<10x16xf32, #tpu.memory_space<vmem>>, vector<1x16xf32>
    tpu.vector_store %arg29[%c0_256, %c0_257], %300 {strides = array<i32>} : memref<10x16xf32, #tpu.memory_space<vmem>>, vector<1x16xf32>,
    %c1_258 = arith.constant 1 : index
    %c0_259 = arith.constant 0 : index
    %302 = vector.load %arg29[%c1_258, %c0_259] : memref<10x16xf32, #tpu.memory_space<vmem>>, vector<8x16xf32>
    tpu.vector_store %arg29[%c1_258, %c0_259], %299 {strides = array<i32>} : memref<10x16xf32, #tpu.memory_space<vmem>>, vector<8x16xf32>,
    %cst_260 = arith.constant 0.000000e+00 : f32
    %303 = vector.broadcast %cst_260 : f32 to vector<1x16xf32>
    %c9 = arith.constant 9 : index
    %c0_261 = arith.constant 0 : index
    %304 = vector.load %arg29[%c9, %c0_261] : memref<10x16xf32, #tpu.memory_space<vmem>>, vector<1x16xf32>
    tpu.vector_store %arg29[%c9, %c0_261], %303 {strides = array<i32>} : memref<10x16xf32, #tpu.memory_space<vmem>>, vector<1x16xf32>,
    %cst_262 = arith.constant 0.000000e+00 : f32
    %305 = vector.broadcast %cst_262 : f32 to vector<8x32xf32>
    %c0_263 = arith.constant 0 : index
    %c0_264 = arith.constant 0 : index
    %306 = vector.load %arg29[%c0_263, %c0_264] : memref<10x16xf32, #tpu.memory_space<vmem>>, vector<8x16xf32>
    %c0_265 = arith.constant 0 : index
    %c0_266 = arith.constant 0 : index
    %307 = vector.load %arg15[%c0_265, %c0_266] : memref<48x32xbf16, #tpu.memory_space<vmem>>, vector<16x32xbf16>
    %308 = arith.truncf %306 : vector<8x16xf32> to vector<8x16xbf16>
    %cst_267 = arith.constant dense<0.000000e+00> : vector<8x32xf32>
    %309 = tpu.matmul %308, %307, %cst_267 {dimension_numbers = #tpu.dot_dimension_numbers<[1], [0], [0], [1], [0, 0, 1, 1], [], []>} : vector<8x16xbf16>, vector<16x32xbf16>, vector<8x32xf32> -> vector<8x32xf32>
    %310 = arith.addf %305, %309 : vector<8x32xf32>
    %c1_268 = arith.constant 1 : index
    %c0_269 = arith.constant 0 : index
    %311 = vector.load %arg29[%c1_268, %c0_269] : memref<10x16xf32, #tpu.memory_space<vmem>>, vector<8x16xf32>
    %c16_270 = arith.constant 16 : index
    %c0_271 = arith.constant 0 : index
    %312 = vector.load %arg15[%c16_270, %c0_271] : memref<48x32xbf16, #tpu.memory_space<vmem>>, vector<16x32xbf16>
    %313 = arith.truncf %311 : vector<8x16xf32> to vector<8x16xbf16>
    %cst_272 = arith.constant dense<0.000000e+00> : vector<8x32xf32>
    %314 = tpu.matmul %313, %312, %cst_272 {dimension_numbers = #tpu.dot_dimension_numbers<[1], [0], [0], [1], [0, 0, 1, 1], [], []>} : vector<8x16xbf16>, vector<16x32xbf16>, vector<8x32xf32> -> vector<8x32xf32>
    %315 = arith.addf %310, %314 : vector<8x32xf32>
    %c2_273 = arith.constant 2 : index
    %c0_274 = arith.constant 0 : index
    %316 = vector.load %arg29[%c2_273, %c0_274] : memref<10x16xf32, #tpu.memory_space<vmem>>, vector<8x16xf32>
    %c32_275 = arith.constant 32 : index
    %c0_276 = arith.constant 0 : index
    %317 = vector.load %arg15[%c32_275, %c0_276] : memref<48x32xbf16, #tpu.memory_space<vmem>>, vector<16x32xbf16>
    %318 = arith.truncf %316 : vector<8x16xf32> to vector<8x16xbf16>
    %cst_277 = arith.constant dense<0.000000e+00> : vector<8x32xf32>
    %319 = tpu.matmul %318, %317, %cst_277 {dimension_numbers = #tpu.dot_dimension_numbers<[1], [0], [0], [1], [0, 0, 1, 1], [], []>} : vector<8x16xbf16>, vector<16x32xbf16>, vector<8x32xf32> -> vector<8x32xf32>
    %320 = arith.addf %315, %319 : vector<8x32xf32>
    %321 = vector.extract_strided_slice %34 {offsets = [0, 0], sizes = [1, 32], strides = [1, 1]} : vector<2x32xf32> to vector<1x32xf32>
    %322 = vector.broadcast %321 : vector<1x32xf32> to vector<8x32xf32>
    %323 = arith.addf %320, %322 : vector<8x32xf32>
    %cst_278 = arith.constant 0.000000e+00 : f32
    %324 = vector.broadcast %cst_278 : f32 to vector<8x32xf32>
    %325 = arith.cmpf oge, %323, %324 : vector<8x32xf32>
    %cst_279 = arith.constant 2.000000e-01 : f32
    %326 = vector.broadcast %cst_279 : f32 to vector<8x32xf32>
    %327 = arith.mulf %326, %323 : vector<8x32xf32>
    %328 = arith.select %325, %323, %327 : vector<8x32xi1>, vector<8x32xf32>
    %cst_280 = arith.constant 0.000000e+00 : f32
    %329 = vector.broadcast %cst_280 : f32 to vector<1x32xf32>
    %c0_281 = arith.constant 0 : index
    %c0_282 = arith.constant 0 : index
    %330 = vector.load %arg30[%c0_281, %c0_282] : memref<10x32xf32, #tpu.memory_space<vmem>>, vector<1x32xf32>
    tpu.vector_store %arg30[%c0_281, %c0_282], %329 {strides = array<i32>} : memref<10x32xf32, #tpu.memory_space<vmem>>, vector<1x32xf32>,
    %c1_283 = arith.constant 1 : index
    %c0_284 = arith.constant 0 : index
    %331 = vector.load %arg30[%c1_283, %c0_284] : memref<10x32xf32, #tpu.memory_space<vmem>>, vector<8x32xf32>
    tpu.vector_store %arg30[%c1_283, %c0_284], %328 {strides = array<i32>} : memref<10x32xf32, #tpu.memory_space<vmem>>, vector<8x32xf32>,
    %cst_285 = arith.constant 0.000000e+00 : f32
    %332 = vector.broadcast %cst_285 : f32 to vector<1x32xf32>
    %c9_286 = arith.constant 9 : index
    %c0_287 = arith.constant 0 : index
    %333 = vector.load %arg30[%c9_286, %c0_287] : memref<10x32xf32, #tpu.memory_space<vmem>>, vector<1x32xf32>
    tpu.vector_store %arg30[%c9_286, %c0_287], %332 {strides = array<i32>} : memref<10x32xf32, #tpu.memory_space<vmem>>, vector<1x32xf32>,
    %cst_288 = arith.constant 0.000000e+00 : f32
    %334 = vector.broadcast %cst_288 : f32 to vector<4x32xf32>
    %c0_289 = arith.constant 0 : index
    %c0_290 = arith.constant 0 : index
    %335 = tpu.strided_load %arg30[%c0_289, %c0_290] {strides = array<i32: 2, 1>} : memref<10x32xf32, #tpu.memory_space<vmem>>, vector<4x32xf32>
    %c0_291 = arith.constant 0 : index
    %c0_292 = arith.constant 0 : index
    %336 = vector.load %arg16[%c0_291, %c0_292] : memref<128x32xbf16, #tpu.memory_space<vmem>>, vector<32x32xbf16>
    %337 = arith.truncf %335 : vector<4x32xf32> to vector<4x32xbf16>
    %cst_293 = arith.constant dense<0.000000e+00> : vector<4x32xf32>
    %338 = tpu.matmul %337, %336, %cst_293 {dimension_numbers = #tpu.dot_dimension_numbers<[1], [0], [0], [1], [0, 0, 1, 1], [], []>} : vector<4x32xbf16>, vector<32x32xbf16>, vector<4x32xf32> -> vector<4x32xf32>
    %339 = arith.addf %334, %338 : vector<4x32xf32>
    %c1_294 = arith.constant 1 : index
    %c0_295 = arith.constant 0 : index
    %340 = tpu.strided_load %arg30[%c1_294, %c0_295] {strides = array<i32: 2, 1>} : memref<10x32xf32, #tpu.memory_space<vmem>>, vector<4x32xf32>
    %c32_296 = arith.constant 32 : index
    %c0_297 = arith.constant 0 : index
    %341 = vector.load %arg16[%c32_296, %c0_297] : memref<128x32xbf16, #tpu.memory_space<vmem>>, vector<32x32xbf16>
    %342 = arith.truncf %340 : vector<4x32xf32> to vector<4x32xbf16>
    %cst_298 = arith.constant dense<0.000000e+00> : vector<4x32xf32>
    %343 = tpu.matmul %342, %341, %cst_298 {dimension_numbers = #tpu.dot_dimension_numbers<[1], [0], [0], [1], [0, 0, 1, 1], [], []>} : vector<4x32xbf16>, vector<32x32xbf16>, vector<4x32xf32> -> vector<4x32xf32>
    %344 = arith.addf %339, %343 : vector<4x32xf32>
    %c2_299 = arith.constant 2 : index
    %c0_300 = arith.constant 0 : index
    %345 = tpu.strided_load %arg30[%c2_299, %c0_300] {strides = array<i32: 2, 1>} : memref<10x32xf32, #tpu.memory_space<vmem>>, vector<4x32xf32>
    %c64 = arith.constant 64 : index
    %c0_301 = arith.constant 0 : index
    %346 = vector.load %arg16[%c64, %c0_301] : memref<128x32xbf16, #tpu.memory_space<vmem>>, vector<32x32xbf16>
    %347 = arith.truncf %345 : vector<4x32xf32> to vector<4x32xbf16>
    %cst_302 = arith.constant dense<0.000000e+00> : vector<4x32xf32>
    %348 = tpu.matmul %347, %346, %cst_302 {dimension_numbers = #tpu.dot_dimension_numbers<[1], [0], [0], [1], [0, 0, 1, 1], [], []>} : vector<4x32xbf16>, vector<32x32xbf16>, vector<4x32xf32> -> vector<4x32xf32>
    %349 = arith.addf %344, %348 : vector<4x32xf32>
    %c3_303 = arith.constant 3 : index
    %c0_304 = arith.constant 0 : index
    %350 = tpu.strided_load %arg30[%c3_303, %c0_304] {strides = array<i32: 2, 1>} : memref<10x32xf32, #tpu.memory_space<vmem>>, vector<4x32xf32>
    %c96 = arith.constant 96 : index
    %c0_305 = arith.constant 0 : index
    %351 = vector.load %arg16[%c96, %c0_305] : memref<128x32xbf16, #tpu.memory_space<vmem>>, vector<32x32xbf16>
    %352 = arith.truncf %350 : vector<4x32xf32> to vector<4x32xbf16>
    %cst_306 = arith.constant dense<0.000000e+00> : vector<4x32xf32>
    %353 = tpu.matmul %352, %351, %cst_306 {dimension_numbers = #tpu.dot_dimension_numbers<[1], [0], [0], [1], [0, 0, 1, 1], [], []>} : vector<4x32xbf16>, vector<32x32xbf16>, vector<4x32xf32> -> vector<4x32xf32>
    %354 = arith.addf %349, %353 : vector<4x32xf32>
    %cst_307 = arith.constant 0.000000e+00 : f32
    %355 = vector.broadcast %cst_307 : f32 to vector<1x16xf32>
    %c0_308 = arith.constant 0 : index
    %c0_309 = arith.constant 0 : index
    %356 = vector.load %arg31[%c0_308, %c0_309] : memref<10x16xf32, #tpu.memory_space<vmem>>, vector<1x16xf32>
    tpu.vector_store %arg31[%c0_308, %c0_309], %355 {strides = array<i32>} : memref<10x16xf32, #tpu.memory_space<vmem>>, vector<1x16xf32>,
    %c1_310 = arith.constant 1 : index
    %c0_311 = arith.constant 0 : index
    %357 = vector.load %arg31[%c1_310, %c0_311] : memref<10x16xf32, #tpu.memory_space<vmem>>, vector<8x16xf32>
    tpu.vector_store %arg31[%c1_310, %c0_311], %285 {strides = array<i32>} : memref<10x16xf32, #tpu.memory_space<vmem>>, vector<8x16xf32>,
    %cst_312 = arith.constant 0.000000e+00 : f32
    %358 = vector.broadcast %cst_312 : f32 to vector<1x16xf32>
    %c9_313 = arith.constant 9 : index
    %c0_314 = arith.constant 0 : index
    %359 = vector.load %arg31[%c9_313, %c0_314] : memref<10x16xf32, #tpu.memory_space<vmem>>, vector<1x16xf32>
    tpu.vector_store %arg31[%c9_313, %c0_314], %358 {strides = array<i32>} : memref<10x16xf32, #tpu.memory_space<vmem>>, vector<1x16xf32>,
    %cst_315 = arith.constant 0.000000e+00 : f32
    %360 = vector.broadcast %cst_315 : f32 to vector<4x32xf32>
    %c0_316 = arith.constant 0 : index
    %c0_317 = arith.constant 0 : index
    %361 = tpu.strided_load %arg31[%c0_316, %c0_317] {strides = array<i32: 2, 1>} : memref<10x16xf32, #tpu.memory_space<vmem>>, vector<4x16xf32>
    %c0_318 = arith.constant 0 : index
    %c0_319 = arith.constant 0 : index
    %362 = vector.load %arg17[%c0_318, %c0_319] : memref<64x32xbf16, #tpu.memory_space<vmem>>, vector<16x32xbf16>
    %363 = arith.truncf %361 : vector<4x16xf32> to vector<4x16xbf16>
    %cst_320 = arith.constant dense<0.000000e+00> : vector<4x32xf32>
    %364 = tpu.matmul %363, %362, %cst_320 {dimension_numbers = #tpu.dot_dimension_numbers<[1], [0], [0], [1], [0, 0, 1, 1], [], []>} : vector<4x16xbf16>, vector<16x32xbf16>, vector<4x32xf32> -> vector<4x32xf32>
    %365 = arith.addf %360, %364 : vector<4x32xf32>
    %c1_321 = arith.constant 1 : index
    %c0_322 = arith.constant 0 : index
    %366 = tpu.strided_load %arg31[%c1_321, %c0_322] {strides = array<i32: 2, 1>} : memref<10x16xf32, #tpu.memory_space<vmem>>, vector<4x16xf32>
    %c16_323 = arith.constant 16 : index
    %c0_324 = arith.constant 0 : index
    %367 = vector.load %arg17[%c16_323, %c0_324] : memref<64x32xbf16, #tpu.memory_space<vmem>>, vector<16x32xbf16>
    %368 = arith.truncf %366 : vector<4x16xf32> to vector<4x16xbf16>
    %cst_325 = arith.constant dense<0.000000e+00> : vector<4x32xf32>
    %369 = tpu.matmul %368, %367, %cst_325 {dimension_numbers = #tpu.dot_dimension_numbers<[1], [0], [0], [1], [0, 0, 1, 1], [], []>} : vector<4x16xbf16>, vector<16x32xbf16>, vector<4x32xf32> -> vector<4x32xf32>
    %370 = arith.addf %365, %369 : vector<4x32xf32>
    %c2_326 = arith.constant 2 : index
    %c0_327 = arith.constant 0 : index
    %371 = tpu.strided_load %arg31[%c2_326, %c0_327] {strides = array<i32: 2, 1>} : memref<10x16xf32, #tpu.memory_space<vmem>>, vector<4x16xf32>
    %c32_328 = arith.constant 32 : index
    %c0_329 = arith.constant 0 : index
    %372 = vector.load %arg17[%c32_328, %c0_329] : memref<64x32xbf16, #tpu.memory_space<vmem>>, vector<16x32xbf16>
    %373 = arith.truncf %371 : vector<4x16xf32> to vector<4x16xbf16>
    %cst_330 = arith.constant dense<0.000000e+00> : vector<4x32xf32>
    %374 = tpu.matmul %373, %372, %cst_330 {dimension_numbers = #tpu.dot_dimension_numbers<[1], [0], [0], [1], [0, 0, 1, 1], [], []>} : vector<4x16xbf16>, vector<16x32xbf16>, vector<4x32xf32> -> vector<4x32xf32>
    %375 = arith.addf %370, %374 : vector<4x32xf32>
    %c3_331 = arith.constant 3 : index
    %c0_332 = arith.constant 0 : index
    %376 = tpu.strided_load %arg31[%c3_331, %c0_332] {strides = array<i32: 2, 1>} : memref<10x16xf32, #tpu.memory_space<vmem>>, vector<4x16xf32>
    %c48_333 = arith.constant 48 : index
    %c0_334 = arith.constant 0 : index
    %377 = vector.load %arg17[%c48_333, %c0_334] : memref<64x32xbf16, #tpu.memory_space<vmem>>, vector<16x32xbf16>
    %378 = arith.truncf %376 : vector<4x16xf32> to vector<4x16xbf16>
    %cst_335 = arith.constant dense<0.000000e+00> : vector<4x32xf32>
    %379 = tpu.matmul %378, %377, %cst_335 {dimension_numbers = #tpu.dot_dimension_numbers<[1], [0], [0], [1], [0, 0, 1, 1], [], []>} : vector<4x16xbf16>, vector<16x32xbf16>, vector<4x32xf32> -> vector<4x32xf32>
    %380 = arith.addf %375, %379 : vector<4x32xf32>
    %cst_336 = arith.constant 0.000000e+00 : f32
    %381 = vector.broadcast %cst_336 : f32 to vector<8x16xf32>
    %382 = arith.cmpf oge, %294, %381 : vector<8x16xf32>
    %cst_337 = arith.constant 2.000000e-01 : f32
    %383 = vector.broadcast %cst_337 : f32 to vector<8x16xf32>
    %384 = arith.mulf %383, %294 : vector<8x16xf32>
    %385 = arith.select %382, %294, %384 : vector<8x16xi1>, vector<8x16xf32>
    %cst_338 = arith.constant 0.000000e+00 : f32
    %386 = vector.broadcast %cst_338 : f32 to vector<1x16xf32>
    %c0_339 = arith.constant 0 : index
    %c0_340 = arith.constant 0 : index
    %387 = vector.load %arg29[%c0_339, %c0_340] : memref<10x16xf32, #tpu.memory_space<vmem>>, vector<1x16xf32>
    tpu.vector_store %arg29[%c0_339, %c0_340], %386 {strides = array<i32>} : memref<10x16xf32, #tpu.memory_space<vmem>>, vector<1x16xf32>,
    %c1_341 = arith.constant 1 : index
    %c0_342 = arith.constant 0 : index
    %388 = vector.load %arg29[%c1_341, %c0_342] : memref<10x16xf32, #tpu.memory_space<vmem>>, vector<8x16xf32>
    tpu.vector_store %arg29[%c1_341, %c0_342], %385 {strides = array<i32>} : memref<10x16xf32, #tpu.memory_space<vmem>>, vector<8x16xf32>,
    %cst_343 = arith.constant 0.000000e+00 : f32
    %389 = vector.broadcast %cst_343 : f32 to vector<1x16xf32>
    %c9_344 = arith.constant 9 : index
    %c0_345 = arith.constant 0 : index
    %390 = vector.load %arg29[%c9_344, %c0_345] : memref<10x16xf32, #tpu.memory_space<vmem>>, vector<1x16xf32>
    tpu.vector_store %arg29[%c9_344, %c0_345], %389 {strides = array<i32>} : memref<10x16xf32, #tpu.memory_space<vmem>>, vector<1x16xf32>,
    %cst_346 = arith.constant 0.000000e+00 : f32
    %391 = vector.broadcast %cst_346 : f32 to vector<8x32xf32>
    %c0_347 = arith.constant 0 : index
    %c0_348 = arith.constant 0 : index
    %392 = vector.load %arg29[%c0_347, %c0_348] : memref<10x16xf32, #tpu.memory_space<vmem>>, vector<8x16xf32>
    %c0_349 = arith.constant 0 : index
    %c0_350 = arith.constant 0 : index
    %393 = vector.load %arg15[%c0_349, %c0_350] : memref<48x32xbf16, #tpu.memory_space<vmem>>, vector<16x32xbf16>
    %394 = arith.truncf %392 : vector<8x16xf32> to vector<8x16xbf16>
    %cst_351 = arith.constant dense<0.000000e+00> : vector<8x32xf32>
    %395 = tpu.matmul %394, %393, %cst_351 {dimension_numbers = #tpu.dot_dimension_numbers<[1], [0], [0], [1], [0, 0, 1, 1], [], []>} : vector<8x16xbf16>, vector<16x32xbf16>, vector<8x32xf32> -> vector<8x32xf32>
    %396 = arith.addf %391, %395 : vector<8x32xf32>
    %c1_352 = arith.constant 1 : index
    %c0_353 = arith.constant 0 : index
    %397 = vector.load %arg29[%c1_352, %c0_353] : memref<10x16xf32, #tpu.memory_space<vmem>>, vector<8x16xf32>
    %c16_354 = arith.constant 16 : index
    %c0_355 = arith.constant 0 : index
    %398 = vector.load %arg15[%c16_354, %c0_355] : memref<48x32xbf16, #tpu.memory_space<vmem>>, vector<16x32xbf16>
    %399 = arith.truncf %397 : vector<8x16xf32> to vector<8x16xbf16>
    %cst_356 = arith.constant dense<0.000000e+00> : vector<8x32xf32>
    %400 = tpu.matmul %399, %398, %cst_356 {dimension_numbers = #tpu.dot_dimension_numbers<[1], [0], [0], [1], [0, 0, 1, 1], [], []>} : vector<8x16xbf16>, vector<16x32xbf16>, vector<8x32xf32> -> vector<8x32xf32>
    %401 = arith.addf %396, %400 : vector<8x32xf32>
    %c2_357 = arith.constant 2 : index
    %c0_358 = arith.constant 0 : index
    %402 = vector.load %arg29[%c2_357, %c0_358] : memref<10x16xf32, #tpu.memory_space<vmem>>, vector<8x16xf32>
    %c32_359 = arith.constant 32 : index
    %c0_360 = arith.constant 0 : index
    %403 = vector.load %arg15[%c32_359, %c0_360] : memref<48x32xbf16, #tpu.memory_space<vmem>>, vector<16x32xbf16>
    %404 = arith.truncf %402 : vector<8x16xf32> to vector<8x16xbf16>
    %cst_361 = arith.constant dense<0.000000e+00> : vector<8x32xf32>
    %405 = tpu.matmul %404, %403, %cst_361 {dimension_numbers = #tpu.dot_dimension_numbers<[1], [0], [0], [1], [0, 0, 1, 1], [], []>} : vector<8x16xbf16>, vector<16x32xbf16>, vector<8x32xf32> -> vector<8x32xf32>
    %406 = arith.addf %401, %405 : vector<8x32xf32>
    %407 = vector.extract_strided_slice %34 {offsets = [1, 0], sizes = [1, 32], strides = [1, 1]} : vector<2x32xf32> to vector<1x32xf32>
    %408 = vector.broadcast %407 : vector<1x32xf32> to vector<8x32xf32>
    %409 = arith.addf %406, %408 : vector<8x32xf32>
    %cst_362 = arith.constant 0.000000e+00 : f32
    %410 = vector.broadcast %cst_362 : f32 to vector<8x32xf32>
    %411 = arith.cmpf oge, %409, %410 : vector<8x32xf32>
    %cst_363 = arith.constant 2.000000e-01 : f32
    %412 = vector.broadcast %cst_363 : f32 to vector<8x32xf32>
    %413 = arith.mulf %412, %409 : vector<8x32xf32>
    %414 = arith.select %411, %409, %413 : vector<8x32xi1>, vector<8x32xf32>
    %cst_364 = arith.constant 0.000000e+00 : f32
    %415 = vector.broadcast %cst_364 : f32 to vector<1x32xf32>
    %c0_365 = arith.constant 0 : index
    %c0_366 = arith.constant 0 : index
    %416 = vector.load %arg30[%c0_365, %c0_366] : memref<10x32xf32, #tpu.memory_space<vmem>>, vector<1x32xf32>
    tpu.vector_store %arg30[%c0_365, %c0_366], %415 {strides = array<i32>} : memref<10x32xf32, #tpu.memory_space<vmem>>, vector<1x32xf32>,
    %c1_367 = arith.constant 1 : index
    %c0_368 = arith.constant 0 : index
    %417 = vector.load %arg30[%c1_367, %c0_368] : memref<10x32xf32, #tpu.memory_space<vmem>>, vector<8x32xf32>
    tpu.vector_store %arg30[%c1_367, %c0_368], %414 {strides = array<i32>} : memref<10x32xf32, #tpu.memory_space<vmem>>, vector<8x32xf32>,
    %cst_369 = arith.constant 0.000000e+00 : f32
    %418 = vector.broadcast %cst_369 : f32 to vector<1x32xf32>
    %c9_370 = arith.constant 9 : index
    %c0_371 = arith.constant 0 : index
    %419 = vector.load %arg30[%c9_370, %c0_371] : memref<10x32xf32, #tpu.memory_space<vmem>>, vector<1x32xf32>
    tpu.vector_store %arg30[%c9_370, %c0_371], %418 {strides = array<i32>} : memref<10x32xf32, #tpu.memory_space<vmem>>, vector<1x32xf32>,
    %cst_372 = arith.constant 0.000000e+00 : f32
    %420 = vector.broadcast %cst_372 : f32 to vector<4x32xf32>
    %c0_373 = arith.constant 0 : index
    %c0_374 = arith.constant 0 : index
    %421 = tpu.strided_load %arg30[%c0_373, %c0_374] {strides = array<i32: 2, 1>} : memref<10x32xf32, #tpu.memory_space<vmem>>, vector<4x32xf32>
    %c0_375 = arith.constant 0 : index
    %c0_376 = arith.constant 0 : index
    %422 = vector.load %arg16[%c0_375, %c0_376] : memref<128x32xbf16, #tpu.memory_space<vmem>>, vector<32x32xbf16>
    %423 = arith.truncf %421 : vector<4x32xf32> to vector<4x32xbf16>
    %cst_377 = arith.constant dense<0.000000e+00> : vector<4x32xf32>
    %424 = tpu.matmul %423, %422, %cst_377 {dimension_numbers = #tpu.dot_dimension_numbers<[1], [0], [0], [1], [0, 0, 1, 1], [], []>} : vector<4x32xbf16>, vector<32x32xbf16>, vector<4x32xf32> -> vector<4x32xf32>
    %425 = arith.addf %420, %424 : vector<4x32xf32>
    %c1_378 = arith.constant 1 : index
    %c0_379 = arith.constant 0 : index
    %426 = tpu.strided_load %arg30[%c1_378, %c0_379] {strides = array<i32: 2, 1>} : memref<10x32xf32, #tpu.memory_space<vmem>>, vector<4x32xf32>
    %c32_380 = arith.constant 32 : index
    %c0_381 = arith.constant 0 : index
    %427 = vector.load %arg16[%c32_380, %c0_381] : memref<128x32xbf16, #tpu.memory_space<vmem>>, vector<32x32xbf16>
    %428 = arith.truncf %426 : vector<4x32xf32> to vector<4x32xbf16>
    %cst_382 = arith.constant dense<0.000000e+00> : vector<4x32xf32>
    %429 = tpu.matmul %428, %427, %cst_382 {dimension_numbers = #tpu.dot_dimension_numbers<[1], [0], [0], [1], [0, 0, 1, 1], [], []>} : vector<4x32xbf16>, vector<32x32xbf16>, vector<4x32xf32> -> vector<4x32xf32>
    %430 = arith.addf %425, %429 : vector<4x32xf32>
    %c2_383 = arith.constant 2 : index
    %c0_384 = arith.constant 0 : index
    %431 = tpu.strided_load %arg30[%c2_383, %c0_384] {strides = array<i32: 2, 1>} : memref<10x32xf32, #tpu.memory_space<vmem>>, vector<4x32xf32>
    %c64_385 = arith.constant 64 : index
    %c0_386 = arith.constant 0 : index
    %432 = vector.load %arg16[%c64_385, %c0_386] : memref<128x32xbf16, #tpu.memory_space<vmem>>, vector<32x32xbf16>
    %433 = arith.truncf %431 : vector<4x32xf32> to vector<4x32xbf16>
    %cst_387 = arith.constant dense<0.000000e+00> : vector<4x32xf32>
    %434 = tpu.matmul %433, %432, %cst_387 {dimension_numbers = #tpu.dot_dimension_numbers<[1], [0], [0], [1], [0, 0, 1, 1], [], []>} : vector<4x32xbf16>, vector<32x32xbf16>, vector<4x32xf32> -> vector<4x32xf32>
    %435 = arith.addf %430, %434 : vector<4x32xf32>
    %c3_388 = arith.constant 3 : index
    %c0_389 = arith.constant 0 : index
    %436 = tpu.strided_load %arg30[%c3_388, %c0_389] {strides = array<i32: 2, 1>} : memref<10x32xf32, #tpu.memory_space<vmem>>, vector<4x32xf32>
    %c96_390 = arith.constant 96 : index
    %c0_391 = arith.constant 0 : index
    %437 = vector.load %arg16[%c96_390, %c0_391] : memref<128x32xbf16, #tpu.memory_space<vmem>>, vector<32x32xbf16>
    %438 = arith.truncf %436 : vector<4x32xf32> to vector<4x32xbf16>
    %cst_392 = arith.constant dense<0.000000e+00> : vector<4x32xf32>
    %439 = tpu.matmul %438, %437, %cst_392 {dimension_numbers = #tpu.dot_dimension_numbers<[1], [0], [0], [1], [0, 0, 1, 1], [], []>} : vector<4x32xbf16>, vector<32x32xbf16>, vector<4x32xf32> -> vector<4x32xf32>
    %440 = arith.addf %435, %439 : vector<4x32xf32>
    %cst_393 = arith.constant 0.000000e+00 : f32
    %441 = vector.broadcast %cst_393 : f32 to vector<1x16xf32>
    %c0_394 = arith.constant 0 : index
    %c0_395 = arith.constant 0 : index
    %442 = vector.load %arg31[%c0_394, %c0_395] : memref<10x16xf32, #tpu.memory_space<vmem>>, vector<1x16xf32>
    tpu.vector_store %arg31[%c0_394, %c0_395], %441 {strides = array<i32>} : memref<10x16xf32, #tpu.memory_space<vmem>>, vector<1x16xf32>,
    %c1_396 = arith.constant 1 : index
    %c0_397 = arith.constant 0 : index
    %443 = vector.load %arg31[%c1_396, %c0_397] : memref<10x16xf32, #tpu.memory_space<vmem>>, vector<8x16xf32>
    tpu.vector_store %arg31[%c1_396, %c0_397], %294 {strides = array<i32>} : memref<10x16xf32, #tpu.memory_space<vmem>>, vector<8x16xf32>,
    %cst_398 = arith.constant 0.000000e+00 : f32
    %444 = vector.broadcast %cst_398 : f32 to vector<1x16xf32>
    %c9_399 = arith.constant 9 : index
    %c0_400 = arith.constant 0 : index
    %445 = vector.load %arg31[%c9_399, %c0_400] : memref<10x16xf32, #tpu.memory_space<vmem>>, vector<1x16xf32>
    tpu.vector_store %arg31[%c9_399, %c0_400], %444 {strides = array<i32>} : memref<10x16xf32, #tpu.memory_space<vmem>>, vector<1x16xf32>,
    %cst_401 = arith.constant 0.000000e+00 : f32
    %446 = vector.broadcast %cst_401 : f32 to vector<4x32xf32>
    %c0_402 = arith.constant 0 : index
    %c0_403 = arith.constant 0 : index
    %447 = tpu.strided_load %arg31[%c0_402, %c0_403] {strides = array<i32: 2, 1>} : memref<10x16xf32, #tpu.memory_space<vmem>>, vector<4x16xf32>
    %c0_404 = arith.constant 0 : index
    %c0_405 = arith.constant 0 : index
    %448 = vector.load %arg17[%c0_404, %c0_405] : memref<64x32xbf16, #tpu.memory_space<vmem>>, vector<16x32xbf16>
    %449 = arith.truncf %447 : vector<4x16xf32> to vector<4x16xbf16>
    %cst_406 = arith.constant dense<0.000000e+00> : vector<4x32xf32>
    %450 = tpu.matmul %449, %448, %cst_406 {dimension_numbers = #tpu.dot_dimension_numbers<[1], [0], [0], [1], [0, 0, 1, 1], [], []>} : vector<4x16xbf16>, vector<16x32xbf16>, vector<4x32xf32> -> vector<4x32xf32>
    %451 = arith.addf %446, %450 : vector<4x32xf32>
    %c1_407 = arith.constant 1 : index
    %c0_408 = arith.constant 0 : index
    %452 = tpu.strided_load %arg31[%c1_407, %c0_408] {strides = array<i32: 2, 1>} : memref<10x16xf32, #tpu.memory_space<vmem>>, vector<4x16xf32>
    %c16_409 = arith.constant 16 : index
    %c0_410 = arith.constant 0 : index
    %453 = vector.load %arg17[%c16_409, %c0_410] : memref<64x32xbf16, #tpu.memory_space<vmem>>, vector<16x32xbf16>
    %454 = arith.truncf %452 : vector<4x16xf32> to vector<4x16xbf16>
    %cst_411 = arith.constant dense<0.000000e+00> : vector<4x32xf32>
    %455 = tpu.matmul %454, %453, %cst_411 {dimension_numbers = #tpu.dot_dimension_numbers<[1], [0], [0], [1], [0, 0, 1, 1], [], []>} : vector<4x16xbf16>, vector<16x32xbf16>, vector<4x32xf32> -> vector<4x32xf32>
    %456 = arith.addf %451, %455 : vector<4x32xf32>
    %c2_412 = arith.constant 2 : index
    %c0_413 = arith.constant 0 : index
    %457 = tpu.strided_load %arg31[%c2_412, %c0_413] {strides = array<i32: 2, 1>} : memref<10x16xf32, #tpu.memory_space<vmem>>, vector<4x16xf32>
    %c32_414 = arith.constant 32 : index
    %c0_415 = arith.constant 0 : index
    %458 = vector.load %arg17[%c32_414, %c0_415] : memref<64x32xbf16, #tpu.memory_space<vmem>>, vector<16x32xbf16>
    %459 = arith.truncf %457 : vector<4x16xf32> to vector<4x16xbf16>
    %cst_416 = arith.constant dense<0.000000e+00> : vector<4x32xf32>
    %460 = tpu.matmul %459, %458, %cst_416 {dimension_numbers = #tpu.dot_dimension_numbers<[1], [0], [0], [1], [0, 0, 1, 1], [], []>} : vector<4x16xbf16>, vector<16x32xbf16>, vector<4x32xf32> -> vector<4x32xf32>
    %461 = arith.addf %456, %460 : vector<4x32xf32>
    %c3_417 = arith.constant 3 : index
    %c0_418 = arith.constant 0 : index
    %462 = tpu.strided_load %arg31[%c3_417, %c0_418] {strides = array<i32: 2, 1>} : memref<10x16xf32, #tpu.memory_space<vmem>>, vector<4x16xf32>
    %c48_419 = arith.constant 48 : index
    %c0_420 = arith.constant 0 : index
    %463 = vector.load %arg17[%c48_419, %c0_420] : memref<64x32xbf16, #tpu.memory_space<vmem>>, vector<16x32xbf16>
    %464 = arith.truncf %462 : vector<4x16xf32> to vector<4x16xbf16>
    %cst_421 = arith.constant dense<0.000000e+00> : vector<4x32xf32>
    %465 = tpu.matmul %464, %463, %cst_421 {dimension_numbers = #tpu.dot_dimension_numbers<[1], [0], [0], [1], [0, 0, 1, 1], [], []>} : vector<4x16xbf16>, vector<16x32xbf16>, vector<4x32xf32> -> vector<4x32xf32>
    %466 = arith.addf %461, %465 : vector<4x32xf32>
    %c0_422 = arith.constant 0 : index
    %c0_423 = arith.constant 0 : index
    %467 = vector.load %arg20[%c0_422, %c0_423] : memref<1x32xf32, #tpu.memory_space<vmem>>, vector<1x32xf32>
    %c0_424 = arith.constant 0 : index
    %c0_425 = arith.constant 0 : index
    %468 = vector.load %arg21[%c0_424, %c0_425] : memref<1x32xf32, #tpu.memory_space<vmem>>, vector<1x32xf32>
    %cst_426 = arith.constant dense<0.000000e+00> : vector<32xf32>
    %469 = vector.multi_reduction <add>, %354, %cst_426 [0] : vector<4x32xf32> to vector<32xf32>
    %470 = vector.shape_cast %469 : vector<32xf32> to vector<1x32xf32>
    %471 = arith.mulf %354, %354 : vector<4x32xf32>
    %cst_427 = arith.constant dense<0.000000e+00> : vector<32xf32>
    %472 = vector.multi_reduction <add>, %471, %cst_427 [0] : vector<4x32xf32> to vector<32xf32>
    %473 = vector.shape_cast %472 : vector<32xf32> to vector<1x32xf32>
    %cst_428 = arith.constant dense<0.000000e+00> : vector<32xf32>
    %474 = vector.multi_reduction <add>, %440, %cst_428 [0] : vector<4x32xf32> to vector<32xf32>
    %475 = vector.shape_cast %474 : vector<32xf32> to vector<1x32xf32>
    %476 = arith.mulf %440, %440 : vector<4x32xf32>
    %cst_429 = arith.constant dense<0.000000e+00> : vector<32xf32>
    %477 = vector.multi_reduction <add>, %476, %cst_429 [0] : vector<4x32xf32> to vector<32xf32>
    %478 = vector.shape_cast %477 : vector<32xf32> to vector<1x32xf32>
    %479 = arith.addf %470, %475 : vector<1x32xf32>
    %480 = arith.addf %473, %478 : vector<1x32xf32>
    %cst_430 = arith.constant 8.000000e+00 : f32
    %481 = vector.broadcast %cst_430 : f32 to vector<1x32xf32>
    %482 = arith.divf %479, %481 : vector<1x32xf32>
    %cst_431 = arith.constant 8.000000e+00 : f32
    %483 = vector.broadcast %cst_431 : f32 to vector<1x32xf32>
    %484 = arith.divf %480, %483 : vector<1x32xf32>
    %485 = arith.mulf %482, %482 : vector<1x32xf32>
    %486 = arith.subf %484, %485 : vector<1x32xf32>
    %cst_432 = arith.constant 9.99999974E-6 : f32
    %487 = vector.broadcast %cst_432 : f32 to vector<1x32xf32>
    %488 = arith.addf %486, %487 : vector<1x32xf32>
    %489 = math.rsqrt %488 : vector<1x32xf32>
    %490 = arith.mulf %489, %467 : vector<1x32xf32>
    %491 = vector.broadcast %482 : vector<1x32xf32> to vector<4x32xf32>
    %492 = arith.subf %354, %491 : vector<4x32xf32>
    %493 = vector.broadcast %490 : vector<1x32xf32> to vector<4x32xf32>
    %494 = arith.mulf %492, %493 : vector<4x32xf32>
    %495 = vector.broadcast %468 : vector<1x32xf32> to vector<4x32xf32>
    %496 = arith.addf %494, %495 : vector<4x32xf32>
    %497 = arith.addf %496, %380 : vector<4x32xf32>
    %cst_433 = arith.constant 0.707106769 : f32
    %498 = vector.broadcast %cst_433 : f32 to vector<4x32xf32>
    %499 = arith.mulf %497, %498 : vector<4x32xf32>
    %500 = vector.broadcast %482 : vector<1x32xf32> to vector<4x32xf32>
    %501 = arith.subf %440, %500 : vector<4x32xf32>
    %502 = vector.broadcast %490 : vector<1x32xf32> to vector<4x32xf32>
    %503 = arith.mulf %501, %502 : vector<4x32xf32>
    %504 = vector.broadcast %468 : vector<1x32xf32> to vector<4x32xf32>
    %505 = arith.addf %503, %504 : vector<4x32xf32>
    %506 = arith.addf %505, %466 : vector<4x32xf32>
    %cst_434 = arith.constant 0.707106769 : f32
    %507 = vector.broadcast %cst_434 : f32 to vector<4x32xf32>
    %508 = arith.mulf %506, %507 : vector<4x32xf32>
    %c0_435 = arith.constant 0 : index
    %c0_436 = arith.constant 0 : index
    %509 = vector.load %arg22[%c0_435, %c0_436] : memref<32x2xbf16, #tpu.memory_space<vmem>>, vector<32x2xbf16>
    %c0_437 = arith.constant 0 : index
    %c0_438 = arith.constant 0 : index
    %510 = vector.load %arg23[%c0_437, %c0_438] : memref<1x2xf32, #tpu.memory_space<vmem>>, vector<1x2xf32>
    %cst_439 = arith.constant 0.000000e+00 : f32
    %511 = vector.broadcast %cst_439 : f32 to vector<4x32xf32>
    %512 = arith.cmpf oge, %499, %511 : vector<4x32xf32>
    %cst_440 = arith.constant 2.000000e-01 : f32
    %513 = vector.broadcast %cst_440 : f32 to vector<4x32xf32>
    %514 = arith.mulf %513, %499 : vector<4x32xf32>
    %515 = arith.select %512, %499, %514 : vector<4x32xi1>, vector<4x32xf32>
    %cst_441 = arith.constant dense<0.000000e+00> : vector<32xf32>
    %516 = vector.multi_reduction <add>, %515, %cst_441 [0] : vector<4x32xf32> to vector<32xf32>
    %517 = vector.shape_cast %516 : vector<32xf32> to vector<1x32xf32>
    %518 = arith.truncf %517 : vector<1x32xf32> to vector<1x32xbf16>
    %cst_442 = arith.constant dense<0.000000e+00> : vector<1x2xf32>
    %519 = tpu.matmul %518, %509, %cst_442 {dimension_numbers = #tpu.dot_dimension_numbers<[1], [0], [0], [1], [0, 0, 1, 1], [], []>} : vector<1x32xbf16>, vector<32x2xbf16>, vector<1x2xf32> -> vector<1x2xf32>
    %520 = arith.addf %519, %510 : vector<1x2xf32>
    %c0_443 = arith.constant 0 : index
    %c0_444 = arith.constant 0 : index
    %521 = vector.load %arg24[%c0_443, %c0_444] : memref<2x2xf32, #tpu.memory_space<vmem>>, vector<1x2xf32>
    tpu.vector_store %arg24[%c0_443, %c0_444], %520 {strides = array<i32>} : memref<2x2xf32, #tpu.memory_space<vmem>>, vector<1x2xf32>,
    %cst_445 = arith.constant 0.000000e+00 : f32
    %522 = vector.broadcast %cst_445 : f32 to vector<4x32xf32>
    %523 = arith.cmpf oge, %508, %522 : vector<4x32xf32>
    %cst_446 = arith.constant 2.000000e-01 : f32
    %524 = vector.broadcast %cst_446 : f32 to vector<4x32xf32>
    %525 = arith.mulf %524, %508 : vector<4x32xf32>
    %526 = arith.select %523, %508, %525 : vector<4x32xi1>, vector<4x32xf32>
    %cst_447 = arith.constant dense<0.000000e+00> : vector<32xf32>
    %527 = vector.multi_reduction <add>, %526, %cst_447 [0] : vector<4x32xf32> to vector<32xf32>
    %528 = vector.shape_cast %527 : vector<32xf32> to vector<1x32xf32>
    %529 = arith.truncf %528 : vector<1x32xf32> to vector<1x32xbf16>
    %cst_448 = arith.constant dense<0.000000e+00> : vector<1x2xf32>
    %530 = tpu.matmul %529, %509, %cst_448 {dimension_numbers = #tpu.dot_dimension_numbers<[1], [0], [0], [1], [0, 0, 1, 1], [], []>} : vector<1x32xbf16>, vector<32x2xbf16>, vector<1x2xf32> -> vector<1x2xf32>
    %531 = arith.addf %530, %510 : vector<1x2xf32>
    %c1_449 = arith.constant 1 : index
    %c0_450 = arith.constant 0 : index
    %532 = vector.load %arg24[%c1_449, %c0_450] : memref<2x2xf32, #tpu.memory_space<vmem>>, vector<1x2xf32>
    tpu.vector_store %arg24[%c1_449, %c0_450], %531 {strides = array<i32>} : memref<2x2xf32, #tpu.memory_space<vmem>>, vector<1x2xf32>,
    return
  }
  func.func @transform_0(%arg0: i32) -> (i32, i32) {
    %c0_i32 = arith.constant 0 : i32
    %c0_i32_0 = arith.constant 0 : i32
    %c0_i32_1 = arith.constant 0 : i32
    return %c0_i32, %c0_i32_0 : i32, i32
  }
  func.func @transform_1(%arg0: i32) -> (i32, i32, i32) {
    %c0_i32 = arith.constant 0 : i32
    %c0_i32_0 = arith.constant 0 : i32
    %c0_i32_1 = arith.constant 0 : i32
    %c0_i32_2 = arith.constant 0 : i32
    return %c0_i32, %c0_i32_0, %c0_i32_1 : i32, i32, i32
  }
  func.func @transform_2(%arg0: i32) -> (i32, i32) {
    %c0_i32 = arith.constant 0 : i32
    %c0_i32_0 = arith.constant 0 : i32
    %c0_i32_1 = arith.constant 0 : i32
    return %c0_i32, %c0_i32_0 : i32, i32
  }
  func.func @transform_3(%arg0: i32) -> (i32, i32) {
    %c0_i32 = arith.constant 0 : i32
    %c0_i32_0 = arith.constant 0 : i32
    %c0_i32_1 = arith.constant 0 : i32
    return %c0_i32, %c0_i32_0 : i32, i32
  }
  func.func @transform_4(%arg0: i32) -> (i32, i32) {
    %c0_i32 = arith.constant 0 : i32
    %c0_i32_0 = arith.constant 0 : i32
    %c0_i32_1 = arith.constant 0 : i32
    return %c0_i32, %c0_i32_0 : i32, i32
  }
  func.func @transform_5(%arg0: i32) -> (i32, i32) {
    %c0_i32 = arith.constant 0 : i32
    %c0_i32_0 = arith.constant 0 : i32
    %c0_i32_1 = arith.constant 0 : i32
    return %c0_i32, %c0_i32_0 : i32, i32
  }
  func.func @transform_6(%arg0: i32) -> (i32, i32) {
    %c0_i32 = arith.constant 0 : i32
    %c0_i32_0 = arith.constant 0 : i32
    %c0_i32_1 = arith.constant 0 : i32
    return %c0_i32, %c0_i32_0 : i32, i32
  }
  func.func @transform_7(%arg0: i32) -> (i32, i32) {
    %c0_i32 = arith.constant 0 : i32
    %c0_i32_0 = arith.constant 0 : i32
    %c0_i32_1 = arith.constant 0 : i32
    return %c0_i32, %c0_i32_0 : i32, i32
  }
  func.func @transform_8(%arg0: i32) -> (i32, i32) {
    %c0_i32 = arith.constant 0 : i32
    %c0_i32_0 = arith.constant 0 : i32
    %c0_i32_1 = arith.constant 0 : i32
    return %c0_i32, %c0_i32_0 : i32, i32
  }
  func.func @transform_9(%arg0: i32) -> (i32, i32) {
    %c0_i32 = arith.constant 0 : i32
    %c0_i32_0 = arith.constant 0 : i32
    %c0_i32_1 = arith.constant 0 : i32
    return %c0_i32, %c0_i32_0 : i32, i32
  }
  func.func @transform_10(%arg0: i32) -> (i32, i32) {
    %c0_i32 = arith.constant 0 : i32
    %c0_i32_0 = arith.constant 0 : i32
    %c0_i32_1 = arith.constant 0 : i32
    return %c0_i32, %c0_i32_0 : i32, i32
  }
  func.func @transform_11(%arg0: i32) -> (i32, i32) {
    %c0_i32 = arith.constant 0 : i32
    %c0_i32_0 = arith.constant 0 : i32
    %c0_i32_1 = arith.constant 0 : i32
    return %c0_i32, %c0_i32_0 : i32, i32
  }
  func.func @transform_12(%arg0: i32) -> (i32, i32) {
    %c0_i32 = arith.constant 0 : i32
    %c0_i32_0 = arith.constant 0 : i32
    %c0_i32_1 = arith.constant 0 : i32
    return %c0_i32, %c0_i32_0 : i32, i32
  }
  func.func @transform_13(%arg0: i32) -> (i32, i32) {
    %c0_i32 = arith.constant 0 : i32
    %c0_i32_0 = arith.constant 0 : i32
    %c0_i32_1 = arith.constant 0 : i32
    return %c0_i32, %c0_i32_0 : i32, i32
  }
  func.func @transform_14(%arg0: i32) -> (i32, i32) {
    %c0_i32 = arith.constant 0 : i32
    %c0_i32_0 = arith.constant 0 : i32
    %c0_i32_1 = arith.constant 0 : i32
    return %c0_i32, %c0_i32_0 : i32, i32
  }
  func.func @transform_15(%arg0: i32) -> (i32, i32) {
    %c0_i32 = arith.constant 0 : i32
    %c0_i32_0 = arith.constant 0 : i32
    %c0_i32_1 = arith.constant 0 : i32
    return %c0_i32, %c0_i32_0 : i32, i32
  }
  func.func @transform_16(%arg0: i32) -> (i32, i32) {
    %c0_i32 = arith.constant 0 : i32
    %c0_i32_0 = arith.constant 0 : i32
    %c0_i32_1 = arith.constant 0 : i32
    return %c0_i32, %c0_i32_0 : i32, i32
  }
  func.func @transform_17(%arg0: i32) -> (i32, i32) {
    %c0_i32 = arith.constant 0 : i32
    %c0_i32_0 = arith.constant 0 : i32
    %c0_i32_1 = arith.constant 0 : i32
    return %c0_i32, %c0_i32_0 : i32, i32
  }
  func.func @transform_18(%arg0: i32) -> (i32, i32) {
    %c0_i32 = arith.constant 0 : i32
    %c0_i32_0 = arith.constant 0 : i32
    %c0_i32_1 = arith.constant 0 : i32
    return %c0_i32, %c0_i32_0 : i32, i32
  }
  func.func @transform_19(%arg0: i32) -> (i32, i32) {
    %c0_i32 = arith.constant 0 : i32
    %c0_i32_0 = arith.constant 0 : i32
    %c0_i32_1 = arith.constant 0 : i32
    return %c0_i32, %c0_i32_0 : i32, i32
  }
  func.func @transform_20(%arg0: i32) -> (i32, i32) {
    %c0_i32 = arith.constant 0 : i32
    %c0_i32_0 = arith.constant 0 : i32
    %c0_i32_1 = arith.constant 0 : i32
    return %c0_i32, %c0_i32_0 : i32, i32
  }
  func.func @transform_21(%arg0: i32) -> (i32, i32) {
    %c0_i32 = arith.constant 0 : i32
    %c0_i32_0 = arith.constant 0 : i32
    %c0_i32_1 = arith.constant 0 : i32
    return %c0_i32, %c0_i32_0 : i32, i32
  }
  func.func @transform_22(%arg0: i32) -> (i32, i32) {
    %c0_i32 = arith.constant 0 : i32
    %c0_i32_0 = arith.constant 0 : i32
    %c0_i32_1 = arith.constant 0 : i32
    return %c0_i32, %c0_i32_0 : i32, i32
  }
  func.func @transform_23(%arg0: i32) -> (i32, i32) {
    %c0_i32 = arith.constant 0 : i32
    %c0_i32_0 = arith.constant 0 : i32
    %c0_i32_1 = arith.constant 0 : i32
    return %c0_i32, %c0_i32_0 : i32, i32
  }
}

</mosaic_0001>

<bundles_post_ra>
// kernel: discriminator_forward.1
= control target key start
LH: loop header
LB: loop body
LE: loop exit
PB: predicated region body
PF: predicated region fallthrough
CT: control target
= control target key end

     0   :  { %vm89_vm0 = vcmask 1043456   ;;  %v4135_v0 = vmov 0.0   ;;  %vm4136_vm1 = vmmov 0   ;;  %vm85_vm2 = vcmask 64512   ;;  %s4900_s2 = inlined_call_operand.vmem [shape: bf16[8,32], index: 2, kind: input, shape index: {}]   ;;  %s4901_s0 = inlined_call_operand.vmem [shape: f32[2,8], index: 0, kind: input, shape index: {}]   ;;  %s4902_s4 = inlined_call_operand.vmem [shape: bf16[32,32], index: 4, kind: input, shape index: {}]   ;;  %s4903_s3 = inlined_call_operand.vmem [shape: f32[1,32], index: 3, kind: input, shape index: {}]   ;;  %s4904_s10 = inlined_call_operand.vmem [shape: bf16[32,16], index: 10, kind: input, shape index: {}]   ;;  %s4905_s17 = inlined_call_operand.vmem [shape: bf16[32,32], index: 17, kind: input, shape index: {}]   ;;  %s4906_s1 = inlined_call_operand.vmem [shape: f32[2,16,4], index: 1, kind: input, shape index: {}]   ;;  %s4907_s6 = inlined_call_operand.vmem [shape: bf16[12,8], index: 6, kind: input, shape index: {}]   ;;  %s4908_s5 = inlined_call_operand.vmem [shape: f32[1,32], index: 5, kind: input, shape index: {}]   ;;  %s4909_s7 = inlined_call_operand.vmem [shape: bf16[24,16], index: 7, kind: input, shape index: {}]   ;;  %s4910_s11 = inlined_call_operand.vmem [shape: f32[1,16], index: 11, kind: input, shape index: {}]   ;;  %s4911_s18 = inlined_call_operand.vmem [shape: f32[1,32], index: 18, kind: input, shape index: {}]   ;;  %s4912_s9 = inlined_call_operand.vmem [shape: bf16[32,16], index: 9, kind: input, shape index: {}]   ;;  %s4913_s8 = inlined_call_operand.vmem [shape: bf16[64,16], index: 8, kind: input, shape index: {}]   ;;  %s4914_s14 = inlined_call_operand.vmem [shape: bf16[48,32], index: 14, kind: input, shape index: {}]   ;;  %s4915_s16 = inlined_call_operand.vmem [shape: bf16[64,32], index: 16, kind: input, shape index: {}]   ;;  %s4916_s12 = inlined_call_operand.vmem [shape: f32[1,16], index: 12, kind: input, shape index: {}]   ;;  %s4917_s13 = inlined_call_operand.vmem [shape: f32[1,16], index: 13, kind: input, shape index: {}]   ;;  %s4918_s15 = inlined_call_operand.vmem [shape: bf16[128,32], index: 15, kind: input, shape index: {}]   ;;  %s4919_s21 = inlined_call_operand.vmem [shape: bf16[32,2], index: 21, kind: input, shape index: {}]   ;;  %s4920_s19 = inlined_call_operand.vmem [shape: f32[1,32], index: 19, kind: input, shape index: {}]   ;;  %s4921_s20 = inlined_call_operand.vmem [shape: f32[1,32], index: 20, kind: input, shape index: {}]   ;;  %s4922_s22 = inlined_call_operand.vmem [shape: f32[1,2], index: 22, kind: input, shape index: {}]   ;;  %s4923_s23 = inlined_call_operand.vmem [shape: f32[2,2], index: 23, kind: output, shape index: {}]  }
   0x1   :  { %4929 = sst [smem:[#allocation9_spill]] %s4900_s2  ;;  %3655 = vmatprep.subr.bf16.mxu0 %v4135_v0  ;;  %3657 = vmatprep.mubr.msk.bf16.mxu0 %vm4136_vm1, %v4135_v0  ;;  %vm160_vm4 = vcmask 261120   ;;  %vm341_vm5 = vcmask 31744   ;;  %vm339_vm6 = vcmask 24576   ;;  %v3420_v33 = vld [vmem:[%s4908_s5] ss:$0 sm:$0xff]  ;;  %v671_v51 = vlaneseq }
   0x2   :  { %4930 = sst [smem:[#allocation10_spill]] %s4901_s0  ;;  %s4937_s24 = sld [smem:[#allocation9_spill]]  ;;  %3661 = vmatprep.subr.bf16.mxu1 %v4135_v0  ;;  %3665 = vmatprep.mubr.msk.bf16.mxu1 %vm4136_vm1, %v4135_v0  ;;  %340 = vst.msk [vmem:[#allocation2] sm:$0x1] %vm339_vm6, %v4135_v0  ;;  %344 = vst.msk [vmem:[#allocation2 + $0x11] sm:$0x1] %vm339_vm6, %v4135_v0 }
   0x3   :  { %4931 = sst [smem:[#allocation11_spill]] %s4902_s4  ;;  %s4938_s0 = sld [smem:[#allocation10_spill]]  ;;  %vm360_vm8 = vcmask 1041408   ;;  %vm511_vm9 = vcmask 57344   ;;  %v522_v49 = vld [vmem:[%s4909_s7 + $0x4] sm:$0xf] }
   0x4   :  { %4932 = sst [smem:[#allocation12_spill]] %s4903_s3  ;;  %s4939_s4 = sld [smem:[#allocation11_spill]]  ;;  %512 = vst.msk [vmem:[#allocation3] sm:$0x1] %vm511_vm9, %v4135_v0  ;;  %515 = vst.msk [vmem:[#allocation3 + $0x11] sm:$0x1] %vm511_vm9, %v4135_v0 }
   0x5   :  { %4933 = sst [smem:[#allocation13_spill]] %s4904_s10  ;;  %s4940_s3 = sld [smem:[#allocation12_spill]]  ;;  %906 = vst.msk [vmem:[#allocation5] sm:$0x1] %vm511_vm9, %v4135_v0  ;;  %909 = vst.msk [vmem:[#allocation5 + $0x11] sm:$0x1] %vm511_vm9, %v4135_v0 }
   0x6   :  { %4934 = sst [smem:[#allocation14_spill]] %s4905_s17  ;;  %s4941_s30 = sld [smem:[#allocation13_spill]]  ;;  %v528_v50 = vsel %vm89_vm0, %v522_v49, 0  ;;  %v4370_v52 = vshrl.u32 %v671_v51, 7  ;;  %v3424_v53 = vld [vmem:[%s4910_s11] ss:$0 sm:$0xff] }
   0x7   :  { %4935 = sst [smem:[#allocation15_spill]] %s4906_s1  ;;  %s4942_s17 = sld [smem:[#allocation14_spill]]  ;;  %v3428_v54 = vld [vmem:[%s4911_s18] ss:$0 sm:$0xff]  ;;  %vm683_vm12 = vcmask 122880   ;;  %vm685_vm14 = vcmask 130048  }
   0x8   :  { %4936 = sst [smem:[#allocation16_spill]] %s4907_s6  ;;  %v76_v1 = vld [vmem:[%s4937_s24] sm:$0xf]  ;;  %s4943_s28 = sld [smem:[#allocation15_spill]]  ;;  %v1444_v55 = vsub.s32 1, %v4370_v52 }
   0x9   :  { %v75_v2 = vld [vmem:[%s4938_s0] sm:$0x3]  ;;  %v91_v3 = vsel %vm89_vm0, %v76_v1, 0  ;;  %s4944_s26 = sld [smem:[#allocation16_spill]]  ;;  %684 = vst.msk [vmem:[#allocation4] sm:$0x1] %vm683_vm12, %v4135_v0 }
   0xa   :  { %v77_v4 = vpack.c.bf16 %v75_v2, %v75_v2  ;;  %3656 = vmatpush3.bf16.msra.mxu0 %v91_v3  ;;  %v4083_v5 = vld [vmem:[%s4939_s4] sm:$0xff]   ;;  %v4084_v6 = vld [vmem:[%s4939_s4 + $0x8] sm:$0xff]   ;;  %688 = vst.msk [vmem:[#allocation4 + $0x11] sm:$0x1] %vm683_vm12, %v4135_v0  ;;  %1939 = vst.msk [vmem:[#allocation6] sm:$0x1] %vm683_vm12, %v4135_v0 }
   0xb   :  { %3669 = vmatprep.subr.bf16.mxu0 %v4135_v0  ;;  %3662 = vmatpush3.bf16.msra.mxu1 %v4083_v5  ;;  %v3418_v7 = vld [vmem:[%s4940_s3] ss:$0 sm:$0xff]  ;;  %1941 = vst.msk [vmem:[#allocation6 + $0x9] sm:$0x1] %vm683_vm12, %v4135_v0  ;;  %2363 = vst.msk [vmem:[#allocation8] sm:$0x1] %vm683_vm12, %v4135_v0 }
   0xc   :  { %3663 = vmatprep.subr.bf16.mxu1 %v4135_v0  ;;  %v4085_v16 = vld [vmem:[%s4941_s30] sm:$0xff]   ;;  %v4087_v18 = vld [vmem:[%s4941_s30 + $0x8] sm:$0xff]   ;;  %2365 = vst.msk [vmem:[#allocation8 + $0x9] sm:$0x1] %vm683_vm12, %v4135_v0 }
   0xd   :  { %3658 = vmatmul.mubr.msk.bf16.vlgmr.msra.gmra.mrb[0].mxu0 %vm85_vm2, %v77_v4  ;;  %v4086_v17 = vld [vmem:[%s4942_s17] sm:$0xff]   ;;  %v4088_v19 = vld [vmem:[%s4942_s17 + $0x8] sm:$0xff]  }
   0xe   :  { %3673 = vmatprep.mubr.msk.bf16.mxu0 %vm4136_vm1, %v4135_v0  ;;  %3670 = vmatpush3.bf16.msra.mxu0 %v4085_v16  ;;  %v337_v20 = vld [vmem:[%s4943_s28] sm:$0xff]  ;;  %v338_v21 = vld [vmem:[%s4943_s28 + $0x8] sm:$0xff]  ;;  %v3451_v31 = vld [vmem:[%s4943_s28 + $0x10] sm:$0xff] }
   0xf   :  { %3664 = vmatpush3.bf16.msra.mxu1 %v4084_v6  ;;  %3671 = vmatprep.subr.bf16.mxu0 %v4135_v0  ;;  %342 = vst.msk [vmem:[#allocation2 + $0x1] sm:$0xff] %vm341_vm5, %v337_v20  ;;  %343 = vst.msk [vmem:[#allocation2 + $0x9] sm:$0xff] %vm341_vm5, %v338_v21  ;;  %v3452_v32 = vld [vmem:[%s4943_s28 + $0x18] sm:$0xff]  ;;  %v4089_v34 = vld [vmem:[%s4944_s26] ss:$0 sps:$4 sm:$0xcc]  }
  0x10   :  { %3677 = vmatprep.subr.bf16.mxu1 %v4135_v0  ;;  %v356_v39 = vrot.slane %v4089_v34, 2  ;;  %v347_v45 = vld [vmem:[%s4944_s26] sm:$0x3]  ;;  %v454_v47 = vld [vmem:[%s4944_s26 + $0x4] sm:$0x3] }
  0x11   :  { %v409_v46 = vsel %vm360_vm8, %v347_v45, 0  ;;  %v460_v48 = vsel %vm360_vm8, %v454_v47, 0  ;;  %v1011_v34 = vld [vmem:[%s4912_s9 + $0x8] sm:$0xf] }
  0x12   :  { %3672 = vmatpush3.bf16.msra.mxu0 %v4087_v18  ;;  %v362_v44 = vsel %vm360_vm8, %v356_v39, 0 }
  0x13   :  { %3685 = vmatprep.subr.bf16.mxu0 %v4135_v0 }
  0x16   :  { %v349_v22 = vld [vmem:[#allocation2 + $0x1] sm:$0xff]  ;;  %v350_v23 = vld [vmem:[#allocation2 + $0x9] sm:$0xff] }
  0x17   :  { %v352_v24 = vpack.c.bf16 %v350_v23, %v349_v22  ;;  %v346_v25 = vld [vmem:[#allocation2 + $0x8] sm:$0xff]  ;;  %v345_v26 = vld [vmem:[#allocation2] sm:$0xff] }
  0x18   :  { %v348_v27 = vpack.c.bf16 %v346_v25, %v345_v26  ;;  %1114 = vst.msk [vmem:[#allocation2] sm:$0x1] %vm339_vm6, %v4135_v0  ;;  %v452_v28 = vld [vmem:[#allocation2 + $0x2] sm:$0xff]  ;;  %v453_v29 = vld [vmem:[#allocation2 + $0xa] sm:$0xff] }
  0x19   :  { %v455_v30 = vpack.c.bf16 %v453_v29, %v452_v28  ;;  %1117 = vst.msk [vmem:[#allocation2 + $0x11] sm:$0x1] %vm339_vm6, %v4135_v0  ;;  %v620_v23 = vld [vmem:[%s4909_s7 + $0x8] sm:$0xf] }
  0x1a   :  { %1115 = vst.msk [vmem:[#allocation2 + $0x1] sm:$0xff] %vm341_vm5, %v3451_v31  ;;  %1116 = vst.msk [vmem:[#allocation2 + $0x9] sm:$0xff] %vm341_vm5, %v3452_v32  ;;  %v626_v25 = vsel %vm89_vm0, %v620_v23, 0  ;;  %v911_v31 = vld [vmem:[%s4912_s9] sm:$0xf] }
  0xe0   :  { %v127_v8 = vpop.f32.mrb[0].mxu0 }
  0xe1   :  { %v128_v9 = vadd.f32 %v3418_v7, %v127_v8  ;;  %v3659_v10 = vpop.f32.mrb[1].mxu0 }
  0xe2   :  { %v130_v11 = vpop.f32.mrb[2].mxu0 }
  0xe3   :  { %vm133_vm3 = vcmp.ge.f32.partialorder %v128_v9, 0.0  ;;  %v134_v12 = vmul.f32 0.2, %v128_v9  ;;  %v3660_v13 = vpop.f32.mrb[3].mxu0 }
  0xe5   :  { %v135_v14 = vsel %vm133_vm3, %v128_v9, %v134_v12 }
  0xe6   :  { %v140_v15 = vpack.c.bf16 %v135_v14, %v135_v14  ;;  %v518_v14 = vld [vmem:[%s4909_s7] sm:$0xf] }
  0xe7   :  { %v575_v20 = vsel %vm89_vm0, %v518_v14, 0 }
  0xe8   :  { %3666 = vmatmul.mubr.msk.bf16.vlgmr.msra.gmra.mrb[0].mxu1 %vm160_vm4, %v140_v15 }
  0xe9   :  { %3681 = vmatprep.mubr.msk.bf16.mxu1 %vm4136_vm1, %v4135_v0  ;;  %3678 = vmatpush3.bf16.msra.mxu1 %v4086_v17 }
  0xea   :  { %3679 = vmatprep.subr.bf16.mxu1 %v4135_v0 }
  0xed   :  { %3680 = vmatpush3.bf16.msra.mxu1 %v4088_v19 }
  0xee   :  { %3703 = vmatprep.subr.bf16.mxu1 %v4135_v0 }
 0x1bb   :  { %v198_v35 = vpop.f32.mrb[0].mxu1 }
 0x1bc   :  { %v199_v36 = vadd.f32 %v3420_v33, %v198_v35  ;;  %v3667_v37 = vpop.f32.mrb[1].mxu1  ;;  %v967_v33 = vsel %vm89_vm0, %v911_v31, 0 }
 0x1bd   :  { %v201_v38 = vpop.f32.mrb[2].mxu1 }
 0x1be   :  { %vm204_vm7 = vcmp.ge.f32.partialorder %v199_v36, 0.0  ;;  %v205_v40 = vmul.f32 0.2, %v199_v36  ;;  %v3668_v41 = vpop.f32.mrb[3].mxu1  ;;  %v1062_v38 = vld [vmem:[%s4912_s9 + $0xc] sm:$0xf] }
 0x1c0   :  { %v206_v42 = vsel %vm204_vm7, %v199_v36, %v205_v40  ;;  %v1017_v36 = vsel %vm89_vm0, %v1011_v34, 0  ;;  %v1068_v40 = vsel %vm89_vm0, %v1062_v38, 0  ;;  %v4093_v34 = vld [vmem:[%s4913_s8 + $0x18] sm:$0xff]  }
 0x1c1   :  { %v211_v43 = vpack.c.bf16 %v206_v42, %v206_v42  ;;  %v4090_v42 = vld [vmem:[%s4913_s8 + $0x8] sm:$0xff]  }
 0x1c3   :  { %3674 = vmatmul.mubr.msk.bf16.vlgmr.msra.gmra.mrb[4].mxu0 %vm160_vm4, %v211_v43  ;;  %3682 = vmatmul.mubr.msk.bf16.vlgmr.msra.gmra.mrb[4].mxu1 %vm160_vm4, %v211_v43 }
 0x1c4   :  { %3686 = vmatpush3.bf16.msra.mxu0 %v362_v44  ;;  %3687 = vmatprep.mubr.msk.bf16.mxu0 %vm4136_vm1, %v4135_v0 }
 0x1c5   :  { %3691 = vmatprep.subr.bf16.mxu0 %v4135_v0  ;;  %3705 = vmatprep.mubr.msk.bf16.mxu1 %vm4136_vm1, %v4135_v0 }
 0x1c6   :  { %3704 = vmatpush3.bf16.msra.mxu1 %v528_v50 }
 0x1c7   :  { %3709 = vmatprep.subr.bf16.mxu1 %v4135_v0 }
 0x1cb   :  { %3688 = vmatmul.mubr.msk.bf16.vlgmr.msra.gmra.mrb[8].mxu0 %vm341_vm5, %v352_v24 }
 0x1cc   :  { %3692 = vmatpush3.bf16.msra.mxu0 %v409_v46  ;;  %3693 = vmatprep.mubr.msk.bf16.mxu0 %vm4136_vm1, %v4135_v0 }
 0x1cd   :  { %3697 = vmatprep.subr.bf16.mxu0 %v4135_v0 }
 0x1d7   :  { %3694 = vmatmul.mubr.msk.bf16.vlgmr.msra.gmra.mrb[8].mxu0 %vm341_vm5, %v348_v27  ;;  %v915_v27 = vld [vmem:[%s4912_s9 + $0x4] sm:$0xf] }
 0x1d8   :  { %3698 = vmatpush3.bf16.msra.mxu0 %v460_v48  ;;  %3699 = vmatprep.mubr.msk.bf16.mxu0 %vm4136_vm1, %v4135_v0  ;;  %v921_v29 = vsel %vm89_vm0, %v915_v27, 0 }
 0x1d9   :  { %3721 = vmatprep.subr.bf16.mxu0 %v4135_v0 }
 0x1e3   :  { %3700 = vmatmul.mubr.msk.bf16.vlgmr.msra.gmra.mrb[8].mxu0 %vm341_vm5, %v455_v30 }
 0x1e4   :  { %3723 = vmatprep.mubr.msk.bf16.mxu0 %vm4136_vm1, %v4135_v0  ;;  %3722 = vmatpush3.bf16.msra.mxu0 %v4090_v42  ;;  %v1120_v42 = vld [vmem:[%s4944_s26] sm:$0x3] }
 0x1e5   :  { %3727 = vmatprep.subr.bf16.mxu0 %v4135_v0 }
 0x296   :  { %v268_v56 = vpop.f32.mrb[4].mxu0  ;;  %v331_v57 = vpop.f32.mrb[4].mxu1 }
 0x297   :  { %v4379_v58 = vadd.f32 %v3424_v53, %v268_v56  ;;  %v4381_v59 = vadd.f32 %v3428_v54, %v331_v57  ;;  %v3675_v60 = vpop.f32.mrb[5].mxu0  ;;  %v3683_v61 = vpop.f32.mrb[5].mxu1  ;;  %v4469_v54 = vsub.s32 0, %v4370_v52 }
 0x298   :  { %v271_v62 = vpop.f32.mrb[6].mxu0  ;;  %v334_v63 = vpop.f32.mrb[6].mxu1 }
 0x299   :  { %v4384_v1 = vrot.slane %v4379_v58, %v1444_v55  ;;  %v4387_v2 = vrot.slane %v4381_v59, %v1444_v55  ;;  %v3676_v3 = vpop.f32.mrb[7].mxu0  ;;  %v3684_v4 = vpop.f32.mrb[7].mxu1  ;;  %v674_v56 = vrot.slane %v4379_v58, %v4469_v54 }
 0x2b6   :  { %v496_v5 = vpop.f32.mrb[8].mxu0 }
 0x2b7   :  { %vm505_vm10 = vcmp.ge.f32.partialorder %v496_v5, 0.0  ;;  %v507_v6 = vmul.f32 0.2, %v496_v5  ;;  %907 = vst.msk [vmem:[#allocation5 + $0x1] sm:$0xff] %vm85_vm2, %v496_v5  ;;  %v3701_v7 = vpop.f32.mrb[9].mxu0 }
 0x2b8   :  { %v499_v8 = vpop.f32.mrb[10].mxu0 }
 0x2b9   :  { %v509_v9 = vsel %vm505_vm10, %v496_v5, %v507_v6  ;;  %vm506_vm11 = vcmp.ge.f32.partialorder %v499_v8, 0.0  ;;  %v508_v10 = vmul.f32 0.2, %v499_v8  ;;  %908 = vst.msk [vmem:[#allocation5 + $0x9] sm:$0xff] %vm85_vm2, %v499_v8  ;;  %v3702_v11 = vpop.f32.mrb[11].mxu0 }
 0x2ba   :  { %513 = vst.msk [vmem:[#allocation3 + $0x1] sm:$0xff] %vm85_vm2, %v509_v9 }
 0x2bb   :  { %v510_v12 = vsel %vm506_vm11, %v499_v8, %v508_v10  ;;  %vm3225_vm11 = vcmask 257024  }
 0x2bc   :  { %514 = vst.msk [vmem:[#allocation3 + $0x9] sm:$0xff] %vm85_vm2, %v510_v12 }
 0x2c0   :  { %v910_v13 = vld [vmem:[#allocation5] ss:$2 sm:$0xff]  ;;  %v1061_v16 = vld [vmem:[#allocation5 + $0x3] ss:$2 sm:$0xff] }
 0x2c1   :  { %v516_v15 = vld [vmem:[#allocation3] sm:$0xff]  ;;  %1672 = vst.msk [vmem:[#allocation5] sm:$0x1] %vm511_vm9, %v4135_v0  ;;  %1675 = vst.msk [vmem:[#allocation5 + $0x11] sm:$0x1] %vm511_vm9, %v4135_v0  ;;  %v912_v35 = vpack.c.bf16 %v910_v13, %v910_v13  ;;  %v1063_v41 = vpack.c.bf16 %v1061_v16, %v1061_v16 }
 0x2c2   :  { %1283 = vst.msk [vmem:[#allocation3] sm:$0x1] %vm511_vm9, %v4135_v0  ;;  %v520_v17 = vld [vmem:[#allocation3 + $0x1] sm:$0xff]  ;;  %v914_v30 = vld [vmem:[#allocation5 + $0x1] ss:$2 sm:$0xff] }
 0x2c3   :  { %v521_v18 = vld [vmem:[#allocation3 + $0x9] sm:$0xff]  ;;  %v916_v32 = vpack.c.bf16 %v914_v30, %v914_v30  ;;  %v1010_v37 = vld [vmem:[#allocation5 + $0x2] ss:$2 sm:$0xff] }
 0x2c4   :  { %v523_v19 = vpack.c.bf16 %v521_v18, %v520_v17  ;;  %v619_v21 = vld [vmem:[#allocation3 + $0xa] sm:$0xff]  ;;  %v618_v26 = vld [vmem:[#allocation3 + $0x2] sm:$0xff]  ;;  %v1012_v39 = vpack.c.bf16 %v1010_v37, %v1010_v37 }
 0x2c5   :  { %1286 = vst.msk [vmem:[#allocation3 + $0x11] sm:$0x1] %vm511_vm9, %v4135_v0  ;;  %v517_v22 = vld [vmem:[#allocation3 + $0x8] sm:$0xff]  ;;  %v621_v28 = vpack.c.bf16 %v619_v21, %v618_v26  ;;  %v4092_v26 = vld [vmem:[%s4913_s8 + $0x10] sm:$0xff]  }
 0x2c6   :  { %3706 = vmatmul.mubr.msk.bf16.vlgmr.msra.gmra.mrb[8].mxu1 %vm85_vm2, %v523_v19  ;;  %v519_v24 = vpack.c.bf16 %v517_v22, %v516_v15  ;;  %v4091_v15 = vld [vmem:[%s4913_s8] sm:$0xff]  }
 0x2c7   :  { %3710 = vmatpush3.bf16.msra.mxu1 %v575_v20  ;;  %3711 = vmatprep.mubr.msk.bf16.mxu1 %vm4136_vm1, %v4135_v0 }
 0x2c8   :  { %3715 = vmatprep.subr.bf16.mxu1 %v4135_v0 }
 0x2ce   :  { %3712 = vmatmul.mubr.msk.bf16.vlgmr.msra.gmra.mrb[12].mxu1 %vm85_vm2, %v519_v24 }
 0x2cf   :  { %3716 = vmatpush3.bf16.msra.mxu1 %v626_v25  ;;  %3717 = vmatprep.mubr.msk.bf16.mxu1 %vm4136_vm1, %v4135_v0 }
 0x2d0   :  { %3745 = vmatprep.subr.bf16.mxu1 %v4135_v0 }
 0x2d6   :  { %3718 = vmatmul.mubr.msk.bf16.vlgmr.msra.gmra.mrb[16].mxu1 %vm85_vm2, %v621_v28 }
 0x2d7   :  { %3746 = vmatpush3.bf16.msra.mxu1 %v921_v29  ;;  %3747 = vmatprep.mubr.msk.bf16.mxu1 %vm4136_vm1, %v4135_v0 }
 0x2d8   :  { %3751 = vmatprep.subr.bf16.mxu1 %v4135_v0 }
 0x2de   :  { %3748 = vmatmul.mubr.msk.bf16.vlgmr.msra.gmra.mrb[20].mxu1 %vm85_vm2, %v916_v32 }
 0x2df   :  { %3752 = vmatpush3.bf16.msra.mxu1 %v967_v33  ;;  %3753 = vmatprep.mubr.msk.bf16.mxu1 %vm4136_vm1, %v4135_v0 }
 0x2e0   :  { %3757 = vmatprep.subr.bf16.mxu1 %v4135_v0 }
 0x2e6   :  { %3754 = vmatmul.mubr.msk.bf16.vlgmr.msra.gmra.mrb[24].mxu1 %vm85_vm2, %v912_v35 }
 0x2e7   :  { %3758 = vmatpush3.bf16.msra.mxu1 %v1017_v36  ;;  %3759 = vmatprep.mubr.msk.bf16.mxu1 %vm4136_vm1, %v4135_v0  ;;  %v4094_v36 = vld [vmem:[%s4944_s26] ss:$0 sps:$4 sm:$0xcc]  }
 0x2e8   :  { %3763 = vmatprep.subr.bf16.mxu1 %v4135_v0  ;;  %v1129_v37 = vrot.slane %v4094_v36, 2 }
 0x2ee   :  { %3760 = vmatmul.mubr.msk.bf16.vlgmr.msra.gmra.mrb[28].mxu1 %vm85_vm2, %v1012_v39  ;;  %v1134_v39 = vsel %vm360_vm8, %v1129_v37, 0 }
 0x2ef   :  { %3764 = vmatpush3.bf16.msra.mxu1 %v1068_v40  ;;  %3765 = vmatprep.mubr.msk.bf16.mxu1 %vm4136_vm1, %v4135_v0  ;;  %v1122_v40 = vld [vmem:[#allocation2 + $0x1] sm:$0xff] }
 0x2f0   :  { %3787 = vmatprep.subr.bf16.mxu1 %v4135_v0 }
 0x2f6   :  { %3766 = vmatmul.mubr.msk.bf16.vlgmr.msra.gmra.mrb[32].mxu1 %vm85_vm2, %v1063_v41  ;;  %v1123_v41 = vld [vmem:[#allocation2 + $0x9] sm:$0xff] }
 0x2f7   :  { %3789 = vmatprep.mubr.msk.bf16.mxu1 %vm4136_vm1, %v4135_v0 }
 0x399   :  { %v564_v43 = vpop.f32.mrb[8].mxu1 }
 0x39a   :  { %v3707_v44 = vpop.f32.mrb[9].mxu1 }
 0x39b   :  { %v567_v45 = vpop.f32.mrb[10].mxu1  ;;  %v1181_v44 = vsel %vm360_vm8, %v1120_v42, 0 }
 0x39c   :  { %v3708_v46 = vpop.f32.mrb[11].mxu1 }
 0x39d   :  { %v1119_v46 = vld [vmem:[#allocation2 + $0x8] sm:$0xff] }
 0x3a1   :  { %v611_v47 = vpop.f32.mrb[12].mxu1 }
 0x3a2   :  { %v612_v48 = vadd.f32 %v611_v47, %v564_v43  ;;  %v3713_v49 = vpop.f32.mrb[13].mxu1  ;;  %v1125_v43 = vpack.c.bf16 %v1123_v41, %v1122_v40  ;;  %v1226_v47 = vld [vmem:[%s4944_s26 + $0x4] sm:$0x3] }
 0x3a3   :  { %v614_v50 = vpop.f32.mrb[14].mxu1  ;;  %v1232_v49 = vsel %vm360_vm8, %v1226_v47, 0  ;;  %vm2110_vm8 = vcmask 253952  }
 0x3a4   :  { %v615_v51 = vadd.f32 %v614_v50, %v567_v45  ;;  %v3714_v53 = vpop.f32.mrb[15].mxu1  ;;  %v1118_v45 = vld [vmem:[#allocation2] sm:$0xff]  ;;  %2111 = vst.msk [vmem:[#allocation7] sm:$0x1] %vm2110_vm8, %v4135_v0  ;;  %2113 = vst.msk [vmem:[#allocation7 + $0x9] sm:$0x1] %vm2110_vm8, %v4135_v0 }
 0x3a5   :  { %v1224_v50 = vld [vmem:[#allocation2 + $0x2] sm:$0xff] }
 0x3a9   :  { %v662_v55 = vpop.f32.mrb[16].mxu1 }
 0x3aa   :  { %v669_v57 = vadd.f32 %v662_v55, %v612_v48  ;;  %v3719_v60 = vpop.f32.mrb[17].mxu1  ;;  %v1121_v48 = vpack.c.bf16 %v1119_v46, %v1118_v45  ;;  %v1293_v55 = vld [vmem:[%s4909_s7 + $0x4] sm:$0xf] }
 0x3ab   :  { %v665_v61 = vpop.f32.mrb[18].mxu1 }
 0x3ac   :  { %v675_v62 = vadd.f32 %v674_v56, %v669_v57  ;;  %v670_v63 = vadd.f32 %v665_v61, %v615_v51  ;;  %v3720_v3 = vpop.f32.mrb[19].mxu1  ;;  %v1225_v51 = vld [vmem:[#allocation2 + $0xa] sm:$0xff] }
 0x3ad   :  { %v1227_v53 = vpack.c.bf16 %v1225_v51, %v1224_v50 }
 0x3ae   :  { %vm677_vm13 = vcmp.ge.f32.partialorder %v675_v62, 0.0  ;;  %v679_v4 = vmul.f32 0.2, %v675_v62  ;;  %v676_v5 = vadd.f32 %v674_v56, %v670_v63  ;;  %v1299_v56 = vsel %vm89_vm0, %v1293_v55, 0 }
 0x3af   :  { %3788 = vmatpush3.bf16.msra.mxu1 %v1299_v56 }
 0x3b0   :  { %v681_v6 = vsel %vm677_vm13, %v675_v62, %v679_v4  ;;  %vm678_vm15 = vcmp.ge.f32.partialorder %v676_v5, 0.0  ;;  %v680_v7 = vmul.f32 0.2, %v676_v5  ;;  %3793 = vmatprep.subr.bf16.mxu1 %v4135_v0  ;;  %vm3357_vm13 = vcmask 8192  }
 0x3b1   :  { %686 = vst.msk [vmem:[#allocation4 + $0x1] sm:$0xff] %vm685_vm14, %v681_v6  ;;  %v957_v52 = vpop.f32.mrb[20].mxu1 }
 0x3b2   :  { %v682_v8 = vsel %vm678_vm15, %v676_v5, %v680_v7  ;;  %v3749_v9 = vpop.f32.mrb[21].mxu1 }
 0x3b3   :  { %687 = vst.msk [vmem:[#allocation4 + $0x9] sm:$0xff] %vm685_vm14, %v682_v8  ;;  %v960_v58 = vpop.f32.mrb[22].mxu1  ;;  %v1289_v9 = vld [vmem:[%s4909_s7] sm:$0xf] }
 0x3b4   :  { %v3750_v10 = vpop.f32.mrb[23].mxu1 }
 0x3b9   :  { %v1003_v11 = vpop.f32.mrb[24].mxu1 }
 0x3ba   :  { %v1004_v12 = vadd.f32 %v1003_v11, %v957_v52  ;;  %v3755_v13 = vpop.f32.mrb[25].mxu1  ;;  %v694_v14 = vld [vmem:[#allocation4 + $0x1] ss:$2 sm:$0xff]  ;;  %v689_v16 = vld [vmem:[#allocation4] ss:$2 sm:$0xff] }
 0x3bb   :  { %v1006_v17 = vpop.f32.mrb[26].mxu1  ;;  %v697_v18 = vpack.c.bf16 %v694_v14, %v694_v14  ;;  %1454 = vst.msk [vmem:[#allocation4] sm:$0x1] %vm683_vm12, %v4135_v0  ;;  %v852_v19 = vld [vmem:[#allocation4 + $0x3] ss:$2 sm:$0xff]  ;;  %v692_v27 = vpack.c.bf16 %v689_v16, %v689_v16 }
 0x3bc   :  { %v3756_v20 = vpop.f32.mrb[27].mxu1  ;;  %1457 = vst.msk [vmem:[#allocation4 + $0x11] sm:$0x1] %vm683_vm12, %v4135_v0  ;;  %v797_v33 = vld [vmem:[#allocation4 + $0x2] ss:$2 sm:$0xff]  ;;  %v855_v38 = vpack.c.bf16 %v852_v19, %v852_v19 }
 0x3bd   :  { %3724 = vmatmul.mubr.msk.bf16.vlgmr.msra.gmra.mrb[12].mxu0 %vm685_vm14, %v697_v18  ;;  %v800_v35 = vpack.c.bf16 %v797_v33, %v797_v33  ;;  %v1391_v14 = vld [vmem:[%s4909_s7 + $0x8] sm:$0xf]  ;;  %v1680_v20 = vld [vmem:[%s4912_s9 + $0x4] sm:$0xf]  ;;  %v1825_v33 = vld [vmem:[%s4912_s9 + $0xc] sm:$0xf] }
 0x3be   :  { %3728 = vmatpush3.bf16.msra.mxu0 %v4091_v15  ;;  %3729 = vmatprep.mubr.msk.bf16.mxu0 %vm4136_vm1, %v4135_v0  ;;  %v1397_v17 = vsel %vm89_vm0, %v1391_v14, 0 }
 0x3bf   :  { %3733 = vmatprep.subr.bf16.mxu0 %v4135_v0 }
 0x3c1   :  { %v1053_v21 = vpop.f32.mrb[28].mxu1 }
 0x3c2   :  { %v1059_v22 = vadd.f32 %v1053_v21, %v1004_v12  ;;  %v3761_v23 = vpop.f32.mrb[29].mxu1  ;;  %v1346_v12 = vsel %vm89_vm0, %v1289_v9, 0 }
 0x3c3   :  { %v1056_v24 = vpop.f32.mrb[30].mxu1 }
 0x3c4   :  { %v3762_v25 = vpop.f32.mrb[31].mxu1  ;;  %v1677_v24 = vld [vmem:[%s4912_s9] sm:$0xf] }
 0x3c9   :  { %3730 = vmatmul.mubr.msk.bf16.vlgmr.msra.gmra.mrb[12].mxu0 %vm685_vm14, %v692_v27  ;;  %v1104_v28 = vpop.f32.mrb[32].mxu1 }
 0x3ca   :  { %3734 = vmatpush3.bf16.msra.mxu0 %v4092_v26  ;;  %v4490_v29 = vadd.f32 %v1104_v28, %v1059_v22  ;;  %v3767_v30 = vpop.f32.mrb[33].mxu1  ;;  %3735 = vmatprep.mubr.msk.bf16.mxu0 %vm4136_vm1, %v4135_v0  ;;  %v1686_v22 = vsel %vm89_vm0, %v1680_v20, 0  ;;  %v1732_v26 = vsel %vm89_vm0, %v1677_v24, 0  ;;  %v1775_v28 = vld [vmem:[%s4912_s9 + $0x8] sm:$0xf]  ;;  %v4097_v20 = vld [vmem:[%s4913_s8 + $0x10] sm:$0xff]  }
 0x3cb   :  { %v1107_v31 = vpop.f32.mrb[34].mxu1  ;;  %3739 = vmatprep.subr.bf16.mxu0 %v4135_v0 }
 0x3cc   :  { %v3768_v32 = vpop.f32.mrb[35].mxu1  ;;  %v1781_v31 = vsel %vm89_vm0, %v1775_v28, 0  ;;  %v4098_v28 = vld [vmem:[%s4913_s8 + $0x18] sm:$0xff]  }
 0x3d5   :  { %3736 = vmatmul.mubr.msk.bf16.vlgmr.msra.gmra.mrb[12].mxu0 %vm685_vm14, %v800_v35  ;;  %v1831_v35 = vsel %vm89_vm0, %v1825_v33, 0  ;;  %v4099_v33 = vld [vmem:[%s4914_s14 + $0x8] sm:$0xff]  }
 0x3d6   :  { %3740 = vmatpush3.bf16.msra.mxu0 %v4093_v34  ;;  %3741 = vmatprep.mubr.msk.bf16.mxu0 %vm4136_vm1, %v4135_v0 }
 0x3d7   :  { %3769 = vmatprep.subr.bf16.mxu0 %v4135_v0 }
 0x3e1   :  { %3742 = vmatmul.mubr.msk.bf16.vlgmr.msra.gmra.mrb[12].mxu0 %vm685_vm14, %v855_v38  ;;  %v4095_v38 = vld [vmem:[%s4913_s8 + $0x8] sm:$0xff]  }
 0x3e2   :  { %3770 = vmatpush3.bf16.msra.mxu0 %v1134_v39  ;;  %3771 = vmatprep.mubr.msk.bf16.mxu0 %vm4136_vm1, %v4135_v0 }
 0x3e3   :  { %3775 = vmatprep.subr.bf16.mxu0 %v4135_v0 }
 0x3e9   :  { %3772 = vmatmul.mubr.msk.bf16.vlgmr.msra.gmra.mrb[16].mxu0 %vm341_vm5, %v1125_v43 }
 0x3ea   :  { %3776 = vmatpush3.bf16.msra.mxu0 %v1181_v44  ;;  %3777 = vmatprep.mubr.msk.bf16.mxu0 %vm4136_vm1, %v4135_v0 }
 0x3eb   :  { %3781 = vmatprep.subr.bf16.mxu0 %v4135_v0 }
 0x3f5   :  { %3778 = vmatmul.mubr.msk.bf16.vlgmr.msra.gmra.mrb[16].mxu0 %vm341_vm5, %v1121_v48 }
 0x3f6   :  { %3782 = vmatpush3.bf16.msra.mxu0 %v1232_v49  ;;  %3783 = vmatprep.mubr.msk.bf16.mxu0 %vm4136_vm1, %v4135_v0 }
 0x3f7   :  { %3805 = vmatprep.subr.bf16.mxu0 %v4135_v0 }
 0x401   :  { %3784 = vmatmul.mubr.msk.bf16.vlgmr.msra.gmra.mrb[16].mxu0 %vm341_vm5, %v1227_v53 }
 0x402   :  { %3807 = vmatprep.mubr.msk.bf16.mxu0 %vm4136_vm1, %v4135_v0  ;;  %3806 = vmatpush3.bf16.msra.mxu0 %v4095_v38 }
 0x403   :  { %3811 = vmatprep.subr.bf16.mxu0 %v4135_v0 }
 0x4b4   :  { %v4534_v57 = vpop.f32.mrb[12].mxu0 }
 0x4b5   :  { %v3743_v60 = vpop.f32.mrb[13].mxu0 }
 0x4b6   :  { %v902_v61 = vpop.f32.mrb[14].mxu0 }
 0x4b7   :  { %v3744_v62 = vpop.f32.mrb[15].mxu0 }
 0x4d4   :  { %v1268_v63 = vpop.f32.mrb[16].mxu0 }
 0x4d5   :  { %vm1277_vm3 = vcmp.ge.f32.partialorder %v1268_v63, 0.0  ;;  %v1279_v3 = vmul.f32 0.2, %v1268_v63  ;;  %1673 = vst.msk [vmem:[#allocation5 + $0x1] sm:$0xff] %vm85_vm2, %v1268_v63  ;;  %v3785_v4 = vpop.f32.mrb[17].mxu0 }
 0x4d6   :  { %v1271_v5 = vpop.f32.mrb[18].mxu0 }
 0x4d7   :  { %v1281_v6 = vsel %vm1277_vm3, %v1268_v63, %v1279_v3  ;;  %vm1278_vm5 = vcmp.ge.f32.partialorder %v1271_v5, 0.0  ;;  %v1280_v7 = vmul.f32 0.2, %v1271_v5  ;;  %1674 = vst.msk [vmem:[#allocation5 + $0x9] sm:$0xff] %vm85_vm2, %v1271_v5  ;;  %v3786_v52 = vpop.f32.mrb[19].mxu0 }
 0x4d8   :  { %1284 = vst.msk [vmem:[#allocation3 + $0x1] sm:$0xff] %vm85_vm2, %v1281_v6 }
 0x4d9   :  { %v1282_v8 = vsel %vm1278_vm5, %v1271_v5, %v1280_v7 }
 0x4da   :  { %1285 = vst.msk [vmem:[#allocation3 + $0x9] sm:$0xff] %vm85_vm2, %v1282_v8 }
 0x4de   :  { %v1679_v23 = vld [vmem:[#allocation5 + $0x1] ss:$2 sm:$0xff]  ;;  %v1676_v27 = vld [vmem:[#allocation5] ss:$2 sm:$0xff] }
 0x4df   :  { %v1291_v58 = vld [vmem:[#allocation3 + $0x1] sm:$0xff]  ;;  %v1681_v25 = vpack.c.bf16 %v1679_v23, %v1679_v23  ;;  %v1678_v30 = vpack.c.bf16 %v1676_v27, %v1676_v27  ;;  %v1774_v32 = vld [vmem:[#allocation5 + $0x2] ss:$2 sm:$0xff] }
 0x4e0   :  { %v1287_v15 = vld [vmem:[#allocation3] sm:$0xff]  ;;  %v1776_v34 = vpack.c.bf16 %v1774_v32, %v1774_v32 }
 0x4e1   :  { %v1292_v10 = vld [vmem:[#allocation3 + $0x9] sm:$0xff]  ;;  %v1824_v36 = vld [vmem:[#allocation5 + $0x3] ss:$2 sm:$0xff] }
 0x4e2   :  { %v1294_v11 = vpack.c.bf16 %v1292_v10, %v1291_v58  ;;  %v1288_v13 = vld [vmem:[#allocation3 + $0x8] sm:$0xff]  ;;  %v1826_v37 = vpack.c.bf16 %v1824_v36, %v1824_v36  ;;  %v1876_v36 = vsel %vm685_vm14, %v4534_v57, 0.0 }
 0x4e3   :  { %v1290_v16 = vpack.c.bf16 %v1288_v13, %v1287_v15  ;;  %v1389_v18 = vld [vmem:[#allocation3 + $0x2] sm:$0xff]  ;;  %v1390_v19 = vld [vmem:[#allocation3 + $0xa] sm:$0xff]  ;;  %v1877_v38 = vrot.slane %v1876_v36, 4 }
 0x4e4   :  { %3790 = vmatmul.mubr.msk.bf16.vlgmr.msra.gmra.mrb[36].mxu1 %vm85_vm2, %v1294_v11  ;;  %v1392_v21 = vpack.c.bf16 %v1390_v19, %v1389_v18 }
 0x4e5   :  { %3794 = vmatpush3.bf16.msra.mxu1 %v1346_v12  ;;  %3795 = vmatprep.mubr.msk.bf16.mxu1 %vm4136_vm1, %v4135_v0 }
 0x4e6   :  { %3799 = vmatprep.subr.bf16.mxu1 %v4135_v0 }
 0x4ec   :  { %3796 = vmatmul.mubr.msk.bf16.vlgmr.msra.gmra.mrb[40].mxu1 %vm85_vm2, %v1290_v16 }
 0x4ed   :  { %3800 = vmatpush3.bf16.msra.mxu1 %v1397_v17  ;;  %3801 = vmatprep.mubr.msk.bf16.mxu1 %vm4136_vm1, %v4135_v0 }
 0x4ee   :  { %3829 = vmatprep.subr.bf16.mxu1 %v4135_v0 }
 0x4f4   :  { %3802 = vmatmul.mubr.msk.bf16.vlgmr.msra.gmra.mrb[44].mxu1 %vm85_vm2, %v1392_v21 }
 0x4f5   :  { %3830 = vmatpush3.bf16.msra.mxu1 %v1686_v22  ;;  %3831 = vmatprep.mubr.msk.bf16.mxu1 %vm4136_vm1, %v4135_v0 }
 0x4f6   :  { %3835 = vmatprep.subr.bf16.mxu1 %v4135_v0 }
 0x4fc   :  { %3832 = vmatmul.mubr.msk.bf16.vlgmr.msra.gmra.mrb[48].mxu1 %vm85_vm2, %v1681_v25 }
 0x4fd   :  { %3836 = vmatpush3.bf16.msra.mxu1 %v1732_v26  ;;  %3837 = vmatprep.mubr.msk.bf16.mxu1 %vm4136_vm1, %v4135_v0 }
 0x4fe   :  { %3841 = vmatprep.subr.bf16.mxu1 %v4135_v0 }
 0x504   :  { %3838 = vmatmul.mubr.msk.bf16.vlgmr.msra.gmra.mrb[52].mxu1 %vm85_vm2, %v1678_v30 }
 0x505   :  { %3842 = vmatpush3.bf16.msra.mxu1 %v1781_v31  ;;  %3843 = vmatprep.mubr.msk.bf16.mxu1 %vm4136_vm1, %v4135_v0 }
 0x506   :  { %3847 = vmatprep.subr.bf16.mxu1 %v4135_v0 }
 0x50c   :  { %3844 = vmatmul.mubr.msk.bf16.vlgmr.msra.gmra.mrb[56].mxu1 %vm85_vm2, %v1776_v34  ;;  %v4100_v34 = vld [vmem:[%s4914_s14] sm:$0xff]  }
 0x50d   :  { %3848 = vmatpush3.bf16.msra.mxu1 %v1831_v35  ;;  %3849 = vmatprep.mubr.msk.bf16.mxu1 %vm4136_vm1, %v4135_v0  ;;  %v1883_v35 = vmul.f32 %v4534_v57, %v4534_v57 }
 0x50e   :  { %3859 = vmatprep.subr.bf16.mxu1 %v4135_v0 }
 0x514   :  { %3850 = vmatmul.mubr.msk.bf16.vlgmr.msra.gmra.mrb[60].mxu1 %vm85_vm2, %v1826_v37  ;;  %v1884_v37 = vsel %vm685_vm14, %v1883_v35, 0.0 }
 0x515   :  { %3861 = vmatprep.mubr.msk.bf16.mxu1 %vm4136_vm1, %v4135_v0  ;;  %3860 = vmatpush3.bf16.msra.mxu1 %v4100_v34 }
 0x516   :  { %3871 = vmatprep.subr.bf16.mxu1 %v4135_v0 }
 0x5b7   :  { %v1335_v39 = vpop.f32.mrb[36].mxu1 }
 0x5b8   :  { %v3791_v40 = vpop.f32.mrb[37].mxu1 }
 0x5b9   :  { %v1338_v41 = vpop.f32.mrb[38].mxu1  ;;  %v1878_v40 = vadd.f32 %v1877_v38, %v1876_v36 }
 0x5ba   :  { %v3792_v42 = vpop.f32.mrb[39].mxu1 }
 0x5bb   :  { %v1879_v42 = vrot.slane %v1878_v40, 2 }
 0x5bf   :  { %v1382_v43 = vpop.f32.mrb[40].mxu1 }
 0x5c0   :  { %v1383_v44 = vadd.f32 %v1382_v43, %v1335_v39  ;;  %v3797_v45 = vpop.f32.mrb[41].mxu1  ;;  %v1885_v39 = vrot.slane %v1884_v37, 4 }
 0x5c1   :  { %v1385_v46 = vpop.f32.mrb[42].mxu1 }
 0x5c2   :  { %v1386_v47 = vadd.f32 %v1385_v46, %v1338_v41  ;;  %v3798_v48 = vpop.f32.mrb[43].mxu1  ;;  %v1886_v41 = vadd.f32 %v1885_v39, %v1884_v37 }
 0x5c7   :  { %v1433_v49 = vpop.f32.mrb[44].mxu1 }
 0x5c8   :  { %v1440_v50 = vadd.f32 %v1433_v49, %v1383_v44  ;;  %v3803_v51 = vpop.f32.mrb[45].mxu1 }
 0x5c9   :  { %v1436_v53 = vpop.f32.mrb[46].mxu1 }
 0x5ca   :  { %v1446_v55 = vadd.f32 %v4384_v1, %v1440_v50  ;;  %v1441_v56 = vadd.f32 %v1436_v53, %v1386_v47  ;;  %v3804_v60 = vpop.f32.mrb[47].mxu1  ;;  %v1887_v47 = vrot.slane %v1886_v41, 2  ;;  %v1880_v53 = vadd.f32 %v1879_v42, %v1878_v40 }
 0x5cc   :  { %vm1448_vm0 = vcmp.ge.f32.partialorder %v1446_v55, 0.0  ;;  %v1450_v61 = vmul.f32 0.2, %v1446_v55  ;;  %v1447_v62 = vadd.f32 %v4384_v1, %v1441_v56  ;;  %v4096_v1 = vld [vmem:[%s4913_s8] sm:$0xff]   ;;  %v1888_v60 = vadd.f32 %v1887_v47, %v1886_v41 }
 0x5cd   :  { %v4103_v47 = vld [vmem:[%s4915_s16] sm:$0xff]  }
 0x5ce   :  { %v1452_v63 = vsel %vm1448_vm0, %v1446_v55, %v1450_v61  ;;  %vm1449_vm2 = vcmp.ge.f32.partialorder %v1447_v62, 0.0  ;;  %v1451_v3 = vmul.f32 0.2, %v1447_v62 }
 0x5cf   :  { %1455 = vst.msk [vmem:[#allocation4 + $0x1] sm:$0xff] %vm685_vm14, %v1452_v63  ;;  %v1722_v4 = vpop.f32.mrb[48].mxu1  ;;  %v1881_v63 = vrot.slane %v1880_v53, 1 }
 0x5d0   :  { %v1453_v5 = vsel %vm1449_vm2, %v1447_v62, %v1451_v3  ;;  %v3833_v6 = vpop.f32.mrb[49].mxu1 }
 0x5d1   :  { %1456 = vst.msk [vmem:[#allocation4 + $0x9] sm:$0xff] %vm685_vm14, %v1453_v5  ;;  %v1725_v7 = vpop.f32.mrb[50].mxu1  ;;  %v1889_v5 = vrot.slane %v1888_v60, 1 }
 0x5d2   :  { %v3834_v52 = vpop.f32.mrb[51].mxu1 }
 0x5d3   :  { %v1882_v52 = vadd.f32 %v1881_v63, %v1880_v53  ;;  %v4108_v63 = vld [vmem:[%s4918_s15 + $0x18] sm:$0xff]  }
 0x5d7   :  { %v1768_v8 = vpop.f32.mrb[52].mxu1 }
 0x5d8   :  { %v1769_v9 = vadd.f32 %v1768_v8, %v1722_v4  ;;  %v3839_v58 = vpop.f32.mrb[53].mxu1  ;;  %v1462_v10 = vld [vmem:[#allocation4 + $0x1] ss:$2 sm:$0xff]  ;;  %v1458_v19 = vld [vmem:[#allocation4] ss:$2 sm:$0xff] }
 0x5d9   :  { %v1771_v11 = vpop.f32.mrb[54].mxu1  ;;  %v1465_v12 = vpack.c.bf16 %v1462_v10, %v1462_v10  ;;  %v1461_v21 = vpack.c.bf16 %v1458_v19, %v1458_v19  ;;  %v1564_v27 = vld [vmem:[#allocation4 + $0x2] ss:$2 sm:$0xff]  ;;  %v1618_v31 = vld [vmem:[#allocation4 + $0x3] ss:$2 sm:$0xff]  ;;  %v1890_v58 = vadd.f32 %v1889_v5, %v1888_v60 }
 0x5da   :  { %v3840_v13 = vpop.f32.mrb[55].mxu1  ;;  %v1567_v30 = vpack.c.bf16 %v1564_v27, %v1564_v27  ;;  %v1621_v32 = vpack.c.bf16 %v1618_v31, %v1618_v31  ;;  %v1874_v19 = vld [vmem:[%s4916_s12] sm:$0x1] }
 0x5db   :  { %3808 = vmatmul.mubr.msk.bf16.vlgmr.msra.gmra.mrb[20].mxu0 %vm685_vm14, %v1465_v12 }
 0x5dc   :  { %3812 = vmatpush3.bf16.msra.mxu0 %v4096_v1  ;;  %3813 = vmatprep.mubr.msk.bf16.mxu0 %vm4136_vm1, %v4135_v0 }
 0x5dd   :  { %3817 = vmatprep.subr.bf16.mxu0 %v4135_v0 }
 0x5df   :  { %v1817_v14 = vpop.f32.mrb[56].mxu1 }
 0x5e0   :  { %v1823_v15 = vadd.f32 %v1817_v14, %v1769_v9  ;;  %v3845_v16 = vpop.f32.mrb[57].mxu1 }
 0x5e1   :  { %v1820_v17 = vpop.f32.mrb[58].mxu1 }
 0x5e2   :  { %v3846_v18 = vpop.f32.mrb[59].mxu1 }
 0x5e7   :  { %3814 = vmatmul.mubr.msk.bf16.vlgmr.msra.gmra.mrb[20].mxu0 %vm685_vm14, %v1461_v21  ;;  %v1867_v22 = vpop.f32.mrb[60].mxu1 }
 0x5e8   :  { %3818 = vmatpush3.bf16.msra.mxu0 %v4097_v20  ;;  %v4610_v23 = vadd.f32 %v1867_v22, %v1823_v15  ;;  %v3851_v24 = vpop.f32.mrb[61].mxu1  ;;  %3819 = vmatprep.mubr.msk.bf16.mxu0 %vm4136_vm1, %v4135_v0 }
 0x5e9   :  { %v1870_v25 = vpop.f32.mrb[62].mxu1  ;;  %3823 = vmatprep.subr.bf16.mxu0 %v4135_v0  ;;  %v3472_v24 = vld [vmem:[%s4917_s13] ss:$0 sm:$0xff] }
 0x5ea   :  { %v3852_v26 = vpop.f32.mrb[63].mxu1 }
 0x5f3   :  { %3820 = vmatmul.mubr.msk.bf16.vlgmr.msra.gmra.mrb[20].mxu0 %vm685_vm14, %v1567_v30 }
 0x5f4   :  { %3824 = vmatpush3.bf16.msra.mxu0 %v4098_v28  ;;  %3825 = vmatprep.mubr.msk.bf16.mxu0 %vm4136_vm1, %v4135_v0 }
 0x5f5   :  { %3853 = vmatprep.subr.bf16.mxu0 %v4135_v0 }
 0x5ff   :  { %3826 = vmatmul.mubr.msk.bf16.vlgmr.msra.gmra.mrb[20].mxu0 %vm685_vm14, %v1621_v32 }
 0x600   :  { %3855 = vmatprep.mubr.msk.bf16.mxu0 %vm4136_vm1, %v4135_v0  ;;  %3854 = vmatpush3.bf16.msra.mxu0 %v4099_v33 }
 0x601   :  { %3865 = vmatprep.subr.bf16.mxu0 %v4135_v0 }
 0x6d2   :  { %v1665_v43 = vpop.f32.mrb[20].mxu0 }
 0x6d3   :  { %v1891_v44 = vsel %vm685_vm14, %v1665_v43, 0.0  ;;  %v1898_v45 = vmul.f32 %v1665_v43, %v1665_v43  ;;  %v3827_v46 = vpop.f32.mrb[21].mxu0 }
 0x6d4   :  { %v1892_v48 = vrot.slane %v1891_v44, 4  ;;  %v1668_v49 = vpop.f32.mrb[22].mxu0 }
 0x6d5   :  { %v1899_v50 = vsel %vm685_vm14, %v1898_v45, 0.0  ;;  %v3828_v51 = vpop.f32.mrb[23].mxu0  ;;  %v4102_v45 = vld [vmem:[%s4915_s16 + $0x8] sm:$0xff]   ;;  %v4104_v49 = vld [vmem:[%s4915_s16 + $0x10] sm:$0xff]  }
 0x6d6   :  { %v1893_v55 = vadd.f32 %v1892_v48, %v1891_v44  ;;  %v1900_v56 = vrot.slane %v1899_v50, 4  ;;  %v4105_v51 = vld [vmem:[%s4915_s16 + $0x18] sm:$0xff]  }
 0x6d8   :  { %v1894_v61 = vrot.slane %v1893_v55, 2  ;;  %v1901_v62 = vadd.f32 %v1900_v56, %v1899_v50 }
 0x6da   :  { %v1895_v3 = vadd.f32 %v1894_v61, %v1893_v55  ;;  %v1902_v4 = vrot.slane %v1901_v62, 2  ;;  %v4106_v55 = vld [vmem:[%s4914_s14] sm:$0xff]  }
 0x6dc   :  { %v1896_v6 = vrot.slane %v1895_v3, 1  ;;  %v1903_v7 = vadd.f32 %v1902_v4, %v1901_v62  ;;  %v4107_v62 = vld [vmem:[%s4918_s15 + $0x10] sm:$0xff]  }
 0x6de   :  { %v1897_v8 = vadd.f32 %v1896_v6, %v1895_v3  ;;  %v1904_v9 = vrot.slane %v1903_v7, 1 }
 0x6e0   :  { %v1905_v10 = vadd.f32 %v1904_v9, %v1903_v7  ;;  %v1906_v1 = vadd.f32 %v1897_v8, %v1882_v52 }
 0x6e2   :  { %v1907_v11 = vadd.f32 %v1905_v10, %v1890_v58  ;;  %v1909_v12 = vmul.f32 0.0625, %v1906_v1  ;;  %v2105_v1 = vrot.slane %v4381_v59, %v4469_v54 }
 0x6e4   :  { %v1910_v13 = vmul.f32 0.0625, %v1907_v11  ;;  %v1911_v14 = vmul.f32 %v1909_v12, %v1909_v12  ;;  %v1916_v15 = vsub.f32 %v4534_v57, %v1909_v12  ;;  %v1931_v16 = vsub.f32 %v1665_v43, %v1909_v12 }
 0x6e6   :  { %v1912_v17 = vsub.f32 %v1910_v13, %v1911_v14 }
 0x6e8   :  { %v1913_v18 = vadd.f32 1e-05, %v1912_v17 }
 0x6ea   :  { %4131 = vrsqrt.f32 %v1913_v18 }
 0x6f4   :  { %v4132_v20 = vpop.eup %4131 }
 0x6f5   :  { %v1915_v21 = vmul.f32 %v4132_v20, %v1874_v19 }
 0x6f7   :  { %v1920_v22 = vrot.slane %v1915_v21, %v4469_v54 }
 0x6f9   :  { %v1921_v25 = vmul.f32 %v1920_v22, %v1916_v15  ;;  %v1932_v26 = vmul.f32 %v1931_v16, %v1920_v22  ;;  %v4109_v22 = vld [vmem:[%s4918_s15] sm:$0xff]  }
 0x6fb   :  { %v1928_v27 = vadd.f32 %v3472_v24, %v1921_v25  ;;  %v1933_v57 = vadd.f32 %v3472_v24, %v1932_v26 }
 0x6fd   :  { %v1929_v28 = vadd.f32 %v1928_v27, %v4490_v29  ;;  %v1934_v30 = vadd.f32 %v1933_v57, %v4610_v23  ;;  %v4101_v23 = vld [vmem:[%s4914_s14 + $0x10] sm:$0xff]  }
 0x6ff   :  { %v1930_v31 = vmul.f32 0.70710677, %v1929_v28  ;;  %v1935_v33 = vmul.f32 0.70710677, %v1934_v30 }
 0x701   :  { %vm1936_vm6 = vcmp.ge.f32.partialorder %v1930_v31, 0.0  ;;  %v1937_v32 = vmul.f32 0.2, %v1930_v31  ;;  %2364 = vst.msk [vmem:[#allocation8 + $0x1] sm:$0xff] %vm685_vm14, %v1930_v31  ;;  %vm2583_vm7 = vcmp.ge.f32.partialorder %v1935_v33, 0.0 }
 0x702   :  { %v2584_v35 = vmul.f32 0.2, %v1935_v33 }
 0x703   :  { %v1938_v34 = vsel %vm1936_vm6, %v1930_v31, %v1937_v32  ;;  %v4110_v32 = vld [vmem:[%s4918_s15 + $0x8] sm:$0xff]  }
 0x704   :  { %1940 = vst.msk [vmem:[#allocation6 + $0x1] sm:$0xff] %vm685_vm14, %v1938_v34  ;;  %v2585_v39 = vsel %vm2583_vm7, %v1935_v33, %v2584_v35 }
 0x708   :  { %v2371_v36 = vld [vmem:[#allocation8 + $0x1] ss:$2 sm:$0xf]  ;;  %v2366_v37 = vld [vmem:[#allocation8] ss:$2 sm:$0xf] }
 0x709   :  { %3006 = vst.msk [vmem:[#allocation8] sm:$0x1] %vm683_vm12, %v4135_v0  ;;  %v2474_v38 = vld [vmem:[#allocation8 + $0x2] ss:$2 sm:$0xf]  ;;  %v2374_v48 = vpack.c.bf16 %v2371_v36, %v2371_v36  ;;  %v2369_v50 = vpack.c.bf16 %v2366_v37, %v2366_v37 }
 0x70a   :  { %v2529_v29 = vld [vmem:[#allocation8 + $0x3] ss:$2 sm:$0xf]  ;;  %v2477_v53 = vpack.c.bf16 %v2474_v38, %v2474_v38 }
 0x70b   :  { %3007 = vst.msk [vmem:[#allocation8 + $0x1] sm:$0xff] %vm685_vm14, %v1935_v33  ;;  %v1946_v40 = vld [vmem:[#allocation6 + $0x1] sm:$0xff]  ;;  %v2532_v56 = vpack.c.bf16 %v2529_v29, %v2529_v29 }
 0x70c   :  { %3008 = vst.msk [vmem:[#allocation8 + $0x9] sm:$0x1] %vm683_vm12, %v4135_v0  ;;  %v1942_v41 = vld [vmem:[#allocation6] sm:$0xff]  ;;  %v1949_v43 = vpack.c.bf16 %v1946_v40, %v1946_v40 }
 0x70d   :  { %v2048_v42 = vld [vmem:[#allocation6 + $0x2] sm:$0xff]  ;;  %v1945_v44 = vpack.c.bf16 %v1942_v41, %v1942_v41  ;;  %2586 = vst.msk [vmem:[#allocation6] sm:$0x1] %vm683_vm12, %v4135_v0 }
 0x70e   :  { %2587 = vst.msk [vmem:[#allocation6 + $0x1] sm:$0xff] %vm685_vm14, %v2585_v39  ;;  %3856 = vmatmul.mubr.msk.bf16.vlgmr.msra.gmra.mrb[24].mxu0 %vm685_vm14, %v1949_v43  ;;  %v2051_v46 = vpack.c.bf16 %v2048_v42, %v2048_v42  ;;  %v4111_v38 = vld [vmem:[%s4918_s15 + $0x20] sm:$0xff]  }
 0x70f   :  { %2588 = vst.msk [vmem:[#allocation6 + $0x9] sm:$0x1] %vm683_vm12, %v4135_v0  ;;  %3862 = vmatmul.mubr.msk.bf16.vlgmr.msra.gmra.mrb[64].mxu1 %vm685_vm14, %v1945_v44  ;;  %3866 = vmatpush3.bf16.msra.mxu0 %v4101_v23  ;;  %v4112_v23 = vld [vmem:[%s4918_s15 + $0x28] sm:$0xff]  }
 0x710   :  { %3867 = vmatprep.mubr.msk.bf16.mxu0 %vm4136_vm1, %v4135_v0  ;;  %3903 = vmatprep.subr.bf16.mxu0 %v4135_v0 }
 0x711   :  { %3875 = vmatprep.mubr.msk.bf16.mxu1 %vm4136_vm1, %v4135_v0  ;;  %3872 = vmatpush3.bf16.msra.mxu1 %v4107_v62 }
 0x712   :  { %3873 = vmatprep.subr.bf16.mxu1 %v4135_v0 }
 0x715   :  { %v2589_v60 = vld [vmem:[#allocation6] sm:$0xff]  ;;  %3874 = vmatpush3.bf16.msra.mxu1 %v4108_v63  ;;  %v4117_v63 = vld [vmem:[%s4915_s16 + $0x8] sm:$0xff]  }
 0x716   :  { %3868 = vmatmul.mubr.msk.bf16.vlgmr.msra.gmra.mrb[28].mxu0 %vm685_vm14, %v2051_v46  ;;  %v2592_v61 = vpack.c.bf16 %v2589_v60, %v2589_v60  ;;  %3879 = vmatprep.subr.bf16.mxu1 %v4135_v0  ;;  %v4116_v60 = vld [vmem:[%s4914_s14 + $0x10] sm:$0xff]   ;;  %v2695_v62 = vld [vmem:[#allocation6 + $0x2] sm:$0xff] }
 0x717   :  { %3904 = vmatpush3.bf16.msra.mxu0 %v4102_v45  ;;  %3905 = vmatprep.mubr.msk.bf16.mxu0 %vm4136_vm1, %v4135_v0  ;;  %v4113_v45 = vld [vmem:[%s4918_s15 + $0x30] sm:$0xff]  }
 0x718   :  { %3909 = vmatprep.subr.bf16.mxu0 %v4135_v0 }
 0x71e   :  { %3906 = vmatmul.mubr.msk.bf16.vlgmr.msra.gmra.mrb[32].mxu0 %vm685_vm14, %v2374_v48 }
 0x71f   :  { %3910 = vmatpush3.bf16.msra.mxu0 %v4103_v47  ;;  %3911 = vmatprep.mubr.msk.bf16.mxu0 %vm4136_vm1, %v4135_v0 }
 0x720   :  { %3915 = vmatprep.subr.bf16.mxu0 %v4135_v0 }
 0x726   :  { %3912 = vmatmul.mubr.msk.bf16.vlgmr.msra.gmra.mrb[36].mxu0 %vm685_vm14, %v2369_v50 }
 0x727   :  { %3916 = vmatpush3.bf16.msra.mxu0 %v4104_v49  ;;  %3917 = vmatprep.mubr.msk.bf16.mxu0 %vm4136_vm1, %v4135_v0 }
 0x728   :  { %3921 = vmatprep.subr.bf16.mxu0 %v4135_v0 }
 0x72e   :  { %3918 = vmatmul.mubr.msk.bf16.vlgmr.msra.gmra.mrb[40].mxu0 %vm685_vm14, %v2477_v53  ;;  %v4115_v53 = vld [vmem:[%s4914_s14 + $0x8] sm:$0xff]  }
 0x72f   :  { %3922 = vmatpush3.bf16.msra.mxu0 %v4105_v51  ;;  %3923 = vmatprep.mubr.msk.bf16.mxu0 %vm4136_vm1, %v4135_v0  ;;  %v4114_v51 = vld [vmem:[%s4918_s15 + $0x38] sm:$0xff]  }
 0x730   :  { %3933 = vmatprep.subr.bf16.mxu0 %v4135_v0 }
 0x736   :  { %3924 = vmatmul.mubr.msk.bf16.vlgmr.msra.gmra.mrb[44].mxu0 %vm685_vm14, %v2532_v56  ;;  %v2593_v56 = vld [vmem:[#allocation6 + $0x1] sm:$0xff] }
 0x737   :  { %3934 = vmatpush3.bf16.msra.mxu0 %v4106_v55  ;;  %3935 = vmatprep.mubr.msk.bf16.mxu0 %vm4136_vm1, %v4135_v0 }
 0x738   :  { %3945 = vmatprep.subr.bf16.mxu0 %v4135_v0 }
 0x73e   :  { %3936 = vmatmul.mubr.msk.bf16.vlgmr.msra.gmra.mrb[48].mxu0 %vm685_vm14, %v2592_v61  ;;  %v2596_v61 = vpack.c.bf16 %v2593_v56, %v2593_v56 }
 0x73f   :  { %3949 = vmatprep.mubr.msk.bf16.mxu0 %vm4136_vm1, %v4135_v0 }
 0x7e1   :  { %v1993_v3 = vpop.f32.mrb[24].mxu0 }
 0x7e2   :  { %v2042_v4 = vpop.f32.mrb[64].mxu1  ;;  %v3857_v6 = vpop.f32.mrb[25].mxu0 }
 0x7e3   :  { %v2043_v5 = vadd.f32 %v2042_v4, %v1993_v3  ;;  %v3863_v7 = vpop.f32.mrb[65].mxu1  ;;  %v1996_v52 = vpop.f32.mrb[26].mxu0  ;;  %v2698_v3 = vpack.c.bf16 %v2695_v62, %v2695_v62  ;;  %v3013_v4 = vld [vmem:[#allocation8 + $0x1] ss:$2 sm:$0xf]  ;;  %v4127_v62 = vld [vmem:[%s4918_s15 + $0x30] sm:$0xff]  }
 0x7e4   :  { %v2045_v8 = vpop.f32.mrb[66].mxu1  ;;  %v3858_v9 = vpop.f32.mrb[27].mxu0  ;;  %v3016_v6 = vpack.c.bf16 %v3013_v4, %v3013_v4  ;;  %v3009_v7 = vld [vmem:[#allocation8] ss:$2 sm:$0xf]  ;;  %v4119_v52 = vld [vmem:[%s4915_s16 + $0x10] sm:$0xff]  }
 0x7e5   :  { %v3864_v58 = vpop.f32.mrb[67].mxu1  ;;  %v3012_v8 = vpack.c.bf16 %v3009_v7, %v3009_v7  ;;  %v3115_v9 = vld [vmem:[#allocation8 + $0x2] ss:$2 sm:$0xf] }
 0x7e6   :  { %v4120_v58 = vld [vmem:[%s4915_s16 + $0x18] sm:$0xff]   ;;  %v4130_v7 = vld [vmem:[%s4919_s21 + $0x8] sm:$0xff]  }
 0x7e9   :  { %v2095_v10 = vpop.f32.mrb[28].mxu0 }
 0x7ea   :  { %v2101_v11 = vadd.f32 %v2095_v10, %v2043_v5  ;;  %v3869_v12 = vpop.f32.mrb[29].mxu0  ;;  %v4118_v5 = vld [vmem:[%s4915_s16] sm:$0xff]   ;;  %v3118_v10 = vpack.c.bf16 %v3115_v9, %v3115_v9 }
 0x7eb   :  { %v2098_v13 = vpop.f32.mrb[30].mxu0  ;;  %v4121_v12 = vld [vmem:[%s4918_s15 + $0x10] sm:$0xff]  }
 0x7ec   :  { %v2106_v14 = vadd.f32 %v2105_v1, %v2101_v11  ;;  %v3870_v15 = vpop.f32.mrb[31].mxu0  ;;  %v3169_v1 = vld [vmem:[#allocation8 + $0x3] ss:$2 sm:$0xf]  ;;  %3946 = vmatpush3.bf16.msra.mxu0 %v4121_v12  ;;  %v4122_v13 = vld [vmem:[%s4918_s15 + $0x18] sm:$0xff]  }
 0x7ed   :  { %v3172_v11 = vpack.c.bf16 %v3169_v1, %v3169_v1  ;;  %3947 = vmatprep.subr.bf16.mxu0 %v4135_v0 }
 0x7ee   :  { %vm2107_vm9 = vcmp.ge.f32.partialorder %v2106_v14, 0.0  ;;  %v2108_v16 = vmul.f32 0.2, %v2106_v14 }
 0x7f0   :  { %v2109_v17 = vsel %vm2107_vm9, %v2106_v14, %v2108_v16  ;;  %3948 = vmatpush3.bf16.msra.mxu0 %v4122_v13 }
 0x7f1   :  { %2112 = vst.msk [vmem:[#allocation7 + $0x1] sm:$0xff] %vm160_vm4, %v2109_v17  ;;  %v2418_v18 = vpop.f32.mrb[32].mxu0  ;;  %3953 = vmatprep.subr.bf16.mxu0 %v4135_v0 }
 0x7f2   :  { %v3907_v19 = vpop.f32.mrb[33].mxu0 }
 0x7f3   :  { %v2421_v20 = vpop.f32.mrb[34].mxu0 }
 0x7f4   :  { %v3908_v21 = vpop.f32.mrb[35].mxu0 }
 0x7f8   :  { %v2121_v24 = vld [vmem:[#allocation7 + $0x1] ss:$2 sm:$0xf]  ;;  %v2114_v59 = vld [vmem:[#allocation7] ss:$2 sm:$0xf] }
 0x7f9   :  { %v2467_v25 = vpop.f32.mrb[36].mxu0  ;;  %v2126_v26 = vpack.c.bf16 %v2121_v24, %v2121_v24  ;;  %2757 = vst.msk [vmem:[#allocation7] sm:$0x1] %vm2110_vm8, %v4135_v0  ;;  %v2301_v28 = vld [vmem:[#allocation7 + $0x3] ss:$2 sm:$0xf]  ;;  %v2119_v29 = vpack.c.bf16 %v2114_v59, %v2114_v59 }
 0x7fa   :  { %v2468_v27 = vadd.f32 %v2467_v25, %v2418_v18  ;;  %v3913_v57 = vpop.f32.mrb[37].mxu0  ;;  %2759 = vst.msk [vmem:[#allocation7 + $0x9] sm:$0x1] %vm2110_vm8, %v4135_v0  ;;  %v2238_v44 = vld [vmem:[#allocation7 + $0x2] ss:$2 sm:$0xf]  ;;  %v2306_v55 = vpack.c.bf16 %v2301_v28, %v2301_v28 }
 0x7fb   :  { %3876 = vmatmul.mubr.msk.bf16.vlgmr.msra.gmra.mrb[68].mxu1 %vm160_vm4, %v2126_v26  ;;  %v2470_v30 = vpop.f32.mrb[38].mxu0  ;;  %v2243_v47 = vpack.c.bf16 %v2238_v44, %v2238_v44 }
 0x7fc   :  { %3880 = vmatpush3.bf16.msra.mxu1 %v4109_v22  ;;  %v3914_v31 = vpop.f32.mrb[39].mxu0  ;;  %3883 = vmatprep.mubr.msk.bf16.mxu1 %vm4136_vm1, %v4135_v0 }
 0x7fd   :  { %3881 = vmatprep.subr.bf16.mxu1 %v4135_v0 }
 0x800   :  { %3882 = vmatpush3.bf16.msra.mxu1 %v4110_v32 }
 0x801   :  { %v2521_v33 = vpop.f32.mrb[40].mxu0  ;;  %3887 = vmatprep.subr.bf16.mxu1 %v4135_v0 }
 0x802   :  { %v2527_v34 = vadd.f32 %v2521_v33, %v2468_v27  ;;  %v3919_v35 = vpop.f32.mrb[41].mxu0 }
 0x803   :  { %v2524_v36 = vpop.f32.mrb[42].mxu0 }
 0x804   :  { %v3920_v37 = vpop.f32.mrb[43].mxu0  ;;  %v4123_v36 = vld [vmem:[%s4918_s15] sm:$0xff]  }
 0x807   :  { %3884 = vmatmul.mubr.msk.bf16.vlgmr.msra.gmra.mrb[68].mxu1 %vm160_vm4, %v2119_v29 }
 0x808   :  { %3888 = vmatpush3.bf16.msra.mxu1 %v4111_v38  ;;  %3891 = vmatprep.mubr.msk.bf16.mxu1 %vm4136_vm1, %v4135_v0 }
 0x809   :  { %v2576_v39 = vpop.f32.mrb[44].mxu0  ;;  %3889 = vmatprep.subr.bf16.mxu1 %v4135_v0 }
 0x80a   :  { %v4750_v40 = vadd.f32 %v2576_v39, %v2527_v34  ;;  %v3925_v41 = vpop.f32.mrb[45].mxu0 }
 0x80b   :  { %v2579_v42 = vpop.f32.mrb[46].mxu0  ;;  %v4124_v41 = vld [vmem:[%s4918_s15 + $0x8] sm:$0xff]  }
 0x80c   :  { %v3926_v43 = vpop.f32.mrb[47].mxu0  ;;  %3890 = vmatpush3.bf16.msra.mxu1 %v4112_v23 }
 0x80d   :  { %3895 = vmatprep.subr.bf16.mxu1 %v4135_v0 }
 0x811   :  { %v4756_v46 = vpop.f32.mrb[48].mxu0 }
 0x812   :  { %v3937_v48 = vpop.f32.mrb[49].mxu0 }
 0x813   :  { %3892 = vmatmul.mubr.msk.bf16.vlgmr.msra.gmra.mrb[68].mxu1 %vm160_vm4, %v2243_v47  ;;  %v2692_v49 = vpop.f32.mrb[50].mxu0  ;;  %v4125_v48 = vld [vmem:[%s4918_s15 + $0x20] sm:$0xff]  }
 0x814   :  { %3896 = vmatpush3.bf16.msra.mxu1 %v4113_v45  ;;  %v3938_v50 = vpop.f32.mrb[51].mxu0  ;;  %3899 = vmatprep.mubr.msk.bf16.mxu1 %vm4136_vm1, %v4135_v0 }
 0x815   :  { %3897 = vmatprep.subr.bf16.mxu1 %v4135_v0  ;;  %v4126_v50 = vld [vmem:[%s4918_s15 + $0x28] sm:$0xff]  }
 0x818   :  { %3898 = vmatpush3.bf16.msra.mxu1 %v4114_v51 }
 0x819   :  { %3927 = vmatprep.subr.bf16.mxu1 %v4135_v0 }
 0x81f   :  { %3900 = vmatmul.mubr.msk.bf16.vlgmr.msra.gmra.mrb[68].mxu1 %vm160_vm4, %v2306_v55 }
 0x820   :  { %3928 = vmatpush3.bf16.msra.mxu1 %v4115_v53  ;;  %3929 = vmatprep.mubr.msk.bf16.mxu1 %vm4136_vm1, %v4135_v0 }
 0x821   :  { %3939 = vmatprep.subr.bf16.mxu1 %v4135_v0 }
 0x827   :  { %3930 = vmatmul.mubr.msk.bf16.vlgmr.msra.gmra.mrb[72].mxu1 %vm685_vm14, %v2596_v61 }
 0x828   :  { %3940 = vmatpush3.bf16.msra.mxu1 %v4116_v60  ;;  %3941 = vmatprep.mubr.msk.bf16.mxu1 %vm4136_vm1, %v4135_v0 }
 0x829   :  { %3977 = vmatprep.subr.bf16.mxu1 %v4135_v0 }
 0x82f   :  { %3942 = vmatmul.mubr.msk.bf16.vlgmr.msra.gmra.mrb[76].mxu1 %vm685_vm14, %v2698_v3  ;;  %v4128_v3 = vld [vmem:[%s4918_s15 + $0x38] sm:$0xff]  }
 0x830   :  { %3978 = vmatpush3.bf16.msra.mxu1 %v4117_v63  ;;  %3979 = vmatprep.mubr.msk.bf16.mxu1 %vm4136_vm1, %v4135_v0 }
 0x831   :  { %3983 = vmatprep.subr.bf16.mxu1 %v4135_v0 }
 0x837   :  { %3980 = vmatmul.mubr.msk.bf16.vlgmr.msra.gmra.mrb[80].mxu1 %vm685_vm14, %v3016_v6  ;;  %v4129_v6 = vld [vmem:[%s4919_s21] sm:$0xff]  }
 0x838   :  { %3984 = vmatpush3.bf16.msra.mxu1 %v4118_v5  ;;  %3985 = vmatprep.mubr.msk.bf16.mxu1 %vm4136_vm1, %v4135_v0 }
 0x839   :  { %3989 = vmatprep.subr.bf16.mxu1 %v4135_v0 }
 0x83f   :  { %3986 = vmatmul.mubr.msk.bf16.vlgmr.msra.gmra.mrb[84].mxu1 %vm685_vm14, %v3012_v8 }
 0x840   :  { %3990 = vmatpush3.bf16.msra.mxu1 %v4119_v52  ;;  %3991 = vmatprep.mubr.msk.bf16.mxu1 %vm4136_vm1, %v4135_v0 }
 0x841   :  { %3995 = vmatprep.subr.bf16.mxu1 %v4135_v0 }
 0x847   :  { %3992 = vmatmul.mubr.msk.bf16.vlgmr.msra.gmra.mrb[88].mxu1 %vm685_vm14, %v3118_v10 }
 0x848   :  { %3996 = vmatpush3.bf16.msra.mxu1 %v4120_v58  ;;  %3997 = vmatprep.mubr.msk.bf16.mxu1 %vm4136_vm1, %v4135_v0 }
 0x849   :  { %4009 = vmatprep.subr.bf16.mxu1 %v4135_v0 }
 0x84f   :  { %3998 = vmatmul.mubr.msk.bf16.vlgmr.msra.gmra.mrb[92].mxu1 %vm685_vm14, %v3172_v11 }
 0x850   :  { %4013 = vmatprep.mubr.msk.bf16.mxu1 %vm4136_vm1, %v4135_v0  ;;  %4010 = vmatpush3.bf16.msra.mxu1 %v4129_v6 }
 0x851   :  { %4011 = vmatprep.subr.bf16.mxu1 %v4135_v0 }
 0x854   :  { %4012 = vmatpush3.bf16.msra.mxu1 %v4130_v7 }
 0x8f2   :  { %v4819_v14 = vpop.f32.mrb[68].mxu1 }
 0x8f3   :  { %v3901_v15 = vpop.f32.mrb[69].mxu1  ;;  %v3233_v52 = vmul.f32 %v4819_v14, %v4819_v14  ;;  %v3226_v8 = vsel %vm3225_vm11, %v4819_v14, 0.0 }
 0x8f4   :  { %v2359_v16 = vpop.f32.mrb[70].mxu1  ;;  %v3227_v58 = vrot.slane %v3226_v8, 4 }
 0x8f5   :  { %v3902_v17 = vpop.f32.mrb[71].mxu1  ;;  %v3234_v9 = vsel %vm3225_vm11, %v3233_v52, 0.0 }
 0x8f6   :  { %v3235_v10 = vrot.slane %v3234_v9, 4  ;;  %v3228_v1 = vadd.f32 %v3227_v58, %v3226_v8 }
 0x8f8   :  { %v3236_v11 = vadd.f32 %v3235_v10, %v3234_v9  ;;  %v3229_v12 = vrot.slane %v3228_v1, 2 }
 0x8fa   :  { %v2640_v18 = vpop.f32.mrb[72].mxu1  ;;  %v3237_v17 = vrot.slane %v3236_v11, 2 }
 0x8fb   :  { %v2690_v19 = vadd.f32 %v4756_v46, %v2640_v18  ;;  %v3931_v20 = vpop.f32.mrb[73].mxu1 }
 0x8fc   :  { %v2643_v21 = vpop.f32.mrb[74].mxu1 }
 0x8fd   :  { %v3932_v22 = vpop.f32.mrb[75].mxu1 }
 0x8fe   :  { %v3230_v22 = vadd.f32 %v3229_v12, %v3228_v1 }
 0x902   :  { %v2742_v24 = vpop.f32.mrb[76].mxu1 }
 0x903   :  { %v2748_v59 = vadd.f32 %v2742_v24, %v2690_v19  ;;  %v3943_v25 = vpop.f32.mrb[77].mxu1 }
 0x904   :  { %v2745_v26 = vpop.f32.mrb[78].mxu1  ;;  %v3238_v25 = vadd.f32 %v3237_v17, %v3236_v11  ;;  %v3290_v17 = vld [vmem:[%s4922_s22] sm:$0x1] }
 0x905   :  { %v2753_v27 = vadd.f32 %v4387_v2, %v2748_v59  ;;  %v3944_v57 = vpop.f32.mrb[79].mxu1 }
 0x906   :  { %v3231_v57 = vrot.slane %v3230_v22, 1 }
 0x907   :  { %vm2754_vm10 = vcmp.ge.f32.partialorder %v2753_v27, 0.0  ;;  %v2755_v28 = vmul.f32 0.2, %v2753_v27 }
 0x909   :  { %v2756_v30 = vsel %vm2754_vm10, %v2753_v27, %v2755_v28 }
 0x90a   :  { %2758 = vst.msk [vmem:[#allocation7 + $0x1] sm:$0xff] %vm160_vm4, %v2756_v30  ;;  %v3060_v31 = vpop.f32.mrb[80].mxu1 }
 0x90b   :  { %v3981_v32 = vpop.f32.mrb[81].mxu1 }
 0x90c   :  { %v3063_v33 = vpop.f32.mrb[82].mxu1 }
 0x90d   :  { %v3982_v34 = vpop.f32.mrb[83].mxu1 }
 0x90e   :  { %v3232_v34 = vadd.f32 %v3231_v57, %v3230_v22 }
 0x911   :  { %v2766_v35 = vld [vmem:[#allocation7 + $0x1] ss:$2 sm:$0xf]  ;;  %v2760_v45 = vld [vmem:[#allocation7] ss:$2 sm:$0xf] }
 0x912   :  { %v3109_v37 = vpop.f32.mrb[84].mxu1  ;;  %v2771_v38 = vpack.c.bf16 %v2766_v35, %v2766_v35  ;;  %v2765_v49 = vpack.c.bf16 %v2760_v45, %v2760_v45  ;;  %v2882_v61 = vld [vmem:[#allocation7 + $0x2] ss:$2 sm:$0xf] }
 0x913   :  { %v3110_v29 = vadd.f32 %v3109_v37, %v3060_v31  ;;  %v3987_v23 = vpop.f32.mrb[85].mxu1  ;;  %v2887_v63 = vpack.c.bf16 %v2882_v61, %v2882_v61  ;;  %v2944_v4 = vld [vmem:[#allocation7 + $0x3] ss:$2 sm:$0xf]  ;;  %v3239_v31 = vrot.slane %v3238_v25, 1 }
 0x914   :  { %3950 = vmatmul.mubr.msk.bf16.vlgmr.msra.gmra.mrb[52].mxu0 %vm160_vm4, %v2771_v38  ;;  %v3112_v2 = vpop.f32.mrb[86].mxu1  ;;  %v2949_v5 = vpack.c.bf16 %v2944_v4, %v2944_v4 }
 0x915   :  { %3954 = vmatpush3.bf16.msra.mxu0 %v4123_v36  ;;  %v3988_v39 = vpop.f32.mrb[87].mxu1  ;;  %3957 = vmatprep.mubr.msk.bf16.mxu0 %vm4136_vm1, %v4135_v0  ;;  %v3240_v37 = vadd.f32 %v3239_v31, %v3238_v25 }
 0x916   :  { %3955 = vmatprep.subr.bf16.mxu0 %v4135_v0 }
 0x919   :  { %3956 = vmatpush3.bf16.msra.mxu0 %v4124_v41 }
 0x91a   :  { %v3162_v42 = vpop.f32.mrb[88].mxu1  ;;  %3961 = vmatprep.subr.bf16.mxu0 %v4135_v0 }
 0x91b   :  { %v3168_v43 = vadd.f32 %v3162_v42, %v3110_v29  ;;  %v3993_v44 = vpop.f32.mrb[89].mxu1 }
 0x91c   :  { %v3165_v46 = vpop.f32.mrb[90].mxu1 }
 0x91d   :  { %v3994_v47 = vpop.f32.mrb[91].mxu1  ;;  %v3223_v46 = vld [vmem:[%s4920_s19] sm:$0x1] }
 0x920   :  { %3958 = vmatmul.mubr.msk.bf16.vlgmr.msra.gmra.mrb[52].mxu0 %vm160_vm4, %v2765_v49 }
 0x921   :  { %3962 = vmatpush3.bf16.msra.mxu0 %v4125_v48  ;;  %3965 = vmatprep.mubr.msk.bf16.mxu0 %vm4136_vm1, %v4135_v0 }
 0x922   :  { %v3216_v51 = vpop.f32.mrb[92].mxu1  ;;  %3963 = vmatprep.subr.bf16.mxu0 %v4135_v0 }
 0x923   :  { %v4845_v53 = vadd.f32 %v3216_v51, %v3168_v43  ;;  %v3999_v55 = vpop.f32.mrb[93].mxu1 }
 0x924   :  { %v3219_v56 = vpop.f32.mrb[94].mxu1 }
 0x925   :  { %v4000_v60 = vpop.f32.mrb[95].mxu1  ;;  %3964 = vmatpush3.bf16.msra.mxu0 %v4126_v50  ;;  %v3525_v50 = vld [vmem:[%s4921_s20] ss:$0 sm:$0xff] }
 0x926   :  { %3969 = vmatprep.subr.bf16.mxu0 %v4135_v0 }
 0x92c   :  { %3966 = vmatmul.mubr.msk.bf16.vlgmr.msra.gmra.mrb[52].mxu0 %vm160_vm4, %v2887_v63 }
 0x92d   :  { %3970 = vmatpush3.bf16.msra.mxu0 %v4127_v62  ;;  %3973 = vmatprep.mubr.msk.bf16.mxu0 %vm4136_vm1, %v4135_v0 }
 0x92e   :  { %3971 = vmatprep.subr.bf16.mxu0 %v4135_v0 }
 0x931   :  { %3972 = vmatpush3.bf16.msra.mxu0 %v4128_v3 }
 0x932   :  { %4001 = vmatprep.subr.bf16.mxu0 %v4135_v0 }
 0x938   :  { %3974 = vmatmul.mubr.msk.bf16.vlgmr.msra.gmra.mrb[52].mxu0 %vm160_vm4, %v2949_v5 }
 0x939   :  { %4005 = vmatprep.mubr.msk.bf16.mxu0 %vm4136_vm1, %v4135_v0  ;;  %4002 = vmatpush3.bf16.msra.mxu0 %v4129_v6 }
 0x93a   :  { %4003 = vmatprep.subr.bf16.mxu0 %v4135_v0 }
 0x93d   :  { %4004 = vmatpush3.bf16.msra.mxu0 %v4130_v7 }
 0xa0b   :  { %v2999_v13 = vpop.f32.mrb[52].mxu0 }
 0xa0c   :  { %v3241_v15 = vsel %vm3225_vm11, %v2999_v13, 0.0  ;;  %v3248_v0 = vmul.f32 %v2999_v13, %v2999_v13  ;;  %v3975_v16 = vpop.f32.mrb[53].mxu0 }
 0xa0d   :  { %v3242_v18 = vrot.slane %v3241_v15, 4  ;;  %v3002_v19 = vpop.f32.mrb[54].mxu0 }
 0xa0e   :  { %v3249_v20 = vsel %vm3225_vm11, %v3248_v0, 0.0  ;;  %v3976_v21 = vpop.f32.mrb[55].mxu0 }
 0xa0f   :  { %v3243_v24 = vadd.f32 %v3242_v18, %v3241_v15  ;;  %v3250_v59 = vrot.slane %v3249_v20, 4 }
 0xa11   :  { %v3244_v26 = vrot.slane %v3243_v24, 2  ;;  %v3251_v27 = vadd.f32 %v3250_v59, %v3249_v20 }
 0xa13   :  { %v3245_v28 = vadd.f32 %v3244_v26, %v3243_v24  ;;  %v3252_v30 = vrot.slane %v3251_v27, 2 }
 0xa15   :  { %v3246_v32 = vrot.slane %v3245_v28, 1  ;;  %v3253_v33 = vadd.f32 %v3252_v30, %v3251_v27 }
 0xa17   :  { %v3247_v35 = vadd.f32 %v3246_v32, %v3245_v28  ;;  %v3254_v36 = vrot.slane %v3253_v33, 1 }
 0xa19   :  { %v3255_v38 = vadd.f32 %v3254_v36, %v3253_v33  ;;  %v3256_v29 = vadd.f32 %v3247_v35, %v3232_v34 }
 0xa1b   :  { %v3257_v23 = vadd.f32 %v3255_v38, %v3240_v37  ;;  %v3259_v2 = vmul.f32 0.125, %v3256_v29 }
 0xa1d   :  { %v3260_v39 = vmul.f32 0.125, %v3257_v23  ;;  %v3261_v41 = vmul.f32 %v3259_v2, %v3259_v2  ;;  %v3266_v42 = vsub.f32 %v4819_v14, %v3259_v2  ;;  %v3281_v43 = vsub.f32 %v2999_v13, %v3259_v2 }
 0xa1f   :  { %v3262_v44 = vsub.f32 %v3260_v39, %v3261_v41 }
 0xa21   :  { %v3263_v45 = vadd.f32 1e-05, %v3262_v44 }
 0xa23   :  { %4133 = vrsqrt.f32 %v3263_v45 }
 0xa2d   :  { %v4134_v47 = vpop.eup %4133 }
 0xa2e   :  { %v3265_v48 = vmul.f32 %v4134_v47, %v3223_v46 }
 0xa30   :  { %v3270_v49 = vrot.slane %v3265_v48, %v4469_v54 }
 0xa32   :  { %v3271_v51 = vmul.f32 %v3270_v49, %v3266_v42  ;;  %v3282_v55 = vmul.f32 %v3281_v43, %v3270_v49 }
 0xa34   :  { %v3278_v56 = vadd.f32 %v3525_v50, %v3271_v51  ;;  %v3283_v14 = vadd.f32 %v3525_v50, %v3282_v55 }
 0xa36   :  { %v3279_v60 = vadd.f32 %v3278_v56, %v4750_v40  ;;  %v3284_v61 = vadd.f32 %v3283_v14, %v4845_v53 }
 0xa38   :  { %v3280_v62 = vmul.f32 0.70710677, %v3279_v60  ;;  %v3285_v63 = vmul.f32 0.70710677, %v3284_v61 }
 0xa3a   :  { %vm3291_vm1 = vcmp.ge.f32.partialorder %v3280_v62, 0.0  ;;  %v3292_v3 = vmul.f32 0.2, %v3280_v62  ;;  %vm3359_vm12 = vcmp.ge.f32.partialorder %v3285_v63, 0.0  ;;  %v3360_v4 = vmul.f32 0.2, %v3285_v63 }
 0xa3c   :  { %v3293_v5 = vsel %vm3291_vm1, %v3280_v62, %v3292_v3  ;;  %v3361_v54 = vsel %vm3359_vm12, %v3285_v63, %v3360_v4 }
 0xa3d   :  { %v3362_v6 = vsel %vm3225_vm11, %v3361_v54, 0.0  ;;  %v3294_v7 = vsel %vm3225_vm11, %v3293_v5, 0.0 }
 0xa3e   :  { %v3363_v52 = vrot.slane %v3362_v6, 4  ;;  %v3295_v8 = vrot.slane %v3294_v7, 4 }
 0xa40   :  { %v3296_v9 = vadd.f32 %v3295_v8, %v3294_v7  ;;  %v3364_v58 = vadd.f32 %v3363_v52, %v3362_v6 }
 0xa42   :  { %v3297_v10 = vrot.slane %v3296_v9, 2  ;;  %v3365_v40 = vrot.slane %v3364_v58, 2 }
 0xa44   :  { %v3298_v1 = vadd.f32 %v3297_v10, %v3296_v9  ;;  %v3366_v53 = vadd.f32 %v3365_v40, %v3364_v58 }
 0xa46   :  { %v3299_v11 = vrot.slane %v3298_v1, 1  ;;  %v3367_v12 = vrot.slane %v3366_v53, 1 }
 0xa48   :  { %v3300_v13 = vadd.f32 %v3299_v11, %v3298_v1  ;;  %v3368_v15 = vadd.f32 %v3367_v12, %v3366_v53 }
 0xa4a   :  { %v3301_v0 = vpack.c.bf16 %v3300_v13, %v3300_v13  ;;  %v3369_v16 = vpack.c.bf16 %v3368_v15, %v3368_v15 }
 0xa4c   :  { %4006 = vmatmul.mubr.msk.bf16.vlgmr.msra.gmra.mrb[56].mxu0 %vm160_vm4, %v3301_v0  ;;  %4014 = vmatmul.mubr.msk.bf16.vlgmr.msra.gmra.mrb[96].mxu1 %vm160_vm4, %v3369_v16 }
 0xb1f   :  { %v3351_v18 = vpop.f32.mrb[56].mxu0  ;;  %v3407_v19 = vpop.f32.mrb[96].mxu1 }
 0xb20   :  { %v3352_v20 = vadd.f32 %v3351_v18, %v3290_v17  ;;  %v3408_v21 = vadd.f32 %v3407_v19, %v3290_v17  ;;  %v4007_v22 = vpop.f32.mrb[57].mxu0  ;;  %v4015_v24 = vpop.f32.mrb[97].mxu1 }
 0xb21   :  { %v3354_v59 = vpop.f32.mrb[58].mxu0  ;;  %v3410_v25 = vpop.f32.mrb[98].mxu1 }
 0xb22   :  { %3358 = vst.msk [vmem:[%s4923_s23] sm:$0x1] %vm3357_vm13, %v3352_v20  ;;  %3413 = vst.msk [vmem:[%s4923_s23 + $0x1] sm:$0x1] %vm3357_vm13, %v3408_v21  ;;  %v4008_v26 = vpop.f32.mrb[59].mxu0  ;;  %v4016_v27 = vpop.f32.mrb[99].mxu1 }

</bundles_post_ra>
